<compile_context>
chip_gen: v7x
topology: tpu7x:2x2x1
jax: 0.10.0
libtpu: 0.0.40
codegen_flags: <defaults>
</compile_context>

<pallas_src>
import jax
import jax.numpy as jnp
from jax import lax
from jax.experimental import pallas as pl
from jax.experimental.pallas import tpu as pltpu

C_IN = 3
C_OUT = 32
KSIZE = 3
HID = 256


def _round_up(n, m):
    return ((n + m - 1) // m) * m


def _sim_encoder_kernel(x_ref, wc_ref, bc_ref, wih_ref, whh_ref, bgi_ref, bhn_ref,
                        out_ref, gi_ref):
    # x_ref:   (1, T*BB, K*C_IN) conv-unfolded, time-major rows (row index = t*BB + b)
    # wc_ref:  (K*C_IN, C_OUT)   fused conv taps
    # bc_ref:  (1, C_OUT)
    # wih_ref: (C_OUT, 3H)  whh_ref: (HID, 3H)       (f32 or bf16 MXU operands)
    # bgi_ref: (1, 3H) = b_ih with b_hh_r / b_hh_z folded in
    # bhn_ref: (1, H)  = b_hh_n
    # out_ref: (BB, H)  final hidden state for this batch block
    # gi_ref:  (T*BB, 3H) f32 scratch: hoisted input projection for all timesteps
    TB = gi_ref.shape[0]
    BB, H = out_ref.shape
    T = TB // BB

    # ---- hoisted, batched pre-pass (one MXU pass each; off the serial critical path) ----
    xw = x_ref[0]                                                      # (T*BB, 9)
    xe = jnp.dot(xw, wc_ref[...], preferred_element_type=jnp.float32) + bc_ref[...]
    xe = jnp.maximum(xe, 0.0)                                          # conv + ReLU
    xe = xe.astype(wih_ref.dtype)
    gi_ref[...] = (jnp.dot(xe, wih_ref[...], preferred_element_type=jnp.float32)
                   + bgi_ref[...])

    # per-gate slices of W_hh, loaded once (static, lane-aligned: 2H = 512 is 128-aligned)
    whh_rz = whh_ref[:, 0:2 * H]                                       # (H, 2H)
    whh_n = whh_ref[:, 2 * H:3 * H]                                    # (H, H)
    b_hn = bhn_ref[...]                                                # (1, H)

    def sigmoid(v):
        # exact sigmoid via one EUP tanh instead of exp + reciprocal
        return 0.5 * jnp.tanh(0.5 * v) + 0.5

    # ---- GRU recurrence (PyTorch gate order r, z, n); only gh = h @ W_hh remains ----
    def step(t, h):
        row = pl.multiple_of(t * BB, BB)
        gi_t = gi_ref[pl.ds(row, BB), :]                               # (BB, 3H)
        hd = h.astype(whh_rz.dtype)
        gh_rz = jnp.dot(hd, whh_rz, preferred_element_type=jnp.float32)        # (BB, 2H)
        gh_n = jnp.dot(hd, whh_n, preferred_element_type=jnp.float32) + b_hn   # (BB, H)
        r = sigmoid(gi_t[:, 0:H] + gh_rz[:, 0:H])
        z = sigmoid(gi_t[:, H:2 * H] + gh_rz[:, H:2 * H])
        n = jnp.tanh(gi_t[:, 2 * H:3 * H] + r * gh_n)
        return (1.0 - z) * n + z * h

    h0 = jnp.zeros((BB, H), jnp.float32)
    h_final = lax.fori_loop(0, T, step, h0, unroll=(True if T <= 16 else 8))
    out_ref[...] = h_final


def similarity_encoder_forward(X, params, *, use_bf16_matmul=False):
    """X: (B, T, C_IN) float32.  Returns final GRU hidden state: (B, HID) float32."""
    B, T, cin = X.shape
    assert cin == C_IN
    wc9, bc, wih_t, whh_t, b_gi, b_hn = params

    # ---- batch blocking: make the batch axis the MXU M dimension ----
    # Cap BB so the hoisted gi scratch (T*BB x 3H f32) stays well inside VMEM on every
    # generation (v5e 16 MiB scoped default, v7x 64 MiB physical).
    row_bytes = T * 3 * HID * 4
    bb_budget = max(8, (8 << 20) // max(row_bytes, 1))
    BB = max(8, min(128, (bb_budget // 8) * 8))
    BB = min(BB, _round_up(B, 8))
    B_pad = _round_up(B, BB)
    nb = B_pad // BB
    # TODO(synk): for very long T, additionally chunk the gi precompute over T instead of
    # only shrinking BB.

    # ---- layout plumbing in XLA (not the hot path): pad time for conv padding=1,
    # unfold the 3 conv taps onto the lane axis, pad batch, and pre-block so each grid
    # step sees a contiguous time-major (T*BB, 9) slab.
    xp = jnp.pad(X, ((0, B_pad - B), (1, 1), (0, 0)))                  # (B_pad, T+2, 3)
    xw = jnp.concatenate([xp[:, 0:T], xp[:, 1:T + 1], xp[:, 2:T + 2]], axis=-1)
    x_blk = (xw.reshape(nb, BB, T, KSIZE * C_IN)
               .transpose(0, 2, 1, 3)
               .reshape(nb, T * BB, KSIZE * C_IN))

    mm_dtype = jnp.bfloat16 if use_bf16_matmul else jnp.float32
    x_blk = x_blk.astype(mm_dtype)
    wc9 = wc9.astype(mm_dtype)
    wih = wih_t.astype(mm_dtype)
    whh = whh_t.astype(mm_dtype)

    # ---- VMEM budget: only raise the scoped limit when the tile actually needs it ----
    bytes_per = 2 if use_bf16_matmul else 4
    gi_bytes = T * BB * 3 * HID * 4
    x_bytes = T * BB * KSIZE * C_IN * bytes_per
    w_bytes = (KSIZE * C_IN * C_OUT + C_OUT * 3 * HID + HID * 3 * HID) * bytes_per \
        + (C_OUT + 3 * HID + HID) * 4
    out_bytes = BB * HID * 4
    vmem_est = gi_bytes + 2 * (x_bytes + w_bytes + out_bytes) + (2 << 20)
    vmem_limit = int(min(vmem_est, 96 << 20)) if vmem_est > (14 << 20) else None

    out_pad = pl.pallas_call(
        _sim_encoder_kernel,
        out_shape=jax.ShapeDtypeStruct((B_pad, HID), jnp.float32),
        grid=(nb,),
        in_specs=[
            pl.BlockSpec((1, T * BB, KSIZE * C_IN), lambda i: (i, 0, 0)),
            pl.BlockSpec((KSIZE * C_IN, C_OUT), lambda i: (0, 0)),
            pl.BlockSpec((1, C_OUT), lambda i: (0, 0)),
            pl.BlockSpec((C_OUT, 3 * HID), lambda i: (0, 0)),
            pl.BlockSpec((HID, 3 * HID), lambda i: (0, 0)),
            pl.BlockSpec((1, 3 * HID), lambda i: (0, 0)),
            pl.BlockSpec((1, HID), lambda i: (0, 0)),
        ],
        out_specs=pl.BlockSpec((BB, HID), lambda i: (i, 0)),
        scratch_shapes=[pltpu.VMEM((T * BB, 3 * HID), jnp.float32)],
        compiler_params=pltpu.CompilerParams(
            dimension_semantics=("parallel",),
            vmem_limit_bytes=vmem_limit),
    )(x_blk, wc9, bc, wih, whh, b_gi, b_hn)

    return out_pad[:B]


def init_params(key):
    """Deterministic kaiming_normal-style init (gain=sqrt(2)/sqrt(fan_in)); biases zero."""
    k1, k2, k3 = jax.random.split(key, 3)
    # PyTorch conv weight (C_OUT, C_IN, K) -> (K, C_IN, C_OUT) -> (K*C_IN, C_OUT):
    # tap-major rows matching the lane-concatenated shifted window built in the wrapper.
    conv_w = jax.random.normal(k1, (C_OUT, C_IN, KSIZE), jnp.float32) * jnp.sqrt(
        2.0 / (C_IN * KSIZE))
    wc9 = jnp.transpose(conv_w, (2, 1, 0)).reshape(KSIZE * C_IN, C_OUT)
    bc = jnp.zeros((1, C_OUT), jnp.float32)
    # GRU weights: weight_ih_l0 (3H, C_OUT), weight_hh_l0 (3H, HID); gate order r,z,n.
    w_ih = jax.random.normal(k2, (3 * HID, C_OUT), jnp.float32) * jnp.sqrt(2.0 / C_OUT)
    w_hh = jax.random.normal(k3, (3 * HID, HID), jnp.float32) * jnp.sqrt(2.0 / HID)
    wih_t = jnp.transpose(w_ih)            # (C_OUT, 3H)
    whh_t = jnp.transpose(w_hh)            # (HID, 3H)
    bih = jnp.zeros((3 * HID,), jnp.float32)
    bhh = jnp.zeros((3 * HID,), jnp.float32)
    # Fold b_hh_r / b_hh_z into the hoisted input-projection bias; keep b_hh_n separate
    # because PyTorch computes n = tanh(gi_n + b_in + r * (gh_n + b_hn)).
    b_gi = bih.at[:2 * HID].add(bhh[:2 * HID]).reshape(1, 3 * HID)
    b_hn = bhh[2 * HID:].reshape(1, HID)
    return wc9, bc, wih_t, whh_t, b_gi, b_hn


def reference_forward(X, params):
    """Pure-JAX reference (same math as PyTorch Conv1d+ReLU+GRU final hidden state)."""
    wc9, bc, wih_t, whh_t, b_gi, b_hn = params
    B, T, _ = X.shape
    xp = jnp.pad(X, ((0, 0), (1, 1), (0, 0)))
    xw = jnp.concatenate([xp[:, 0:T], xp[:, 1:T + 1], xp[:, 2:T + 2]], axis=-1)
    xe = jnp.maximum(xw @ wc9 + bc, 0.0)                               # (B, T, 32)
    gi = xe @ wih_t + b_gi                                             # (B, T, 3H)

    def step(h, gi_t):
        gh = h @ whh_t
        r = jax.nn.sigmoid(gi_t[:, :HID] + gh[:, :HID])
        z = jax.nn.sigmoid(gi_t[:, HID:2 * HID] + gh[:, HID:2 * HID])
        n = jnp.tanh(gi_t[:, 2 * HID:] + r * (gh[:, 2 * HID:] + b_hn))
        return (1.0 - z) * n + z * h, None

    h, _ = lax.scan(step, jnp.zeros((B, HID), jnp.float32), jnp.transpose(gi, (1, 0, 2)))
    return h


if __name__ == "__main__":
    key = jax.random.PRNGKey(0)
    kx, kp = jax.random.split(key)
    B, T = 2, 8
    # NOTE: module docstring says (b, T, 2) but Conv1d has channel_in=3; use C_IN=3.
    X = jax.random.normal(kx, (B, T, C_IN), jnp.float32)
    params = init_params(kp)

    out = similarity_encoder_forward(X, params)
    out = jax.block_until_ready(out)
    assert out.shape == (B, HID) and out.dtype == jnp.float32

    ref = jax.block_until_ready(reference_forward(X, params))
    assert jnp.allclose(out, ref, atol=2e-4, rtol=2e-4), float(jnp.max(jnp.abs(out - ref)))
    print("KERNEL_OK")
</pallas_src>

<mosaic_0001>
module attributes {stable_mosaic.version = 11 : i64} {
  func.func @_sim_encoder_kernel(%arg0: i32, %arg1: memref<1x64x9xf32, #tpu.memory_space<vmem>>, %arg2: memref<9x32xf32, #tpu.memory_space<vmem>>, %arg3: memref<1x32xf32, #tpu.memory_space<vmem>>, %arg4: memref<32x768xf32, #tpu.memory_space<vmem>>, %arg5: memref<256x768xf32, #tpu.memory_space<vmem>>, %arg6: memref<1x768xf32, #tpu.memory_space<vmem>>, %arg7: memref<1x256xf32, #tpu.memory_space<vmem>>, %arg8: memref<8x256xf32, #tpu.memory_space<vmem>>, %arg9: memref<64x768xf32, #tpu.memory_space<vmem>>) attributes {dimension_semantics = [#tpu.dimension_semantics<parallel>], iteration_bounds = array<i64: 1>, scalar_prefetch = 0 : i64, scratch_operands = 1 : i64, tpu.core_type = #tpu.core_type<tc>, window_params = [{transform_indices = @transform_0, window_bounds = array<i64: 1, 64, 9>}, {pipeline_mode = #tpu.pipeline_mode<synchronous>, transform_indices = @transform_1, window_bounds = array<i64: 9, 32>}, {pipeline_mode = #tpu.pipeline_mode<synchronous>, transform_indices = @transform_2, window_bounds = array<i64: 1, 32>}, {pipeline_mode = #tpu.pipeline_mode<synchronous>, transform_indices = @transform_3, window_bounds = array<i64: 32, 768>}, {pipeline_mode = #tpu.pipeline_mode<synchronous>, transform_indices = @transform_4, window_bounds = array<i64: 256, 768>}, {pipeline_mode = #tpu.pipeline_mode<synchronous>, transform_indices = @transform_5, window_bounds = array<i64: 1, 768>}, {pipeline_mode = #tpu.pipeline_mode<synchronous>, transform_indices = @transform_6, window_bounds = array<i64: 1, 256>}, {transform_indices = @transform_7, window_bounds = array<i64: 8, 256>}]} {
    %c0 = arith.constant 0 : index
    %c0_0 = arith.constant 0 : index
    %c0_1 = arith.constant 0 : index
    %0 = vector.load %arg1[%c0, %c0_0, %c0_1] : memref<1x64x9xf32, #tpu.memory_space<vmem>>, vector<1x64x9xf32>
    %1 = vector.shape_cast %0 : vector<1x64x9xf32> to vector<64x9xf32>
    %c0_2 = arith.constant 0 : index
    %c0_3 = arith.constant 0 : index
    %2 = vector.load %arg2[%c0_2, %c0_3] : memref<9x32xf32, #tpu.memory_space<vmem>>, vector<9x32xf32>
    %cst = arith.constant dense<0.000000e+00> : vector<64x32xf32>
    %3 = tpu.matmul %1, %2, %cst {dimension_numbers = #tpu.dot_dimension_numbers<[1], [0], [0], [1], [0, 0, 1, 1], [], []>} : vector<64x9xf32>, vector<9x32xf32>, vector<64x32xf32> -> vector<64x32xf32>
    %c0_4 = arith.constant 0 : index
    %c0_5 = arith.constant 0 : index
    %4 = vector.load %arg3[%c0_4, %c0_5] : memref<1x32xf32, #tpu.memory_space<vmem>>, vector<1x32xf32>
    %5 = vector.broadcast %4 : vector<1x32xf32> to vector<64x32xf32>
    %6 = arith.addf %3, %5 : vector<64x32xf32>
    %cst_6 = arith.constant 0.000000e+00 : f32
    %7 = vector.broadcast %cst_6 : f32 to vector<64x32xf32>
    %8 = arith.maximumf %6, %7 : vector<64x32xf32>
    %c0_7 = arith.constant 0 : index
    %c0_8 = arith.constant 0 : index
    %9 = vector.load %arg4[%c0_7, %c0_8] : memref<32x768xf32, #tpu.memory_space<vmem>>, vector<32x768xf32>
    %cst_9 = arith.constant dense<0.000000e+00> : vector<64x768xf32>
    %10 = tpu.matmul %8, %9, %cst_9 {dimension_numbers = #tpu.dot_dimension_numbers<[1], [0], [0], [1], [0, 0, 1, 1], [], []>} : vector<64x32xf32>, vector<32x768xf32>, vector<64x768xf32> -> vector<64x768xf32>
    %c0_10 = arith.constant 0 : index
    %c0_11 = arith.constant 0 : index
    %11 = vector.load %arg6[%c0_10, %c0_11] : memref<1x768xf32, #tpu.memory_space<vmem>>, vector<1x768xf32>
    %12 = vector.broadcast %11 : vector<1x768xf32> to vector<64x768xf32>
    %13 = arith.addf %10, %12 : vector<64x768xf32>
    %c0_12 = arith.constant 0 : index
    %c0_13 = arith.constant 0 : index
    %14 = vector.load %arg9[%c0_12, %c0_13] : memref<64x768xf32, #tpu.memory_space<vmem>>, vector<64x768xf32>
    tpu.vector_store %arg9[%c0_12, %c0_13], %13 {strides = array<i32>} : memref<64x768xf32, #tpu.memory_space<vmem>>, vector<64x768xf32>,
    %c0_14 = arith.constant 0 : index
    %c0_15 = arith.constant 0 : index
    %15 = vector.load %arg5[%c0_14, %c0_15] : memref<256x768xf32, #tpu.memory_space<vmem>>, vector<256x512xf32>
    %c0_16 = arith.constant 0 : index
    %c512 = arith.constant 512 : index
    %16 = vector.load %arg5[%c0_16, %c512] : memref<256x768xf32, #tpu.memory_space<vmem>>, vector<256x256xf32>
    %c0_17 = arith.constant 0 : index
    %c0_18 = arith.constant 0 : index
    %17 = vector.load %arg7[%c0_17, %c0_18] : memref<1x256xf32, #tpu.memory_space<vmem>>, vector<1x256xf32>
    %cst_19 = arith.constant 0.000000e+00 : f32
    %18 = vector.broadcast %cst_19 : f32 to vector<8x256xf32>
    %c0_i32 = arith.constant 0 : i32
    %c8_i32 = arith.constant 8 : i32
    %19 = arith.muli %c0_i32, %c8_i32 : i32
    %20 = tpu.assume_multiple %19, 8 : i32
    %21 = arith.index_cast %20 : i32 to index
    %c0_20 = arith.constant 0 : index
    %22 = vector.load %arg9[%21, %c0_20] : memref<64x768xf32, #tpu.memory_space<vmem>>, vector<8x768xf32>
    %cst_21 = arith.constant dense<0.000000e+00> : vector<8x512xf32>
    %23 = tpu.matmul %18, %15, %cst_21 {dimension_numbers = #tpu.dot_dimension_numbers<[1], [0], [0], [1], [0, 0, 1, 1], [], []>} : vector<8x256xf32>, vector<256x512xf32>, vector<8x512xf32> -> vector<8x512xf32>
    %cst_22 = arith.constant dense<0.000000e+00> : vector<8x256xf32>
    %24 = tpu.matmul %18, %16, %cst_22 {dimension_numbers = #tpu.dot_dimension_numbers<[1], [0], [0], [1], [0, 0, 1, 1], [], []>} : vector<8x256xf32>, vector<256x256xf32>, vector<8x256xf32> -> vector<8x256xf32>
    %25 = vector.broadcast %17 : vector<1x256xf32> to vector<8x256xf32>
    %26 = arith.addf %24, %25 : vector<8x256xf32>
    %27 = vector.extract_strided_slice %22 {offsets = [0, 0], sizes = [8, 256], strides = [1, 1]} : vector<8x768xf32> to vector<8x256xf32>
    %28 = vector.extract_strided_slice %23 {offsets = [0, 0], sizes = [8, 256], strides = [1, 1]} : vector<8x512xf32> to vector<8x256xf32>
    %29 = arith.addf %27, %28 : vector<8x256xf32>
    %cst_23 = arith.constant 5.000000e-01 : f32
    %30 = vector.broadcast %cst_23 : f32 to vector<8x256xf32>
    %31 = arith.mulf %30, %29 : vector<8x256xf32>
    %32 = math.tanh %31 : vector<8x256xf32>
    %cst_24 = arith.constant 5.000000e-01 : f32
    %33 = vector.broadcast %cst_24 : f32 to vector<8x256xf32>
    %34 = arith.mulf %33, %32 : vector<8x256xf32>
    %cst_25 = arith.constant 5.000000e-01 : f32
    %35 = vector.broadcast %cst_25 : f32 to vector<8x256xf32>
    %36 = arith.addf %34, %35 : vector<8x256xf32>
    %37 = vector.extract_strided_slice %22 {offsets = [0, 256], sizes = [8, 256], strides = [1, 1]} : vector<8x768xf32> to vector<8x256xf32>
    %38 = vector.extract_strided_slice %23 {offsets = [0, 256], sizes = [8, 256], strides = [1, 1]} : vector<8x512xf32> to vector<8x256xf32>
    %39 = arith.addf %37, %38 : vector<8x256xf32>
    %cst_26 = arith.constant 5.000000e-01 : f32
    %40 = vector.broadcast %cst_26 : f32 to vector<8x256xf32>
    %41 = arith.mulf %40, %39 : vector<8x256xf32>
    %42 = math.tanh %41 : vector<8x256xf32>
    %cst_27 = arith.constant 5.000000e-01 : f32
    %43 = vector.broadcast %cst_27 : f32 to vector<8x256xf32>
    %44 = arith.mulf %43, %42 : vector<8x256xf32>
    %cst_28 = arith.constant 5.000000e-01 : f32
    %45 = vector.broadcast %cst_28 : f32 to vector<8x256xf32>
    %46 = arith.addf %44, %45 : vector<8x256xf32>
    %47 = vector.extract_strided_slice %22 {offsets = [0, 512], sizes = [8, 256], strides = [1, 1]} : vector<8x768xf32> to vector<8x256xf32>
    %48 = arith.mulf %36, %26 : vector<8x256xf32>
    %49 = arith.addf %47, %48 : vector<8x256xf32>
    %50 = math.tanh %49 : vector<8x256xf32>
    %cst_29 = arith.constant 1.000000e+00 : f32
    %51 = vector.broadcast %cst_29 : f32 to vector<8x256xf32>
    %52 = arith.subf %51, %46 : vector<8x256xf32>
    %53 = arith.mulf %52, %50 : vector<8x256xf32>
    %54 = arith.mulf %46, %18 : vector<8x256xf32>
    %55 = arith.addf %53, %54 : vector<8x256xf32>
    %c1_i32 = arith.constant 1 : i32
    %c8_i32_30 = arith.constant 8 : i32
    %56 = arith.muli %c1_i32, %c8_i32_30 : i32
    %57 = tpu.assume_multiple %56, 8 : i32
    %58 = arith.index_cast %57 : i32 to index
    %c0_31 = arith.constant 0 : index
    %59 = vector.load %arg9[%58, %c0_31] : memref<64x768xf32, #tpu.memory_space<vmem>>, vector<8x768xf32>
    %cst_32 = arith.constant dense<0.000000e+00> : vector<8x512xf32>
    %60 = tpu.matmul %55, %15, %cst_32 {dimension_numbers = #tpu.dot_dimension_numbers<[1], [0], [0], [1], [0, 0, 1, 1], [], []>} : vector<8x256xf32>, vector<256x512xf32>, vector<8x512xf32> -> vector<8x512xf32>
    %cst_33 = arith.constant dense<0.000000e+00> : vector<8x256xf32>
    %61 = tpu.matmul %55, %16, %cst_33 {dimension_numbers = #tpu.dot_dimension_numbers<[1], [0], [0], [1], [0, 0, 1, 1], [], []>} : vector<8x256xf32>, vector<256x256xf32>, vector<8x256xf32> -> vector<8x256xf32>
    %62 = vector.broadcast %17 : vector<1x256xf32> to vector<8x256xf32>
    %63 = arith.addf %61, %62 : vector<8x256xf32>
    %64 = vector.extract_strided_slice %59 {offsets = [0, 0], sizes = [8, 256], strides = [1, 1]} : vector<8x768xf32> to vector<8x256xf32>
    %65 = vector.extract_strided_slice %60 {offsets = [0, 0], sizes = [8, 256], strides = [1, 1]} : vector<8x512xf32> to vector<8x256xf32>
    %66 = arith.addf %64, %65 : vector<8x256xf32>
    %cst_34 = arith.constant 5.000000e-01 : f32
    %67 = vector.broadcast %cst_34 : f32 to vector<8x256xf32>
    %68 = arith.mulf %67, %66 : vector<8x256xf32>
    %69 = math.tanh %68 : vector<8x256xf32>
    %cst_35 = arith.constant 5.000000e-01 : f32
    %70 = vector.broadcast %cst_35 : f32 to vector<8x256xf32>
    %71 = arith.mulf %70, %69 : vector<8x256xf32>
    %cst_36 = arith.constant 5.000000e-01 : f32
    %72 = vector.broadcast %cst_36 : f32 to vector<8x256xf32>
    %73 = arith.addf %71, %72 : vector<8x256xf32>
    %74 = vector.extract_strided_slice %59 {offsets = [0, 256], sizes = [8, 256], strides = [1, 1]} : vector<8x768xf32> to vector<8x256xf32>
    %75 = vector.extract_strided_slice %60 {offsets = [0, 256], sizes = [8, 256], strides = [1, 1]} : vector<8x512xf32> to vector<8x256xf32>
    %76 = arith.addf %74, %75 : vector<8x256xf32>
    %cst_37 = arith.constant 5.000000e-01 : f32
    %77 = vector.broadcast %cst_37 : f32 to vector<8x256xf32>
    %78 = arith.mulf %77, %76 : vector<8x256xf32>
    %79 = math.tanh %78 : vector<8x256xf32>
    %cst_38 = arith.constant 5.000000e-01 : f32
    %80 = vector.broadcast %cst_38 : f32 to vector<8x256xf32>
    %81 = arith.mulf %80, %79 : vector<8x256xf32>
    %cst_39 = arith.constant 5.000000e-01 : f32
    %82 = vector.broadcast %cst_39 : f32 to vector<8x256xf32>
    %83 = arith.addf %81, %82 : vector<8x256xf32>
    %84 = vector.extract_strided_slice %59 {offsets = [0, 512], sizes = [8, 256], strides = [1, 1]} : vector<8x768xf32> to vector<8x256xf32>
    %85 = arith.mulf %73, %63 : vector<8x256xf32>
    %86 = arith.addf %84, %85 : vector<8x256xf32>
    %87 = math.tanh %86 : vector<8x256xf32>
    %cst_40 = arith.constant 1.000000e+00 : f32
    %88 = vector.broadcast %cst_40 : f32 to vector<8x256xf32>
    %89 = arith.subf %88, %83 : vector<8x256xf32>
    %90 = arith.mulf %89, %87 : vector<8x256xf32>
    %91 = arith.mulf %83, %55 : vector<8x256xf32>
    %92 = arith.addf %90, %91 : vector<8x256xf32>
    %c2_i32 = arith.constant 2 : i32
    %c8_i32_41 = arith.constant 8 : i32
    %93 = arith.muli %c2_i32, %c8_i32_41 : i32
    %94 = tpu.assume_multiple %93, 8 : i32
    %95 = arith.index_cast %94 : i32 to index
    %c0_42 = arith.constant 0 : index
    %96 = vector.load %arg9[%95, %c0_42] : memref<64x768xf32, #tpu.memory_space<vmem>>, vector<8x768xf32>
    %cst_43 = arith.constant dense<0.000000e+00> : vector<8x512xf32>
    %97 = tpu.matmul %92, %15, %cst_43 {dimension_numbers = #tpu.dot_dimension_numbers<[1], [0], [0], [1], [0, 0, 1, 1], [], []>} : vector<8x256xf32>, vector<256x512xf32>, vector<8x512xf32> -> vector<8x512xf32>
    %cst_44 = arith.constant dense<0.000000e+00> : vector<8x256xf32>
    %98 = tpu.matmul %92, %16, %cst_44 {dimension_numbers = #tpu.dot_dimension_numbers<[1], [0], [0], [1], [0, 0, 1, 1], [], []>} : vector<8x256xf32>, vector<256x256xf32>, vector<8x256xf32> -> vector<8x256xf32>
    %99 = vector.broadcast %17 : vector<1x256xf32> to vector<8x256xf32>
    %100 = arith.addf %98, %99 : vector<8x256xf32>
    %101 = vector.extract_strided_slice %96 {offsets = [0, 0], sizes = [8, 256], strides = [1, 1]} : vector<8x768xf32> to vector<8x256xf32>
    %102 = vector.extract_strided_slice %97 {offsets = [0, 0], sizes = [8, 256], strides = [1, 1]} : vector<8x512xf32> to vector<8x256xf32>
    %103 = arith.addf %101, %102 : vector<8x256xf32>
    %cst_45 = arith.constant 5.000000e-01 : f32
    %104 = vector.broadcast %cst_45 : f32 to vector<8x256xf32>
    %105 = arith.mulf %104, %103 : vector<8x256xf32>
    %106 = math.tanh %105 : vector<8x256xf32>
    %cst_46 = arith.constant 5.000000e-01 : f32
    %107 = vector.broadcast %cst_46 : f32 to vector<8x256xf32>
    %108 = arith.mulf %107, %106 : vector<8x256xf32>
    %cst_47 = arith.constant 5.000000e-01 : f32
    %109 = vector.broadcast %cst_47 : f32 to vector<8x256xf32>
    %110 = arith.addf %108, %109 : vector<8x256xf32>
    %111 = vector.extract_strided_slice %96 {offsets = [0, 256], sizes = [8, 256], strides = [1, 1]} : vector<8x768xf32> to vector<8x256xf32>
    %112 = vector.extract_strided_slice %97 {offsets = [0, 256], sizes = [8, 256], strides = [1, 1]} : vector<8x512xf32> to vector<8x256xf32>
    %113 = arith.addf %111, %112 : vector<8x256xf32>
    %cst_48 = arith.constant 5.000000e-01 : f32
    %114 = vector.broadcast %cst_48 : f32 to vector<8x256xf32>
    %115 = arith.mulf %114, %113 : vector<8x256xf32>
    %116 = math.tanh %115 : vector<8x256xf32>
    %cst_49 = arith.constant 5.000000e-01 : f32
    %117 = vector.broadcast %cst_49 : f32 to vector<8x256xf32>
    %118 = arith.mulf %117, %116 : vector<8x256xf32>
    %cst_50 = arith.constant 5.000000e-01 : f32
    %119 = vector.broadcast %cst_50 : f32 to vector<8x256xf32>
    %120 = arith.addf %118, %119 : vector<8x256xf32>
    %121 = vector.extract_strided_slice %96 {offsets = [0, 512], sizes = [8, 256], strides = [1, 1]} : vector<8x768xf32> to vector<8x256xf32>
    %122 = arith.mulf %110, %100 : vector<8x256xf32>
    %123 = arith.addf %121, %122 : vector<8x256xf32>
    %124 = math.tanh %123 : vector<8x256xf32>
    %cst_51 = arith.constant 1.000000e+00 : f32
    %125 = vector.broadcast %cst_51 : f32 to vector<8x256xf32>
    %126 = arith.subf %125, %120 : vector<8x256xf32>
    %127 = arith.mulf %126, %124 : vector<8x256xf32>
    %128 = arith.mulf %120, %92 : vector<8x256xf32>
    %129 = arith.addf %127, %128 : vector<8x256xf32>
    %c3_i32 = arith.constant 3 : i32
    %c8_i32_52 = arith.constant 8 : i32
    %130 = arith.muli %c3_i32, %c8_i32_52 : i32
    %131 = tpu.assume_multiple %130, 8 : i32
    %132 = arith.index_cast %131 : i32 to index
    %c0_53 = arith.constant 0 : index
    %133 = vector.load %arg9[%132, %c0_53] : memref<64x768xf32, #tpu.memory_space<vmem>>, vector<8x768xf32>
    %cst_54 = arith.constant dense<0.000000e+00> : vector<8x512xf32>
    %134 = tpu.matmul %129, %15, %cst_54 {dimension_numbers = #tpu.dot_dimension_numbers<[1], [0], [0], [1], [0, 0, 1, 1], [], []>} : vector<8x256xf32>, vector<256x512xf32>, vector<8x512xf32> -> vector<8x512xf32>
    %cst_55 = arith.constant dense<0.000000e+00> : vector<8x256xf32>
    %135 = tpu.matmul %129, %16, %cst_55 {dimension_numbers = #tpu.dot_dimension_numbers<[1], [0], [0], [1], [0, 0, 1, 1], [], []>} : vector<8x256xf32>, vector<256x256xf32>, vector<8x256xf32> -> vector<8x256xf32>
    %136 = vector.broadcast %17 : vector<1x256xf32> to vector<8x256xf32>
    %137 = arith.addf %135, %136 : vector<8x256xf32>
    %138 = vector.extract_strided_slice %133 {offsets = [0, 0], sizes = [8, 256], strides = [1, 1]} : vector<8x768xf32> to vector<8x256xf32>
    %139 = vector.extract_strided_slice %134 {offsets = [0, 0], sizes = [8, 256], strides = [1, 1]} : vector<8x512xf32> to vector<8x256xf32>
    %140 = arith.addf %138, %139 : vector<8x256xf32>
    %cst_56 = arith.constant 5.000000e-01 : f32
    %141 = vector.broadcast %cst_56 : f32 to vector<8x256xf32>
    %142 = arith.mulf %141, %140 : vector<8x256xf32>
    %143 = math.tanh %142 : vector<8x256xf32>
    %cst_57 = arith.constant 5.000000e-01 : f32
    %144 = vector.broadcast %cst_57 : f32 to vector<8x256xf32>
    %145 = arith.mulf %144, %143 : vector<8x256xf32>
    %cst_58 = arith.constant 5.000000e-01 : f32
    %146 = vector.broadcast %cst_58 : f32 to vector<8x256xf32>
    %147 = arith.addf %145, %146 : vector<8x256xf32>
    %148 = vector.extract_strided_slice %133 {offsets = [0, 256], sizes = [8, 256], strides = [1, 1]} : vector<8x768xf32> to vector<8x256xf32>
    %149 = vector.extract_strided_slice %134 {offsets = [0, 256], sizes = [8, 256], strides = [1, 1]} : vector<8x512xf32> to vector<8x256xf32>
    %150 = arith.addf %148, %149 : vector<8x256xf32>
    %cst_59 = arith.constant 5.000000e-01 : f32
    %151 = vector.broadcast %cst_59 : f32 to vector<8x256xf32>
    %152 = arith.mulf %151, %150 : vector<8x256xf32>
    %153 = math.tanh %152 : vector<8x256xf32>
    %cst_60 = arith.constant 5.000000e-01 : f32
    %154 = vector.broadcast %cst_60 : f32 to vector<8x256xf32>
    %155 = arith.mulf %154, %153 : vector<8x256xf32>
    %cst_61 = arith.constant 5.000000e-01 : f32
    %156 = vector.broadcast %cst_61 : f32 to vector<8x256xf32>
    %157 = arith.addf %155, %156 : vector<8x256xf32>
    %158 = vector.extract_strided_slice %133 {offsets = [0, 512], sizes = [8, 256], strides = [1, 1]} : vector<8x768xf32> to vector<8x256xf32>
    %159 = arith.mulf %147, %137 : vector<8x256xf32>
    %160 = arith.addf %158, %159 : vector<8x256xf32>
    %161 = math.tanh %160 : vector<8x256xf32>
    %cst_62 = arith.constant 1.000000e+00 : f32
    %162 = vector.broadcast %cst_62 : f32 to vector<8x256xf32>
    %163 = arith.subf %162, %157 : vector<8x256xf32>
    %164 = arith.mulf %163, %161 : vector<8x256xf32>
    %165 = arith.mulf %157, %129 : vector<8x256xf32>
    %166 = arith.addf %164, %165 : vector<8x256xf32>
    %c4_i32 = arith.constant 4 : i32
    %c8_i32_63 = arith.constant 8 : i32
    %167 = arith.muli %c4_i32, %c8_i32_63 : i32
    %168 = tpu.assume_multiple %167, 8 : i32
    %169 = arith.index_cast %168 : i32 to index
    %c0_64 = arith.constant 0 : index
    %170 = vector.load %arg9[%169, %c0_64] : memref<64x768xf32, #tpu.memory_space<vmem>>, vector<8x768xf32>
    %cst_65 = arith.constant dense<0.000000e+00> : vector<8x512xf32>
    %171 = tpu.matmul %166, %15, %cst_65 {dimension_numbers = #tpu.dot_dimension_numbers<[1], [0], [0], [1], [0, 0, 1, 1], [], []>} : vector<8x256xf32>, vector<256x512xf32>, vector<8x512xf32> -> vector<8x512xf32>
    %cst_66 = arith.constant dense<0.000000e+00> : vector<8x256xf32>
    %172 = tpu.matmul %166, %16, %cst_66 {dimension_numbers = #tpu.dot_dimension_numbers<[1], [0], [0], [1], [0, 0, 1, 1], [], []>} : vector<8x256xf32>, vector<256x256xf32>, vector<8x256xf32> -> vector<8x256xf32>
    %173 = vector.broadcast %17 : vector<1x256xf32> to vector<8x256xf32>
    %174 = arith.addf %172, %173 : vector<8x256xf32>
    %175 = vector.extract_strided_slice %170 {offsets = [0, 0], sizes = [8, 256], strides = [1, 1]} : vector<8x768xf32> to vector<8x256xf32>
    %176 = vector.extract_strided_slice %171 {offsets = [0, 0], sizes = [8, 256], strides = [1, 1]} : vector<8x512xf32> to vector<8x256xf32>
    %177 = arith.addf %175, %176 : vector<8x256xf32>
    %cst_67 = arith.constant 5.000000e-01 : f32
    %178 = vector.broadcast %cst_67 : f32 to vector<8x256xf32>
    %179 = arith.mulf %178, %177 : vector<8x256xf32>
    %180 = math.tanh %179 : vector<8x256xf32>
    %cst_68 = arith.constant 5.000000e-01 : f32
    %181 = vector.broadcast %cst_68 : f32 to vector<8x256xf32>
    %182 = arith.mulf %181, %180 : vector<8x256xf32>
    %cst_69 = arith.constant 5.000000e-01 : f32
    %183 = vector.broadcast %cst_69 : f32 to vector<8x256xf32>
    %184 = arith.addf %182, %183 : vector<8x256xf32>
    %185 = vector.extract_strided_slice %170 {offsets = [0, 256], sizes = [8, 256], strides = [1, 1]} : vector<8x768xf32> to vector<8x256xf32>
    %186 = vector.extract_strided_slice %171 {offsets = [0, 256], sizes = [8, 256], strides = [1, 1]} : vector<8x512xf32> to vector<8x256xf32>
    %187 = arith.addf %185, %186 : vector<8x256xf32>
    %cst_70 = arith.constant 5.000000e-01 : f32
    %188 = vector.broadcast %cst_70 : f32 to vector<8x256xf32>
    %189 = arith.mulf %188, %187 : vector<8x256xf32>
    %190 = math.tanh %189 : vector<8x256xf32>
    %cst_71 = arith.constant 5.000000e-01 : f32
    %191 = vector.broadcast %cst_71 : f32 to vector<8x256xf32>
    %192 = arith.mulf %191, %190 : vector<8x256xf32>
    %cst_72 = arith.constant 5.000000e-01 : f32
    %193 = vector.broadcast %cst_72 : f32 to vector<8x256xf32>
    %194 = arith.addf %192, %193 : vector<8x256xf32>
    %195 = vector.extract_strided_slice %170 {offsets = [0, 512], sizes = [8, 256], strides = [1, 1]} : vector<8x768xf32> to vector<8x256xf32>
    %196 = arith.mulf %184, %174 : vector<8x256xf32>
    %197 = arith.addf %195, %196 : vector<8x256xf32>
    %198 = math.tanh %197 : vector<8x256xf32>
    %cst_73 = arith.constant 1.000000e+00 : f32
    %199 = vector.broadcast %cst_73 : f32 to vector<8x256xf32>
    %200 = arith.subf %199, %194 : vector<8x256xf32>
    %201 = arith.mulf %200, %198 : vector<8x256xf32>
    %202 = arith.mulf %194, %166 : vector<8x256xf32>
    %203 = arith.addf %201, %202 : vector<8x256xf32>
    %c5_i32 = arith.constant 5 : i32
    %c8_i32_74 = arith.constant 8 : i32
    %204 = arith.muli %c5_i32, %c8_i32_74 : i32
    %205 = tpu.assume_multiple %204, 8 : i32
    %206 = arith.index_cast %205 : i32 to index
    %c0_75 = arith.constant 0 : index
    %207 = vector.load %arg9[%206, %c0_75] : memref<64x768xf32, #tpu.memory_space<vmem>>, vector<8x768xf32>
    %cst_76 = arith.constant dense<0.000000e+00> : vector<8x512xf32>
    %208 = tpu.matmul %203, %15, %cst_76 {dimension_numbers = #tpu.dot_dimension_numbers<[1], [0], [0], [1], [0, 0, 1, 1], [], []>} : vector<8x256xf32>, vector<256x512xf32>, vector<8x512xf32> -> vector<8x512xf32>
    %cst_77 = arith.constant dense<0.000000e+00> : vector<8x256xf32>
    %209 = tpu.matmul %203, %16, %cst_77 {dimension_numbers = #tpu.dot_dimension_numbers<[1], [0], [0], [1], [0, 0, 1, 1], [], []>} : vector<8x256xf32>, vector<256x256xf32>, vector<8x256xf32> -> vector<8x256xf32>
    %210 = vector.broadcast %17 : vector<1x256xf32> to vector<8x256xf32>
    %211 = arith.addf %209, %210 : vector<8x256xf32>
    %212 = vector.extract_strided_slice %207 {offsets = [0, 0], sizes = [8, 256], strides = [1, 1]} : vector<8x768xf32> to vector<8x256xf32>
    %213 = vector.extract_strided_slice %208 {offsets = [0, 0], sizes = [8, 256], strides = [1, 1]} : vector<8x512xf32> to vector<8x256xf32>
    %214 = arith.addf %212, %213 : vector<8x256xf32>
    %cst_78 = arith.constant 5.000000e-01 : f32
    %215 = vector.broadcast %cst_78 : f32 to vector<8x256xf32>
    %216 = arith.mulf %215, %214 : vector<8x256xf32>
    %217 = math.tanh %216 : vector<8x256xf32>
    %cst_79 = arith.constant 5.000000e-01 : f32
    %218 = vector.broadcast %cst_79 : f32 to vector<8x256xf32>
    %219 = arith.mulf %218, %217 : vector<8x256xf32>
    %cst_80 = arith.constant 5.000000e-01 : f32
    %220 = vector.broadcast %cst_80 : f32 to vector<8x256xf32>
    %221 = arith.addf %219, %220 : vector<8x256xf32>
    %222 = vector.extract_strided_slice %207 {offsets = [0, 256], sizes = [8, 256], strides = [1, 1]} : vector<8x768xf32> to vector<8x256xf32>
    %223 = vector.extract_strided_slice %208 {offsets = [0, 256], sizes = [8, 256], strides = [1, 1]} : vector<8x512xf32> to vector<8x256xf32>
    %224 = arith.addf %222, %223 : vector<8x256xf32>
    %cst_81 = arith.constant 5.000000e-01 : f32
    %225 = vector.broadcast %cst_81 : f32 to vector<8x256xf32>
    %226 = arith.mulf %225, %224 : vector<8x256xf32>
    %227 = math.tanh %226 : vector<8x256xf32>
    %cst_82 = arith.constant 5.000000e-01 : f32
    %228 = vector.broadcast %cst_82 : f32 to vector<8x256xf32>
    %229 = arith.mulf %228, %227 : vector<8x256xf32>
    %cst_83 = arith.constant 5.000000e-01 : f32
    %230 = vector.broadcast %cst_83 : f32 to vector<8x256xf32>
    %231 = arith.addf %229, %230 : vector<8x256xf32>
    %232 = vector.extract_strided_slice %207 {offsets = [0, 512], sizes = [8, 256], strides = [1, 1]} : vector<8x768xf32> to vector<8x256xf32>
    %233 = arith.mulf %221, %211 : vector<8x256xf32>
    %234 = arith.addf %232, %233 : vector<8x256xf32>
    %235 = math.tanh %234 : vector<8x256xf32>
    %cst_84 = arith.constant 1.000000e+00 : f32
    %236 = vector.broadcast %cst_84 : f32 to vector<8x256xf32>
    %237 = arith.subf %236, %231 : vector<8x256xf32>
    %238 = arith.mulf %237, %235 : vector<8x256xf32>
    %239 = arith.mulf %231, %203 : vector<8x256xf32>
    %240 = arith.addf %238, %239 : vector<8x256xf32>
    %c6_i32 = arith.constant 6 : i32
    %c8_i32_85 = arith.constant 8 : i32
    %241 = arith.muli %c6_i32, %c8_i32_85 : i32
    %242 = tpu.assume_multiple %241, 8 : i32
    %243 = arith.index_cast %242 : i32 to index
    %c0_86 = arith.constant 0 : index
    %244 = vector.load %arg9[%243, %c0_86] : memref<64x768xf32, #tpu.memory_space<vmem>>, vector<8x768xf32>
    %cst_87 = arith.constant dense<0.000000e+00> : vector<8x512xf32>
    %245 = tpu.matmul %240, %15, %cst_87 {dimension_numbers = #tpu.dot_dimension_numbers<[1], [0], [0], [1], [0, 0, 1, 1], [], []>} : vector<8x256xf32>, vector<256x512xf32>, vector<8x512xf32> -> vector<8x512xf32>
    %cst_88 = arith.constant dense<0.000000e+00> : vector<8x256xf32>
    %246 = tpu.matmul %240, %16, %cst_88 {dimension_numbers = #tpu.dot_dimension_numbers<[1], [0], [0], [1], [0, 0, 1, 1], [], []>} : vector<8x256xf32>, vector<256x256xf32>, vector<8x256xf32> -> vector<8x256xf32>
    %247 = vector.broadcast %17 : vector<1x256xf32> to vector<8x256xf32>
    %248 = arith.addf %246, %247 : vector<8x256xf32>
    %249 = vector.extract_strided_slice %244 {offsets = [0, 0], sizes = [8, 256], strides = [1, 1]} : vector<8x768xf32> to vector<8x256xf32>
    %250 = vector.extract_strided_slice %245 {offsets = [0, 0], sizes = [8, 256], strides = [1, 1]} : vector<8x512xf32> to vector<8x256xf32>
    %251 = arith.addf %249, %250 : vector<8x256xf32>
    %cst_89 = arith.constant 5.000000e-01 : f32
    %252 = vector.broadcast %cst_89 : f32 to vector<8x256xf32>
    %253 = arith.mulf %252, %251 : vector<8x256xf32>
    %254 = math.tanh %253 : vector<8x256xf32>
    %cst_90 = arith.constant 5.000000e-01 : f32
    %255 = vector.broadcast %cst_90 : f32 to vector<8x256xf32>
    %256 = arith.mulf %255, %254 : vector<8x256xf32>
    %cst_91 = arith.constant 5.000000e-01 : f32
    %257 = vector.broadcast %cst_91 : f32 to vector<8x256xf32>
    %258 = arith.addf %256, %257 : vector<8x256xf32>
    %259 = vector.extract_strided_slice %244 {offsets = [0, 256], sizes = [8, 256], strides = [1, 1]} : vector<8x768xf32> to vector<8x256xf32>
    %260 = vector.extract_strided_slice %245 {offsets = [0, 256], sizes = [8, 256], strides = [1, 1]} : vector<8x512xf32> to vector<8x256xf32>
    %261 = arith.addf %259, %260 : vector<8x256xf32>
    %cst_92 = arith.constant 5.000000e-01 : f32
    %262 = vector.broadcast %cst_92 : f32 to vector<8x256xf32>
    %263 = arith.mulf %262, %261 : vector<8x256xf32>
    %264 = math.tanh %263 : vector<8x256xf32>
    %cst_93 = arith.constant 5.000000e-01 : f32
    %265 = vector.broadcast %cst_93 : f32 to vector<8x256xf32>
    %266 = arith.mulf %265, %264 : vector<8x256xf32>
    %cst_94 = arith.constant 5.000000e-01 : f32
    %267 = vector.broadcast %cst_94 : f32 to vector<8x256xf32>
    %268 = arith.addf %266, %267 : vector<8x256xf32>
    %269 = vector.extract_strided_slice %244 {offsets = [0, 512], sizes = [8, 256], strides = [1, 1]} : vector<8x768xf32> to vector<8x256xf32>
    %270 = arith.mulf %258, %248 : vector<8x256xf32>
    %271 = arith.addf %269, %270 : vector<8x256xf32>
    %272 = math.tanh %271 : vector<8x256xf32>
    %cst_95 = arith.constant 1.000000e+00 : f32
    %273 = vector.broadcast %cst_95 : f32 to vector<8x256xf32>
    %274 = arith.subf %273, %268 : vector<8x256xf32>
    %275 = arith.mulf %274, %272 : vector<8x256xf32>
    %276 = arith.mulf %268, %240 : vector<8x256xf32>
    %277 = arith.addf %275, %276 : vector<8x256xf32>
    %c7_i32 = arith.constant 7 : i32
    %c8_i32_96 = arith.constant 8 : i32
    %278 = arith.muli %c7_i32, %c8_i32_96 : i32
    %279 = tpu.assume_multiple %278, 8 : i32
    %280 = arith.index_cast %279 : i32 to index
    %c0_97 = arith.constant 0 : index
    %281 = vector.load %arg9[%280, %c0_97] : memref<64x768xf32, #tpu.memory_space<vmem>>, vector<8x768xf32>
    %cst_98 = arith.constant dense<0.000000e+00> : vector<8x512xf32>
    %282 = tpu.matmul %277, %15, %cst_98 {dimension_numbers = #tpu.dot_dimension_numbers<[1], [0], [0], [1], [0, 0, 1, 1], [], []>} : vector<8x256xf32>, vector<256x512xf32>, vector<8x512xf32> -> vector<8x512xf32>
    %cst_99 = arith.constant dense<0.000000e+00> : vector<8x256xf32>
    %283 = tpu.matmul %277, %16, %cst_99 {dimension_numbers = #tpu.dot_dimension_numbers<[1], [0], [0], [1], [0, 0, 1, 1], [], []>} : vector<8x256xf32>, vector<256x256xf32>, vector<8x256xf32> -> vector<8x256xf32>
    %284 = vector.broadcast %17 : vector<1x256xf32> to vector<8x256xf32>
    %285 = arith.addf %283, %284 : vector<8x256xf32>
    %286 = vector.extract_strided_slice %281 {offsets = [0, 0], sizes = [8, 256], strides = [1, 1]} : vector<8x768xf32> to vector<8x256xf32>
    %287 = vector.extract_strided_slice %282 {offsets = [0, 0], sizes = [8, 256], strides = [1, 1]} : vector<8x512xf32> to vector<8x256xf32>
    %288 = arith.addf %286, %287 : vector<8x256xf32>
    %cst_100 = arith.constant 5.000000e-01 : f32
    %289 = vector.broadcast %cst_100 : f32 to vector<8x256xf32>
    %290 = arith.mulf %289, %288 : vector<8x256xf32>
    %291 = math.tanh %290 : vector<8x256xf32>
    %cst_101 = arith.constant 5.000000e-01 : f32
    %292 = vector.broadcast %cst_101 : f32 to vector<8x256xf32>
    %293 = arith.mulf %292, %291 : vector<8x256xf32>
    %cst_102 = arith.constant 5.000000e-01 : f32
    %294 = vector.broadcast %cst_102 : f32 to vector<8x256xf32>
    %295 = arith.addf %293, %294 : vector<8x256xf32>
    %296 = vector.extract_strided_slice %281 {offsets = [0, 256], sizes = [8, 256], strides = [1, 1]} : vector<8x768xf32> to vector<8x256xf32>
    %297 = vector.extract_strided_slice %282 {offsets = [0, 256], sizes = [8, 256], strides = [1, 1]} : vector<8x512xf32> to vector<8x256xf32>
    %298 = arith.addf %296, %297 : vector<8x256xf32>
    %cst_103 = arith.constant 5.000000e-01 : f32
    %299 = vector.broadcast %cst_103 : f32 to vector<8x256xf32>
    %300 = arith.mulf %299, %298 : vector<8x256xf32>
    %301 = math.tanh %300 : vector<8x256xf32>
    %cst_104 = arith.constant 5.000000e-01 : f32
    %302 = vector.broadcast %cst_104 : f32 to vector<8x256xf32>
    %303 = arith.mulf %302, %301 : vector<8x256xf32>
    %cst_105 = arith.constant 5.000000e-01 : f32
    %304 = vector.broadcast %cst_105 : f32 to vector<8x256xf32>
    %305 = arith.addf %303, %304 : vector<8x256xf32>
    %306 = vector.extract_strided_slice %281 {offsets = [0, 512], sizes = [8, 256], strides = [1, 1]} : vector<8x768xf32> to vector<8x256xf32>
    %307 = arith.mulf %295, %285 : vector<8x256xf32>
    %308 = arith.addf %306, %307 : vector<8x256xf32>
    %309 = math.tanh %308 : vector<8x256xf32>
    %cst_106 = arith.constant 1.000000e+00 : f32
    %310 = vector.broadcast %cst_106 : f32 to vector<8x256xf32>
    %311 = arith.subf %310, %305 : vector<8x256xf32>
    %312 = arith.mulf %311, %309 : vector<8x256xf32>
    %313 = arith.mulf %305, %277 : vector<8x256xf32>
    %314 = arith.addf %312, %313 : vector<8x256xf32>
    %c8_i32_107 = arith.constant 8 : i32
    %c0_108 = arith.constant 0 : index
    %c0_109 = arith.constant 0 : index
    %315 = vector.load %arg8[%c0_108, %c0_109] : memref<8x256xf32, #tpu.memory_space<vmem>>, vector<8x256xf32>
    tpu.vector_store %arg8[%c0_108, %c0_109], %314 {strides = array<i32>} : memref<8x256xf32, #tpu.memory_space<vmem>>, vector<8x256xf32>,
    return
  }
  func.func @transform_0(%arg0: i32) -> (i32, i32, i32) {
    %c0_i32 = arith.constant 0 : i32
    %c0_i32_0 = arith.constant 0 : i32
    %c0_i32_1 = arith.constant 0 : i32
    return %arg0, %c0_i32, %c0_i32_0 : i32, i32, i32
  }
  func.func @transform_1(%arg0: i32) -> (i32, i32) {
    %c0_i32 = arith.constant 0 : i32
    %c0_i32_0 = arith.constant 0 : i32
    %c0_i32_1 = arith.constant 0 : i32
    return %c0_i32, %c0_i32_0 : i32, i32
  }
  func.func @transform_2(%arg0: i32) -> (i32, i32) {
    %c0_i32 = arith.constant 0 : i32
    %c0_i32_0 = arith.constant 0 : i32
    %c0_i32_1 = arith.constant 0 : i32
    return %c0_i32, %c0_i32_0 : i32, i32
  }
  func.func @transform_3(%arg0: i32) -> (i32, i32) {
    %c0_i32 = arith.constant 0 : i32
    %c0_i32_0 = arith.constant 0 : i32
    %c0_i32_1 = arith.constant 0 : i32
    return %c0_i32, %c0_i32_0 : i32, i32
  }
  func.func @transform_4(%arg0: i32) -> (i32, i32) {
    %c0_i32 = arith.constant 0 : i32
    %c0_i32_0 = arith.constant 0 : i32
    %c0_i32_1 = arith.constant 0 : i32
    return %c0_i32, %c0_i32_0 : i32, i32
  }
  func.func @transform_5(%arg0: i32) -> (i32, i32) {
    %c0_i32 = arith.constant 0 : i32
    %c0_i32_0 = arith.constant 0 : i32
    %c0_i32_1 = arith.constant 0 : i32
    return %c0_i32, %c0_i32_0 : i32, i32
  }
  func.func @transform_6(%arg0: i32) -> (i32, i32) {
    %c0_i32 = arith.constant 0 : i32
    %c0_i32_0 = arith.constant 0 : i32
    %c0_i32_1 = arith.constant 0 : i32
    return %c0_i32, %c0_i32_0 : i32, i32
  }
  func.func @transform_7(%arg0: i32) -> (i32, i32) {
    %c0_i32 = arith.constant 0 : i32
    %c0_i32_0 = arith.constant 0 : i32
    return %arg0, %c0_i32 : i32, i32
  }
}

</mosaic_0001>

<bundles_post_ra>
// kernel: tpu_custom_call.1
= control target key start
LH: loop header
LB: loop body
LE: loop exit
PB: predicated region body
PF: predicated region fallthrough
CT: control target
= control target key end

     0   :  { %12 = vsyncpa [#allocation4], 0  ;;  %s6248_s0 = inlined_call_operand.vmem [shape: f32[1,64,9], index: 0, kind: input, shape index: {}]   ;;  %s6249_s1 = inlined_call_operand.vmem [shape: f32[9,32], index: 1, kind: input, shape index: {}]   ;;  %s6250_s2 = inlined_call_operand.vmem [shape: f32[1,32], index: 2, kind: input, shape index: {}]   ;;  %s6251_s3 = inlined_call_operand.hbm [shape: f32[32,768], index: 3, kind: input, shape index: {}]   ;;  %s6252_s4 = inlined_call_operand.hbm [shape: f32[256,768], index: 4, kind: input, shape index: {}]   ;;  %s6253_s5 = inlined_call_operand.vmem [shape: f32[1,768], index: 5, kind: input, shape index: {}]   ;;  %s6254_s6 = inlined_call_operand.vmem [shape: f32[1,256], index: 6, kind: input, shape index: {}]   ;;  %s6255_s7 = inlined_call_operand.hbm [shape: f32[8,256], index: 7, kind: output, shape index: {}]  }
   0x1   :  { %13 = vsyncpa [#allocation7], 0 }
   0x2   :  { %14 = vsyncpa [#allocation5], 0  ;;  %s4828_s24 = smov [#allocation3]   ;;  %s4756_s28 = scalar_lea.hbm %s6251_s3, 3072 }
   0x3   :  { %s26_s25 = sshll.u32 %s4828_s24, 4  ;;  %p4757_p0 = scmp.ne.s32.totalorder %s6251_s3, %s4756_s28  ;;  %s27_s25 = int_to_ptr.vmem [resolvable:$true] %s26_s25 }
   0x4   :  { %p4760_p1 = scmp.lt.u32.totalorder %s4756_s28, %s6251_s3 }
   0x6   :  { %p4762_p2 = pnand %p4760_p1, %p4757_p0 }
   0x8   :  { %4765 = shalt.err (!%p4762_p2)
}
   0x9   :  { %s4766_s10 = scalar_lea.vmem %s27_s25, 3072  ;;  %p4771_p4 = scmp.lt.s32.totalorder %s27_s25, %s27_s25 }
   0xa   :  { %p4767_p3 = scmp.ne.s32.totalorder %s27_s25, %s4766_s10  ;;  %p4772_p5 = scmp.lt.s32.totalorder %s4766_s10, %s4766_s10 }
   0xc   :  { %p4773_p6 = por %p4772_p5, %p4771_p4 }
   0xe   :  { %p4774_p7 = pnand %p4773_p6, %p4767_p3 }
  0x10   :  { %4777 = shalt.err (!%p4774_p7)
}
  0x11   :  { %s4829_s11 = smov 768   ;;  %s4830_s12 = smov 48  }
  0x12   :  { %32 = dma.hbm_to_vmem [thread:$0]  %s6251_s3, 3072, %s27_s25, [#allocation4], %s4829_s11, %s4829_s11, %s4830_s12  }
  0x13   :  { %s4831_s15 = smov [#allocation6]   ;;  %s4778_s19 = scalar_lea.hbm %s6252_s4, 24576 }
  0x14   :  { %s38_s16 = sshll.u32 %s4831_s15, 4  ;;  %p4779_p8 = scmp.ne.s32.totalorder %s6252_s4, %s4778_s19  ;;  %s39_s16 = int_to_ptr.vmem [resolvable:$true] %s38_s16 }
  0x15   :  { %p4782_p9 = scmp.lt.u32.totalorder %s4778_s19, %s6252_s4 }
  0x17   :  { %p4784_p10 = pnand %p4782_p9, %p4779_p8 }
  0x19   :  { %4787 = shalt.err (!%p4784_p10)
}
  0x1a   :  { %s4788_s24 = scalar_lea.vmem %s39_s16, 24576  ;;  %p4793_p12 = scmp.lt.s32.totalorder %s39_s16, %s39_s16 }
  0x1b   :  { %p4789_p11 = scmp.ne.s32.totalorder %s39_s16, %s4788_s24  ;;  %p4794_p13 = scmp.lt.s32.totalorder %s4788_s24, %s4788_s24 }
  0x1d   :  { %p4795_p0 = por %p4794_p13, %p4793_p12 }
  0x1f   :  { %p4796_p1 = pnand %p4795_p0, %p4789_p11 }
  0x21   :  { %4799 = shalt.err (!%p4796_p1)
}
  0x22   :  { %44 = dma.hbm_to_vmem [thread:$0]  %s6252_s4, 24576, %s39_s16, [#allocation7], %s4829_s11, %s4829_s11, %s4830_s12  }
  0x23   :  { %4822 = dma.done.wait [#allocation4], 3072  }
  0x24   :  { %4823 = vsyncadd [#allocation4], 4294964224 }
  0x25   :  { %4824 = dma.done.wait [#allocation7], 24576  }
  0x26   :  { %4825 = vsyncadd [#allocation7], 4294942720  ;;  %vm97_vm0 = vcmask 1040384   ;;  %vm72_vm1 = vcmask 72704   ;;  %vm4832_vm2 = vmmov 1   ;;  %v63_v0 = vld [vmem:[%s6249_s1] sm:$0xff] }
  0x27   :  { %vm3020_vm3 = vmpackc.low %vm97_vm0, %vm4832_vm2  ;;  %v64_v1 = vld [vmem:[%s6249_s1 + $0x8] sm:$0x1]  ;;  %v55_v2 = vld [vmem:[%s6248_s0] sm:$0xff]  ;;  %v6256_v26 = vmov 0.0   ;;  %vm270_vm4 = vcmask 261120  }
  0x28   :  { %v3019_v3 = vpack.c.bf16 %v64_v1, %v63_v0  ;;  %3007 = vmatprep.mubr.msk.f32.mxu0 %vm72_vm1, %v55_v2  ;;  %v56_v4 = vld [vmem:[%s6248_s0 + $0x8] sm:$0xff]  ;;  %v57_v5 = vld [vmem:[%s6248_s0 + $0x10] sm:$0xff]  ;;  %v221_v7 = vld [vmem:[#allocation3 + $0x38] sm:$0xff]  ;;  %371 = vmatprep.mubr.f32.mxu1 %v6256_v26 }
  0x29   :  { %v215_v6 = vld [vmem:[#allocation3 + $0x8] sm:$0xff]  ;;  %v214_v9 = vld [vmem:[#allocation3] sm:$0xff]  ;;  %v220_v10 = vld [vmem:[#allocation3 + $0x30] sm:$0xff] }
  0x2a   :  { %3021 = vmatprep.subr.msk.bf16.mxu0 %vm3020_vm3, %v3019_v3  ;;  %v3025_v8 = vpack.c.bf16 %v221_v7, %v215_v6  ;;  %v227_v11 = vld [vmem:[#allocation3 + $0x68] sm:$0xff]  ;;  %v3027_v12 = vpack.c.bf16 %v220_v10, %v214_v9  ;;  %v233_v13 = vld [vmem:[#allocation3 + $0x98] sm:$0xff]  ;;  %v226_v14 = vld [vmem:[#allocation3 + $0x60] sm:$0xff] }
  0x2b   :  { %3024 = vmatpush3.bf16.msk.msra.mxu0 %vm3020_vm3, %v3019_v3  ;;  %v232_v15 = vld [vmem:[#allocation3 + $0x90] sm:$0xff]  ;;  %v3029_v16 = vpack.c.bf16 %v233_v13, %v227_v11  ;;  %v58_v17 = vld [vmem:[%s6248_s0 + $0x18] sm:$0xff]  ;;  %v59_v19 = vld [vmem:[%s6248_s0 + $0x20] sm:$0xff] }
  0x2c   :  { %3026 = vmatprep.subr.bf16.mxu0 %v3025_v8  ;;  %4585 = vmatprep.subr.bf16.mxu1 %v3025_v8  ;;  %v3031_v18 = vpack.c.bf16 %v232_v15, %v226_v14  ;;  %v60_v20 = vld [vmem:[%s6248_s0 + $0x28] sm:$0xff]  ;;  %v61_v21 = vld [vmem:[%s6248_s0 + $0x30] sm:$0xff]  ;;  %v62_v22 = vld [vmem:[%s6248_s0 + $0x38] sm:$0xff] }
  0x2d   :  { %4587 = vmatpush1.bf16.msra.mxu1 %v3027_v12  ;;  %v217_v23 = vld [vmem:[#allocation3 + $0x18] sm:$0xff]  ;;  %v223_v24 = vld [vmem:[#allocation3 + $0x48] sm:$0xff]  ;;  %v4942_v30 = vld [vmem:[%s6250_s2] ss:$0 sm:$0xff] }
  0x2e   :  { %3008 = vmatmul.mubr.msk.f32.vlgmr.msra.gmra.mrb[0].mxu0 %vm72_vm1, %v56_v4  ;;  %4586 = vmatprep.subr.bf16.mxu1 %v3029_v16  ;;  %v3033_v25 = vpack.c.bf16 %v223_v24, %v217_v23  ;;  %v219_v27 = vld [vmem:[#allocation3 + $0x28] sm:$0xff]  ;;  %v225_v28 = vld [vmem:[#allocation3 + $0x58] sm:$0xff]  ;;  %v216_v32 = vld [vmem:[#allocation3 + $0x10] sm:$0xff] }
  0x2f   :  { %3010 = vmatprep.mubr.msk.f32.mxu0 %vm72_vm1, %v57_v5  ;;  %3028 = vmatpush1.bf16.msra.mxu0 %v3027_v12  ;;  %v3041_v29 = vpack.c.bf16 %v225_v28, %v219_v27  ;;  %v222_v33 = vld [vmem:[#allocation3 + $0x40] sm:$0xff]  ;;  %v229_v35 = vld [vmem:[#allocation3 + $0x78] sm:$0xff]  ;;  %v235_v36 = vld [vmem:[#allocation3 + $0xa8] sm:$0xff] }
  0x30   :  { %3030 = vmatprep.subr.bf16.mxu0 %v3029_v16  ;;  %v3035_v38 = vpack.c.bf16 %v222_v33, %v216_v32  ;;  %v3037_v42 = vpack.c.bf16 %v235_v36, %v229_v35  ;;  %v228_v43 = vld [vmem:[#allocation3 + $0x70] sm:$0xff]  ;;  %v234_v44 = vld [vmem:[#allocation3 + $0xa0] sm:$0xff]  ;;  %v685_v46 = vld [vmem:[#allocation6 + $0x18] sm:$0xff] }
  0x31   :  { %4588 = vmatpush1.bf16.msra.mxu1 %v3031_v18  ;;  %v689_v47 = vld [vmem:[#allocation6 + $0x48] sm:$0xff]  ;;  %v218_v50 = vld [vmem:[#allocation3 + $0x20] sm:$0xff]  ;;  %v224_v51 = vld [vmem:[#allocation3 + $0x50] sm:$0xff]  ;;  %v3039_v52 = vpack.c.bf16 %v234_v44, %v228_v43 }
  0x32   :  { %3011 = vmatmul.mubr.msk.f32.gmra.mrb[2].mxu0 %vm72_vm1, %v58_v17  ;;  %3042 = vmatprep.subr.bf16.mxu1 %v3041_v29  ;;  %v4957_v56 = vpack.c.bf16 %v689_v47, %v685_v46  ;;  %v684_v57 = vld [vmem:[#allocation6 + $0x10] sm:$0xff]  ;;  %v688_v58 = vld [vmem:[#allocation6 + $0x40] sm:$0xff]  ;;  %v693_v60 = vld [vmem:[#allocation6 + $0x78] sm:$0xff]  ;;  %v3043_v62 = vpack.c.bf16 %v224_v51, %v218_v50 }
  0x33   :  { %3013 = vmatprep.mubr.msk.f32.mxu0 %vm72_vm1, %v59_v19  ;;  %3032 = vmatpush1.bf16.msra.mxu0 %v3031_v18  ;;  %v697_v61 = vld [vmem:[#allocation6 + $0xa8] sm:$0xff]  ;;  %v237_v2 = vld [vmem:[#allocation3 + $0xb8] sm:$0xff]  ;;  %v4967_v3 = vpack.c.bf16 %v688_v58, %v684_v57  ;;  %v692_v5 = vld [vmem:[#allocation6 + $0x70] sm:$0xff] }
  0x34   :  { %3034 = vmatprep.subr.bf16.mxu0 %v3033_v25  ;;  %6521 = vst [vmem:[#allocation12_spill] sm:$0xff] %v4957_v56  ;;  %v231_v1 = vld [vmem:[#allocation3 + $0x88] sm:$0xff]  ;;  %v4971_v4 = vpack.c.bf16 %v697_v61, %v693_v60  ;;  %v696_v6 = vld [vmem:[#allocation6 + $0xa0] sm:$0xff]  ;;  %v701_v8 = vld [vmem:[#allocation6 + $0xd8] sm:$0xff] }
  0x35   :  { %6522 = vst [vmem:[#allocation13_spill] sm:$0xff] %v4967_v3  ;;  %v705_v10 = vld [vmem:[#allocation6 + $0x108] sm:$0xff]  ;;  %v3045_v11 = vpack.c.bf16 %v237_v2, %v231_v1  ;;  %v230_v12 = vld [vmem:[#allocation3 + $0x80] sm:$0xff]  ;;  %v236_v13 = vld [vmem:[#allocation3 + $0xb0] sm:$0xff]  ;;  %v4982_v18 = vpack.c.bf16 %v696_v6, %v692_v5 }
  0x36   :  { %3014 = vmatmul.mubr.msk.f32.gmra.mrb[4].mxu0 %vm72_vm1, %v60_v20  ;;  %6523 = vst [vmem:[#allocation14_spill] sm:$0xff] %v4971_v4  ;;  %v683_v16 = vld [vmem:[#allocation6 + $0x8] sm:$0xff]  ;;  %v687_v17 = vld [vmem:[#allocation6 + $0x38] sm:$0xff]  ;;  %v4986_v19 = vpack.c.bf16 %v705_v10, %v701_v8  ;;  %v700_v20 = vld [vmem:[#allocation6 + $0xd0] sm:$0xff] }
  0x37   :  { %3016 = vmatprep.mubr.msk.f32.mxu0 %vm72_vm1, %v61_v21  ;;  %6524 = vst [vmem:[#allocation15_spill] sm:$0xff] %v4982_v18  ;;  %v704_v21 = vld [vmem:[#allocation6 + $0x100] sm:$0xff]  ;;  %v709_v23 = vld [vmem:[#allocation6 + $0x138] sm:$0xff]  ;;  %v713_v24 = vld [vmem:[#allocation6 + $0x168] sm:$0xff]  ;;  %v4988_v25 = vpack.c.bf16 %v687_v17, %v683_v16 }
  0x38   :  { %6525 = vst [vmem:[#allocation16_spill] sm:$0xff] %v4986_v19  ;;  %v4999_v29 = vpack.c.bf16 %v704_v21, %v700_v20  ;;  %v708_v32 = vld [vmem:[#allocation6 + $0x130] sm:$0xff]  ;;  %v712_v33 = vld [vmem:[#allocation6 + $0x160] sm:$0xff]  ;;  %v721_v35 = vld [vmem:[#allocation6 + $0x1c8] sm:$0xff] }
  0x39   :  { %6526 = vst [vmem:[#allocation17_spill] sm:$0xff] %v4988_v25  ;;  %v729_v43 = vld [vmem:[#allocation6 + $0x228] sm:$0xff]  ;;  %v682_v46 = vld [vmem:[#allocation6] sm:$0xff]  ;;  %v703_v6 = vld [vmem:[#allocation6 + $0xf8] sm:$0xff] }
  0x3a   :  { %3017 = vmatmul.mubr.msk.f32.gmra.mrb[6].mxu0 %vm72_vm1, %v62_v22  ;;  %v3047_v22 = vpack.c.bf16 %v236_v13, %v230_v12  ;;  %6527 = vst [vmem:[#allocation18_spill] sm:$0xff] %v4999_v29  ;;  %v728_v50 = vld [vmem:[#allocation6 + $0x220] sm:$0xff]  ;;  %v691_v51 = vld [vmem:[#allocation6 + $0x68] sm:$0xff]  ;;  %v740_v13 = vld [vmem:[#allocation6 + $0x2b0] sm:$0xff] }
  0x3b   :  { %359 = vmatprep.mubr.f32.mxu0 %v6256_v26  ;;  %v737_v57 = vld [vmem:[#allocation6 + $0x288] sm:$0xff]  ;;  %v690_v60 = vld [vmem:[#allocation6 + $0x60] sm:$0xff]  ;;  %v711_v20 = vld [vmem:[#allocation6 + $0x158] sm:$0xff] }
  0x3c   :  { %v736_v1 = vld [vmem:[#allocation6 + $0x280] sm:$0xff]  ;;  %v699_v5 = vld [vmem:[#allocation6 + $0xc8] sm:$0xff]  ;;  %v749_v21 = vld [vmem:[#allocation6 + $0x318] sm:$0xff] }
  0x3d   :  { %v745_v8 = vld [vmem:[#allocation6 + $0x2e8] sm:$0xff]  ;;  %v5063_v12 = vpack.c.bf16 %v703_v6, %v699_v5  ;;  %v722_v5 = vld [vmem:[#allocation6 + $0x1e0] sm:$0xff] }
  0x3e   :  { %v707_v17 = vld [vmem:[#allocation6 + $0x128] sm:$0xff] }
  0x3f   :  { %6539 = vst [vmem:[#allocation30_spill] sm:$0xff] %v5063_v12 }
 0x101   :  { %v3009_v31 = vpop.f32.mrb[0].mxu0 }
 0x102   :  { %v167_v34 = vpop.f32.mrb[1].mxu0  ;;  %v173_v39 = vadd.f32 %v3009_v31, %v4942_v30  ;;  %v5002_v31 = vpack.c.bf16 %v713_v24, %v709_v23 }
 0x103   :  { %v168_v37 = vadd.f32 %v4942_v30, %v167_v34  ;;  %v717_v34 = vld [vmem:[#allocation6 + $0x198] sm:$0xff] }
 0x104   :  { %v4953_v53 = vmax.f32 %v173_v39, 0.0  ;;  %6528 = vst [vmem:[#allocation19_spill] sm:$0xff] %v5002_v31  ;;  %v5018_v39 = vpack.c.bf16 %v721_v35, %v717_v34  ;;  %v752_v34 = vld [vmem:[#allocation6 + $0x340] sm:$0xff] }
 0x105   :  { %v4946_v40 = vmax.f32 %v168_v37, 0.0  ;;  %v3012_v41 = vpop.f32.mrb[2].mxu0 }
 0x106   :  { %v177_v45 = vpop.f32.mrb[3].mxu0  ;;  %v183_v48 = vadd.f32 %v3012_v41, %v4942_v30  ;;  %6530 = vst [vmem:[#allocation21_spill] sm:$0xff] %v5018_v39  ;;  %v716_v41 = vld [vmem:[#allocation6 + $0x190] sm:$0xff] }
 0x107   :  { %v178_v49 = vadd.f32 %v4942_v30, %v177_v45  ;;  %2969 = vmatmul.mubr.msk.f32.vlgmr.msra.gmra.mrb[8].mxu0 %vm270_vm4, %v4946_v40 }
 0x108   :  { %3036 = vmatpush1.bf16.msra.mxu0 %v3035_v38  ;;  %365 = vmatprep.mubr.f32.mxu0 %v6256_v26  ;;  %v4959_v63 = vmax.f32 %v183_v48, 0.0  ;;  %v5015_v38 = vpack.c.bf16 %v712_v33, %v708_v32  ;;  %v686_v48 = vld [vmem:[#allocation6 + $0x30] sm:$0xff]  ;;  %v5081_v32 = vpack.c.bf16 %v711_v20, %v707_v17  ;;  %v777_v17 = vld [vmem:[#allocation6 + $0x468] sm:$0xff] }
 0x109   :  { %v4955_v54 = vmax.f32 %v178_v49, 0.0  ;;  %3038 = vmatprep.subr.bf16.mxu0 %v3037_v42  ;;  %v3015_v55 = vpop.f32.mrb[4].mxu0  ;;  %v725_v42 = vld [vmem:[#allocation6 + $0x1f8] sm:$0xff]  ;;  %v724_v49 = vld [vmem:[#allocation6 + $0x1f0] sm:$0xff]  ;;  %v5041_v58 = vpack.c.bf16 %v686_v48, %v682_v46  ;;  %v714_v48 = vld [vmem:[#allocation6 + $0x180] sm:$0xff] }
 0x10a   :  { %v187_v59 = vpop.f32.mrb[5].mxu0  ;;  %v193_v14 = vadd.f32 %v3015_v55, %v4942_v30  ;;  %6529 = vst [vmem:[#allocation20_spill] sm:$0xff] %v5015_v38  ;;  %v5032_v47 = vpack.c.bf16 %v729_v43, %v725_v42  ;;  %v733_v55 = vld [vmem:[#allocation6 + $0x258] sm:$0xff]  ;;  %6543 = vst [vmem:[#allocation34_spill] sm:$0xff] %v5081_v32  ;;  %v748_v33 = vld [vmem:[#allocation6 + $0x310] sm:$0xff] }
 0x10b   :  { %2970 = vmatmul.mubr.msk.f32.gmra.mrb[10].mxu0 %vm270_vm4, %v4953_v53  ;;  %2971 = vmatmul.mubr.msk.f32.vlgmr.msra.gmra.mrb[0].mxu1 %vm270_vm4, %v4955_v54  ;;  %v188_v0 = vadd.f32 %v4942_v30, %v187_v59  ;;  %6533 = vst [vmem:[#allocation24_spill] sm:$0xff] %v5041_v58  ;;  %v5043_v59 = vpack.c.bf16 %v728_v50, %v724_v49  ;;  %v761_v42 = vld [vmem:[#allocation6 + $0x3a8] sm:$0xff]  ;;  %v756_v50 = vld [vmem:[#allocation6 + $0x370] sm:$0xff] }
 0x10c   :  { %3040 = vmatpush1.bf16.msra.mxu0 %v3039_v52  ;;  %377 = vmatprep.mubr.f32.mxu1 %v6256_v26  ;;  %v4990_v27 = vmax.f32 %v193_v14, 0.0  ;;  %6532 = vst [vmem:[#allocation23_spill] sm:$0xff] %v5032_v47  ;;  %v695_v52 = vld [vmem:[#allocation6 + $0x98] sm:$0xff]  ;;  %v5049_v2 = vpack.c.bf16 %v737_v57, %v733_v55  ;;  %v744_v14 = vld [vmem:[#allocation6 + $0x2e0] sm:$0xff]  ;;  %v5095_v46 = vpack.c.bf16 %v752_v34, %v748_v33  ;;  %v723_v55 = vld [vmem:[#allocation6 + $0x1e8] sm:$0xff] }
 0x10d   :  { %472 = vmatprep.mubr.f32.mxu0 %v6256_v26  ;;  %3114 = vmatprep.subr.bf16.mxu0 %v4957_v56  ;;  %v3018_v7 = vpop.f32.mrb[6].mxu0  ;;  %v4974_v15 = vmax.f32 %v188_v0, 0.0  ;;  %6534 = vst [vmem:[#allocation25_spill] sm:$0xff] %v5043_v59  ;;  %v5046_v61 = vpack.c.bf16 %v695_v52, %v691_v51  ;;  %v732_v0 = vld [vmem:[#allocation6 + $0x250] sm:$0xff]  ;;  %v5077_v24 = vpack.c.bf16 %v744_v14, %v740_v13  ;;  %v760_v51 = vld [vmem:[#allocation6 + $0x3a0] sm:$0xff]  ;;  %v727_v57 = vld [vmem:[#allocation6 + $0x218] sm:$0xff] }
 0x10e   :  { %v197_v9 = vpop.f32.mrb[7].mxu0  ;;  %3044 = vmatpush1.bf16.msra.mxu1 %v3043_v62  ;;  %v203_v36 = vadd.f32 %v3018_v7, %v4942_v30  ;;  %v694_v62 = vld [vmem:[#allocation6 + $0x90] sm:$0xff]  ;;  %6536 = vst [vmem:[#allocation27_spill] sm:$0xff] %v5049_v2  ;;  %v741_v7 = vld [vmem:[#allocation6 + $0x2b8] sm:$0xff]  ;;  %v5059_v10 = vpack.c.bf16 %v736_v1, %v732_v0  ;;  %6546 = vst [vmem:[#allocation37_spill] sm:$0xff] %v5095_v46  ;;  %v5111_v1 = vpack.c.bf16 %v760_v51, %v756_v50 }
 0x10f   :  { %2972 = vmatmul.mubr.msk.f32.gmra.mrb[2].mxu1 %vm270_vm4, %v4959_v63  ;;  %2977 = vmatmul.mubr.msk.f32.vlgmr.msra.gmra.mrb[12].mxu0 %vm270_vm4, %v4946_v40  ;;  %v198_v28 = vadd.f32 %v4942_v30, %v197_v9  ;;  %v720_v30 = vld [vmem:[#allocation6 + $0x1c0] sm:$0xff]  ;;  %6535 = vst [vmem:[#allocation26_spill] sm:$0xff] %v5046_v61  ;;  %v5057_v9 = vpack.c.bf16 %v694_v62, %v690_v60  ;;  %6542 = vst [vmem:[#allocation33_spill] sm:$0xff] %v5077_v24  ;;  %v765_v60 = vld [vmem:[#allocation6 + $0x3d8] sm:$0xff] }
 0x110   :  { %3116 = vmatpush1.bf16.msra.mxu0 %v4967_v3  ;;  %383 = vmatprep.mubr.f32.mxu1 %v6256_v26  ;;  %v5021_v44 = vmax.f32 %v203_v36, 0.0  ;;  %v5029_v45 = vpack.c.bf16 %v720_v30, %v716_v41  ;;  %6538 = vst [vmem:[#allocation29_spill] sm:$0xff] %v5059_v10  ;;  %v5066_v16 = vpack.c.bf16 %v745_v8, %v741_v7  ;;  %v715_v36 = vld [vmem:[#allocation6 + $0x188] sm:$0xff]  ;;  %v719_v41 = vld [vmem:[#allocation6 + $0x1b8] sm:$0xff]  ;;  %6550 = vst [vmem:[#allocation41_spill] sm:$0xff] %v5111_v1 }
 0x111   :  { %478 = vmatprep.mubr.f32.mxu0 %v6256_v26  ;;  %3118 = vmatprep.subr.bf16.mxu0 %v4971_v4  ;;  %v5007_v37 = vmax.f32 %v198_v28, 0.0  ;;  %6537 = vst [vmem:[#allocation28_spill] sm:$0xff] %v5057_v9  ;;  %v706_v28 = vld [vmem:[#allocation6 + $0x120] sm:$0xff]  ;;  %v757_v30 = vld [vmem:[#allocation6 + $0x378] sm:$0xff]  ;;  %v5099_v49 = vpack.c.bf16 %v719_v41, %v715_v36  ;;  %v769_v62 = vld [vmem:[#allocation6 + $0x408] sm:$0xff]  ;;  %v5115_v6 = vpack.c.bf16 %v727_v57, %v723_v55 }
 0x112   :  { %3046 = vmatprep.subr.bf16.mxu1 %v3045_v11  ;;  %6531 = vst [vmem:[#allocation22_spill] sm:$0xff] %v5029_v45  ;;  %v698_v11 = vld [vmem:[#allocation6 + $0xc0] sm:$0xff]  ;;  %6540 = vst [vmem:[#allocation31_spill] sm:$0xff] %v5066_v16  ;;  %v5102_v52 = vpack.c.bf16 %v761_v42, %v757_v30  ;;  %v726_v7 = vld [vmem:[#allocation6 + $0x210] sm:$0xff] }
 0x113   :  { %2973 = vmatmul.mubr.msk.f32.gmra.mrb[4].mxu1 %vm270_vm4, %v4974_v15  ;;  %2978 = vmatmul.mubr.msk.f32.gmra.mrb[14].mxu0 %vm270_vm4, %v4953_v53  ;;  %6547 = vst [vmem:[#allocation38_spill] sm:$0xff] %v5099_v49  ;;  %6551 = vst [vmem:[#allocation42_spill] sm:$0xff] %v5115_v6  ;;  %v764_v8 = vld [vmem:[#allocation6 + $0x3d0] sm:$0xff]  ;;  %v735_v13 = vld [vmem:[#allocation6 + $0x278] sm:$0xff]  ;;  %v5124_v20 = vpack.c.bf16 %v726_v7, %v722_v5 }
 0x114   :  { %3120 = vmatpush1.bf16.msra.mxu0 %v4982_v18  ;;  %389 = vmatprep.mubr.f32.mxu1 %v6256_v26  ;;  %6548 = vst [vmem:[#allocation39_spill] sm:$0xff] %v5102_v52  ;;  %v773_v14 = vld [vmem:[#allocation6 + $0x438] sm:$0xff]  ;;  %v772_v33 = vld [vmem:[#allocation6 + $0x430] sm:$0xff]  ;;  %v739_v36 = vld [vmem:[#allocation6 + $0x2a8] sm:$0xff] }
 0x115   :  { %3122 = vmatprep.subr.bf16.mxu0 %v4986_v19  ;;  %3048 = vmatpush1.bf16.msra.mxu1 %v3047_v22  ;;  %v753_v22 = vld [vmem:[#allocation6 + $0x348] sm:$0xff]  ;;  %6553 = vst [vmem:[#allocation44_spill] sm:$0xff] %v5124_v20  ;;  %v5133_v34 = vpack.c.bf16 %v777_v17, %v773_v14  ;;  %v743_v41 = vld [vmem:[#allocation6 + $0x2d8] sm:$0xff]  ;;  %v738_v50 = vld [vmem:[#allocation6 + $0x2a0] sm:$0xff] }
 0x116   :  { %484 = vmatprep.mubr.f32.mxu0 %v6256_v26  ;;  %3050 = vmatprep.subr.bf16.mxu1 %v4988_v25  ;;  %v5084_v35 = vpack.c.bf16 %v753_v22, %v749_v21  ;;  %v730_v22 = vld [vmem:[#allocation6 + $0x240] sm:$0xff]  ;;  %v781_v30 = vld [vmem:[#allocation6 + $0x498] sm:$0xff]  ;;  %v785_v42 = vld [vmem:[#allocation6 + $0x4c8] sm:$0xff]  ;;  %v5145_v55 = vpack.c.bf16 %v743_v41, %v739_v36 }
 0x117   :  { %2974 = vmatmul.mubr.msk.f32.gmra.mrb[6].mxu1 %vm270_vm4, %v4990_v27  ;;  %2979 = vmatmul.mubr.msk.f32.gmra.mrb[16].mxu0 %vm270_vm4, %v4955_v54  ;;  %6556 = vst [vmem:[#allocation47_spill] sm:$0xff] %v5133_v34  ;;  %v742_v51 = vld [vmem:[#allocation6 + $0x2d0] sm:$0xff]  ;;  %v751_v5 = vld [vmem:[#allocation6 + $0x338] sm:$0xff]  ;;  %v801_v41 = vld [vmem:[#allocation6 + $0x588] sm:$0xff] }
 0x118   :  { %3124 = vmatpush1.bf16.msra.mxu0 %v4999_v29  ;;  %395 = vmatprep.mubr.f32.mxu1 %v6256_v26  ;;  %6544 = vst [vmem:[#allocation35_spill] sm:$0xff] %v5084_v35  ;;  %6559 = vst [vmem:[#allocation50_spill] sm:$0xff] %v5145_v55  ;;  %v780_v57 = vld [vmem:[#allocation6 + $0x490] sm:$0xff]  ;;  %v789_v7 = vld [vmem:[#allocation6 + $0x4f8] sm:$0xff] }
 0x119   :  { %3126 = vmatprep.subr.bf16.mxu0 %v5002_v31  ;;  %490 = vmatprep.mubr.f32.mxu0 %v6256_v26  ;;  %v750_v14 = vld [vmem:[#allocation6 + $0x330] sm:$0xff]  ;;  %v797_v36 = vld [vmem:[#allocation6 + $0x558] sm:$0xff] }
 0x11b   :  { %2975 = vmatmul.mubr.msk.f32.gmra.mrb[8].mxu1 %vm270_vm4, %v5007_v37  ;;  %2980 = vmatmul.mubr.msk.f32.gmra.mrb[18].mxu0 %vm270_vm4, %v4959_v63 }
 0x11c   :  { %3128 = vmatpush1.bf16.msra.mxu0 %v5015_v38  ;;  %401 = vmatprep.mubr.f32.mxu1 %v6256_v26 }
 0x11d   :  { %3130 = vmatprep.subr.bf16.mxu0 %v5018_v39  ;;  %496 = vmatprep.mubr.f32.mxu0 %v6256_v26 }
 0x11f   :  { %2976 = vmatmul.mubr.msk.f32.gmra.mrb[10].mxu1 %vm270_vm4, %v5021_v44  ;;  %2981 = vmatmul.mubr.msk.f32.gmra.mrb[20].mxu0 %vm270_vm4, %v4974_v15 }
 0x120   :  { %3132 = vmatpush1.bf16.msra.mxu0 %v5029_v45  ;;  %585 = vmatprep.mubr.f32.mxu1 %v6256_v26 }
 0x121   :  { %3134 = vmatprep.subr.bf16.mxu0 %v5032_v47  ;;  %502 = vmatprep.mubr.f32.mxu0 %v6256_v26 }
 0x123   :  { %2985 = vmatmul.mubr.msk.f32.vlgmr.msra.gmra.mrb[12].mxu1 %vm270_vm4, %v4946_v40  ;;  %2982 = vmatmul.mubr.msk.f32.gmra.mrb[22].mxu0 %vm270_vm4, %v4990_v27  ;;  %v702_v40 = vld [vmem:[#allocation6 + $0xf0] sm:$0xff] }
 0x124   :  { %3052 = vmatpush1.bf16.msra.mxu1 %v5041_v58  ;;  %3136 = vmatpush1.bf16.msra.mxu0 %v5043_v59  ;;  %v5075_v23 = vpack.c.bf16 %v702_v40, %v698_v11  ;;  %v5118_v11 = vpack.c.bf16 %v769_v62, %v765_v60  ;;  %v731_v40 = vld [vmem:[#allocation6 + $0x248] sm:$0xff]  ;;  %v5148_v62 = vpack.c.bf16 %v785_v42, %v781_v30 }
 0x125   :  { %591 = vmatprep.mubr.f32.mxu1 %v6256_v26  ;;  %3054 = vmatprep.subr.bf16.mxu1 %v5046_v61  ;;  %v747_v60 = vld [vmem:[#allocation6 + $0x308] sm:$0xff] }
 0x126   :  { %3138 = vmatprep.subr.bf16.mxu0 %v5049_v2  ;;  %508 = vmatprep.mubr.f32.mxu0 %v6256_v26  ;;  %6541 = vst [vmem:[#allocation32_spill] sm:$0xff] %v5075_v23  ;;  %6552 = vst [vmem:[#allocation43_spill] sm:$0xff] %v5118_v11  ;;  %v5160_v17 = vpack.c.bf16 %v751_v5, %v747_v60  ;;  %v796_v60 = vld [vmem:[#allocation6 + $0x550] sm:$0xff]  ;;  %v763_v5 = vld [vmem:[#allocation6 + $0x3c8] sm:$0xff] }
 0x127   :  { %2986 = vmatmul.mubr.msk.f32.gmra.mrb[14].mxu1 %vm270_vm4, %v4953_v53  ;;  %2983 = vmatmul.mubr.msk.f32.gmra.mrb[24].mxu0 %vm270_vm4, %v5007_v37  ;;  %v710_v53 = vld [vmem:[#allocation6 + $0x150] sm:$0xff]  ;;  %6560 = vst [vmem:[#allocation51_spill] sm:$0xff] %v5148_v62 }
 0x128   :  { %3056 = vmatpush1.bf16.msra.mxu1 %v5057_v9  ;;  %3140 = vmatpush1.bf16.msra.mxu0 %v5059_v10  ;;  %v5093_v43 = vpack.c.bf16 %v710_v53, %v706_v28  ;;  %v5130_v28 = vpack.c.bf16 %v735_v13, %v731_v40  ;;  %v734_v53 = vld [vmem:[#allocation6 + $0x270] sm:$0xff]  ;;  %v746_v13 = vld [vmem:[#allocation6 + $0x300] sm:$0xff]  ;;  %6563 = vst [vmem:[#allocation54_spill] sm:$0xff] %v5160_v17  ;;  %v833_v10 = vld [vmem:[#allocation6 + $0x238] sm:$0xff] }
 0x129   :  { %597 = vmatprep.mubr.f32.mxu1 %v6256_v26  ;;  %3058 = vmatprep.subr.bf16.mxu1 %v5063_v12  ;;  %v5169_v30 = vpack.c.bf16 %v750_v14, %v746_v13  ;;  %v6569_v13 = vmov 0.0  }
 0x12a   :  { %3142 = vmatprep.subr.bf16.mxu0 %v5066_v16  ;;  %514 = vmatprep.mubr.f32.mxu0 %v6256_v26  ;;  %6545 = vst [vmem:[#allocation36_spill] sm:$0xff] %v5093_v43  ;;  %6555 = vst [vmem:[#allocation46_spill] sm:$0xff] %v5130_v28  ;;  %v827_v16 = vld [vmem:[#allocation6 + $0x1a8] sm:$0xff] }
 0x12b   :  { %2987 = vmatmul.mubr.msk.f32.gmra.mrb[16].mxu1 %vm270_vm4, %v4955_v54  ;;  %2984 = vmatmul.mubr.msk.f32.gmra.mrb[26].mxu0 %vm270_vm4, %v5021_v44  ;;  %v718_v54 = vld [vmem:[#allocation6 + $0x1b0] sm:$0xff]  ;;  %6565 = vst [vmem:[#allocation56_spill] sm:$0xff] %v5169_v30 }
 0x12c   :  { %3060 = vmatpush1.bf16.msra.mxu1 %v5075_v23  ;;  %3144 = vmatpush1.bf16.msra.mxu0 %v5077_v24  ;;  %v5109_v0 = vpack.c.bf16 %v718_v54, %v714_v48  ;;  %v5139_v48 = vpack.c.bf16 %v734_v53, %v730_v22  ;;  %v788_v53 = vld [vmem:[#allocation6 + $0x4f0] sm:$0xff]  ;;  %v807_v24 = vld [vmem:[#allocation6 + $0x5d8] sm:$0xff] }
 0x12d   :  { %603 = vmatprep.mubr.f32.mxu1 %v6256_v26  ;;  %3062 = vmatprep.subr.bf16.mxu1 %v5081_v32 }
 0x12e   :  { %3146 = vmatprep.subr.bf16.mxu0 %v5084_v35  ;;  %1019 = vmatprep.mubr.f32.mxu0 %v6256_v26  ;;  %6549 = vst [vmem:[#allocation40_spill] sm:$0xff] %v5109_v0  ;;  %6557 = vst [vmem:[#allocation48_spill] sm:$0xff] %v5139_v48  ;;  %v823_v35 = vld [vmem:[#allocation6 + $0x148] sm:$0xff] }
 0x12f   :  { %2988 = vmatmul.mubr.msk.f32.gmra.mrb[18].mxu1 %vm270_vm4, %v4959_v63  ;;  %v768_v63 = vld [vmem:[#allocation6 + $0x400] sm:$0xff] }
 0x130   :  { %3064 = vmatpush1.bf16.msra.mxu1 %v5093_v43  ;;  %3148 = vmatpush1.bf16.msra.mxu0 %v5095_v46  ;;  %v5126_v21 = vpack.c.bf16 %v768_v63, %v764_v8  ;;  %v793_v8 = vld [vmem:[#allocation6 + $0x528] sm:$0xff]  ;;  %v5154_v63 = vpack.c.bf16 %v742_v51, %v738_v50  ;;  %v754_v50 = vld [vmem:[#allocation6 + $0x360] sm:$0xff]  ;;  %v758_v51 = vld [vmem:[#allocation6 + $0x390] sm:$0xff] }
 0x131   :  { %609 = vmatprep.mubr.f32.mxu1 %v6256_v26  ;;  %3066 = vmatprep.subr.bf16.mxu1 %v5099_v49  ;;  %v5162_v22 = vpack.c.bf16 %v793_v8, %v789_v7  ;;  %v767_v7 = vld [vmem:[#allocation6 + $0x3f8] sm:$0xff]  ;;  %v5182_v14 = vpack.c.bf16 %v758_v51, %v754_v50 }
 0x132   :  { %3150 = vmatprep.subr.bf16.mxu0 %v5102_v52  ;;  %6554 = vst [vmem:[#allocation45_spill] sm:$0xff] %v5126_v21  ;;  %6561 = vst [vmem:[#allocation52_spill] sm:$0xff] %v5154_v63  ;;  %v805_v8 = vld [vmem:[#allocation6 + $0x5b8] sm:$0xff]  ;;  %v795_v52 = vld [vmem:[#allocation6 + $0x548] sm:$0xff] }
 0x133   :  { %2989 = vmatmul.mubr.msk.f32.gmra.mrb[20].mxu1 %vm270_vm4, %v4974_v15  ;;  %v776_v15 = vld [vmem:[#allocation6 + $0x460] sm:$0xff]  ;;  %6564 = vst [vmem:[#allocation55_spill] sm:$0xff] %v5162_v22  ;;  %6570 = vst [vmem:[#allocation60_spill] sm:$0xff] %v5182_v14  ;;  %v799_v46 = vld [vmem:[#allocation6 + $0x578] sm:$0xff] }
 0x134   :  { %3068 = vmatpush1.bf16.msra.mxu1 %v5109_v0  ;;  %3152 = vmatpush1.bf16.msra.mxu0 %v5111_v1  ;;  %v5141_v54 = vpack.c.bf16 %v776_v15, %v772_v33  ;;  %v755_v33 = vld [vmem:[#allocation6 + $0x368] sm:$0xff]  ;;  %v759_v15 = vld [vmem:[#allocation6 + $0x398] sm:$0xff] }
 0x135   :  { %615 = vmatprep.mubr.f32.mxu1 %v6256_v26  ;;  %3070 = vmatprep.subr.bf16.mxu1 %v5115_v6  ;;  %v819_v1 = vld [vmem:[#allocation6 + $0xe8] sm:$0xff] }
 0x136   :  { %3154 = vmatprep.subr.bf16.mxu0 %v5118_v11  ;;  %6558 = vst [vmem:[#allocation49_spill] sm:$0xff] %v5141_v54  ;;  %v791_v11 = vld [vmem:[#allocation6 + $0x518] sm:$0xff] }
 0x137   :  { %2990 = vmatmul.mubr.msk.f32.gmra.mrb[22].mxu1 %vm270_vm4, %v4990_v27  ;;  %v784_v27 = vld [vmem:[#allocation6 + $0x4c0] sm:$0xff] }
 0x138   :  { %3072 = vmatpush1.bf16.msra.mxu1 %v5124_v20  ;;  %3156 = vmatpush1.bf16.msra.mxu0 %v5126_v21  ;;  %v5156_v40 = vpack.c.bf16 %v784_v27, %v780_v57  ;;  %v5175_v57 = vpack.c.bf16 %v759_v15, %v755_v33  ;;  %v5177_v27 = vpack.c.bf16 %v801_v41, %v797_v36  ;;  %v766_v33 = vld [vmem:[#allocation6 + $0x3f0] sm:$0xff]  ;;  %v815_v21 = vld [vmem:[#allocation6 + $0x88] sm:$0xff] }
 0x139   :  { %621 = vmatprep.mubr.f32.mxu1 %v6256_v26  ;;  %3074 = vmatprep.subr.bf16.mxu1 %v5130_v28  ;;  %v5188_v15 = vpack.c.bf16 %v767_v7, %v763_v5  ;;  %v804_v41 = vld [vmem:[#allocation6 + $0x5b0] sm:$0xff]  ;;  %v810_v7 = vld [vmem:[#allocation6 + $0x20] sm:$0xff] }
 0x13a   :  { %3158 = vmatprep.subr.bf16.mxu0 %v5133_v34  ;;  %6562 = vst [vmem:[#allocation53_spill] sm:$0xff] %v5156_v40  ;;  %6567 = vst [vmem:[#allocation58_spill] sm:$0xff] %v5175_v57  ;;  %v783_v34 = vld [vmem:[#allocation6 + $0x4b8] sm:$0xff] }
 0x13b   :  { %2991 = vmatmul.mubr.msk.f32.gmra.mrb[24].mxu1 %vm270_vm4, %v5007_v37  ;;  %v792_v37 = vld [vmem:[#allocation6 + $0x520] sm:$0xff]  ;;  %6568 = vst [vmem:[#allocation59_spill] sm:$0xff] %v5177_v27  ;;  %6572 = vst [vmem:[#allocation62_spill] sm:$0xff] %v5188_v15 }
 0x13c   :  { %3076 = vmatpush1.bf16.msra.mxu1 %v5139_v48  ;;  %3160 = vmatpush1.bf16.msra.mxu0 %v5141_v54  ;;  %v5171_v42 = vpack.c.bf16 %v792_v37, %v788_v53  ;;  %v762_v37 = vld [vmem:[#allocation6 + $0x3c0] sm:$0xff]  ;;  %v811_v54 = vld [vmem:[#allocation6 + $0x28] sm:$0xff] }
 0x13d   :  { %627 = vmatprep.mubr.f32.mxu1 %v6256_v26  ;;  %3078 = vmatprep.subr.bf16.mxu1 %v5145_v55  ;;  %v809_v26 = vld [vmem:[#allocation6 + $0x5e8] sm:$0xff]  ;;  %v5194_v50 = vpack.c.bf16 %v766_v33, %v762_v37  ;;  %v778_v33 = vld [vmem:[#allocation6 + $0x480] sm:$0xff] }
 0x13e   :  { %3162 = vmatprep.subr.bf16.mxu0 %v5148_v62  ;;  %6566 = vst [vmem:[#allocation57_spill] sm:$0xff] %v5171_v42  ;;  %v5190_v36 = vpack.c.bf16 %v809_v26, %v805_v8  ;;  %v775_v62 = vld [vmem:[#allocation6 + $0x458] sm:$0xff]  ;;  %v812_v8 = vld [vmem:[#allocation6 + $0x50] sm:$0xff] }
 0x13f   :  { %2992 = vmatmul.mubr.msk.f32.gmra.mrb[26].mxu1 %vm270_vm4, %v5021_v44  ;;  %v800_v44 = vld [vmem:[#allocation6 + $0x580] sm:$0xff]  ;;  %6574 = vst [vmem:[#allocation64_spill] sm:$0xff] %v5194_v50  ;;  %v5208_v37 = vpack.c.bf16 %v812_v8, %v810_v7  ;;  %v820_v8 = vld [vmem:[#allocation6 + $0x110] sm:$0xff] }
 0x140   :  { %3080 = vmatpush1.bf16.msra.mxu1 %v5154_v63  ;;  %3164 = vmatpush1.bf16.msra.mxu0 %v5156_v40  ;;  %v5184_v53 = vpack.c.bf16 %v800_v44, %v796_v60  ;;  %6573 = vst [vmem:[#allocation63_spill] sm:$0xff] %v5190_v36  ;;  %v771_v40 = vld [vmem:[#allocation6 + $0x428] sm:$0xff]  ;;  %v770_v60 = vld [vmem:[#allocation6 + $0x420] sm:$0xff]  ;;  %v774_v44 = vld [vmem:[#allocation6 + $0x450] sm:$0xff] }
 0x141   :  { %3082 = vmatprep.subr.bf16.mxu1 %v5160_v17  ;;  %3166 = vmatprep.subr.bf16.mxu0 %v5162_v22  ;;  %v808_v22 = vld [vmem:[#allocation6 + $0x5e0] sm:$0xff]  ;;  %v5200_v26 = vpack.c.bf16 %v775_v62, %v771_v40  ;;  %6579 = vst [vmem:[#allocation69_spill] sm:$0xff] %v5208_v37 }
 0x142   :  { %948 = vmatprep.mubr.f32.mxu1 %v6569_v13  ;;  %6571 = vst [vmem:[#allocation61_spill] sm:$0xff] %v5184_v53  ;;  %v5196_v51 = vpack.c.bf16 %v808_v22, %v804_v41  ;;  %v5206_v22 = vpack.c.bf16 %v774_v44, %v770_v60  ;;  %v782_v41 = vld [vmem:[#allocation6 + $0x4b0] sm:$0xff]  ;;  %v814_v40 = vld [vmem:[#allocation6 + $0x80] sm:$0xff] }
 0x143   :  { %6576 = vst [vmem:[#allocation66_spill] sm:$0xff] %v5200_v26  ;;  %v5219_v60 = vpack.c.bf16 %v782_v41, %v778_v33  ;;  %v818_v7 = vld [vmem:[#allocation6 + $0xe0] sm:$0xff] }
 0x144   :  { %3084 = vmatpush1.bf16.msra.mxu1 %v5169_v30  ;;  %3168 = vmatpush1.bf16.msra.mxu0 %v5171_v42  ;;  %v813_v42 = vld [vmem:[#allocation6 + $0x58] sm:$0xff]  ;;  %6575 = vst [vmem:[#allocation65_spill] sm:$0xff] %v5196_v51  ;;  %6578 = vst [vmem:[#allocation68_spill] sm:$0xff] %v5206_v22  ;;  %v5234_v41 = vpack.c.bf16 %v820_v8, %v818_v7  ;;  %v802_v7 = vld [vmem:[#allocation6 + $0x5a0] sm:$0xff] }
 0x145   :  { %3086 = vmatprep.subr.bf16.mxu1 %v5175_v57  ;;  %3170 = vmatprep.subr.bf16.mxu0 %v5177_v27  ;;  %v5202_v5 = vpack.c.bf16 %v813_v42, %v811_v54  ;;  %v779_v27 = vld [vmem:[#allocation6 + $0x488] sm:$0xff]  ;;  %v816_v42 = vld [vmem:[#allocation6 + $0xb0] sm:$0xff]  ;;  %6582 = vst [vmem:[#allocation72_spill] sm:$0xff] %v5219_v60 }
 0x146   :  { %v5212_v54 = vpack.c.bf16 %v783_v34, %v779_v27  ;;  %v5221_v44 = vpack.c.bf16 %v816_v42, %v814_v40  ;;  %v786_v34 = vld [vmem:[#allocation6 + $0x4e0] sm:$0xff]  ;;  %v790_v27 = vld [vmem:[#allocation6 + $0x510] sm:$0xff] }
 0x147   :  { %6577 = vst [vmem:[#allocation67_spill] sm:$0xff] %v5202_v5  ;;  %v5232_v33 = vpack.c.bf16 %v790_v27, %v786_v34  ;;  %v822_v40 = vld [vmem:[#allocation6 + $0x140] sm:$0xff]  ;;  %v824_v42 = vld [vmem:[#allocation6 + $0x170] sm:$0xff] }
 0x148   :  { %3088 = vmatpush1.bf16.msra.mxu1 %v5182_v14  ;;  %3172 = vmatpush1.bf16.msra.mxu0 %v5184_v53  ;;  %v817_v53 = vld [vmem:[#allocation6 + $0xb8] sm:$0xff]  ;;  %6580 = vst [vmem:[#allocation70_spill] sm:$0xff] %v5212_v54  ;;  %6583 = vst [vmem:[#allocation73_spill] sm:$0xff] %v5221_v44  ;;  %v5246_v27 = vpack.c.bf16 %v824_v42, %v822_v40  ;;  %v828_v8 = vld [vmem:[#allocation6 + $0x1d0] sm:$0xff] }
 0x149   :  { %3090 = vmatprep.subr.bf16.mxu1 %v5188_v15  ;;  %3174 = vmatprep.subr.bf16.mxu0 %v5190_v36  ;;  %v5214_v62 = vpack.c.bf16 %v817_v53, %v815_v21  ;;  %v787_v36 = vld [vmem:[#allocation6 + $0x4e8] sm:$0xff]  ;;  %6586 = vst [vmem:[#allocation76_spill] sm:$0xff] %v5232_v33  ;;  %v837_v40 = vld [vmem:[#allocation6 + $0x298] sm:$0xff] }
 0x14a   :  { %v5225_v21 = vpack.c.bf16 %v791_v11, %v787_v36  ;;  %v794_v11 = vld [vmem:[#allocation6 + $0x540] sm:$0xff]  ;;  %v798_v36 = vld [vmem:[#allocation6 + $0x570] sm:$0xff] }
 0x14b   :  { %6581 = vst [vmem:[#allocation71_spill] sm:$0xff] %v5214_v62  ;;  %v5244_v34 = vpack.c.bf16 %v798_v36, %v794_v11 }
 0x14c   :  { %3092 = vmatpush1.bf16.msra.mxu1 %v5194_v50  ;;  %3176 = vmatpush1.bf16.msra.mxu0 %v5196_v51  ;;  %v821_v51 = vld [vmem:[#allocation6 + $0x118] sm:$0xff]  ;;  %6584 = vst [vmem:[#allocation74_spill] sm:$0xff] %v5225_v21 }
 0x14d   :  { %3094 = vmatprep.subr.bf16.mxu1 %v5200_v26  ;;  %3178 = vmatprep.subr.bf16.mxu0 %v5202_v5  ;;  %v5227_v53 = vpack.c.bf16 %v821_v51, %v819_v1  ;;  %v5238_v1 = vpack.c.bf16 %v799_v46, %v795_v52  ;;  %6588 = vst [vmem:[#allocation78_spill] sm:$0xff] %v5244_v34  ;;  %v806_v52 = vld [vmem:[#allocation6 + $0x5d0] sm:$0xff] }
 0x14e   :  { %v5256_v11 = vpack.c.bf16 %v806_v52, %v802_v7  ;;  %v834_v52 = vld [vmem:[#allocation6 + $0x260] sm:$0xff] }
 0x14f   :  { %1020 = vmatmul.mubr.f32.vlgmr.msra.gmra.mrb[12].mxu0 %v6569_v13  ;;  %6585 = vst [vmem:[#allocation75_spill] sm:$0xff] %v5227_v53  ;;  %6587 = vst [vmem:[#allocation77_spill] sm:$0xff] %v5238_v1 }
 0x150   :  { %3096 = vmatpush1.bf16.msra.mxu1 %v5206_v22  ;;  %3180 = vmatpush1.bf16.msra.mxu0 %v5208_v37  ;;  %v825_v37 = vld [vmem:[#allocation6 + $0x178] sm:$0xff]  ;;  %6590 = vst [vmem:[#allocation80_spill] sm:$0xff] %v5256_v11 }
 0x151   :  { %3098 = vmatprep.subr.bf16.mxu1 %v5212_v54  ;;  %3182 = vmatprep.subr.bf16.mxu0 %v5214_v62  ;;  %v5240_v51 = vpack.c.bf16 %v825_v37, %v823_v35  ;;  %v803_v62 = vld [vmem:[#allocation6 + $0x5a8] sm:$0xff]  ;;  %v826_v37 = vld [vmem:[#allocation6 + $0x1a0] sm:$0xff] }
 0x152   :  { %1101 = vmatprep.mubr.f32.mxu0 %v6569_v13  ;;  %v5250_v35 = vpack.c.bf16 %v807_v24, %v803_v62  ;;  %v5258_v36 = vpack.c.bf16 %v828_v8, %v826_v37  ;;  %v832_v62 = vld [vmem:[#allocation6 + $0x230] sm:$0xff] }
 0x153   :  { %v836_v37 = vld [vmem:[#allocation6 + $0x290] sm:$0xff] }
 0x154   :  { %3100 = vmatpush1.bf16.msra.mxu1 %v5219_v60  ;;  %3184 = vmatpush1.bf16.msra.mxu0 %v5221_v44  ;;  %v829_v44 = vld [vmem:[#allocation6 + $0x1d8] sm:$0xff]  ;;  %6589 = vst [vmem:[#allocation79_spill] sm:$0xff] %v5250_v35  ;;  %v5274_v8 = vpack.c.bf16 %v836_v37, %v834_v52  ;;  %v842_v37 = vld [vmem:[#allocation6 + $0x320] sm:$0xff] }
 0x155   :  { %3102 = vmatprep.subr.bf16.mxu1 %v5225_v21  ;;  %3186 = vmatprep.subr.bf16.mxu0 %v5227_v53  ;;  %v5252_v46 = vpack.c.bf16 %v829_v44, %v827_v16  ;;  %v831_v53 = vld [vmem:[#allocation6 + $0x208] sm:$0xff]  ;;  %v830_v16 = vld [vmem:[#allocation6 + $0x200] sm:$0xff] }
 0x156   :  { %v5262_v24 = vpack.c.bf16 %v833_v10, %v831_v53  ;;  %v835_v44 = vld [vmem:[#allocation6 + $0x268] sm:$0xff]  ;;  %v5266_v42 = vpack.c.bf16 %v832_v62, %v830_v16  ;;  %v841_v53 = vld [vmem:[#allocation6 + $0x2f8] sm:$0xff]  ;;  %v838_v62 = vld [vmem:[#allocation6 + $0x2c0] sm:$0xff] }
 0x157   :  { %v5269_v7 = vpack.c.bf16 %v837_v40, %v835_v44  ;;  %v839_v10 = vld [vmem:[#allocation6 + $0x2c8] sm:$0xff]  ;;  %v840_v44 = vld [vmem:[#allocation6 + $0x2f0] sm:$0xff] }
 0x158   :  { %3104 = vmatpush1.bf16.msra.mxu1 %v5232_v33  ;;  %3188 = vmatpush1.bf16.msra.mxu0 %v5234_v41  ;;  %6591 = vst [vmem:[#allocation81_spill] sm:$0xff] %v5262_v24  ;;  %v5278_v16 = vpack.c.bf16 %v841_v53, %v839_v10  ;;  %v843_v40 = vld [vmem:[#allocation6 + $0x328] sm:$0xff]  ;;  %v849_v53 = vld [vmem:[#allocation6 + $0x3b8] sm:$0xff] }
 0x159   :  { %3106 = vmatprep.subr.bf16.mxu1 %v5238_v1  ;;  %3190 = vmatprep.subr.bf16.mxu0 %v5240_v51  ;;  %v847_v10 = vld [vmem:[#allocation6 + $0x388] sm:$0xff] }
 0x15c   :  { %3108 = vmatpush1.bf16.msra.mxu1 %v5244_v34  ;;  %3192 = vmatpush1.bf16.msra.mxu0 %v5246_v27 }
 0x15d   :  { %3110 = vmatprep.subr.bf16.mxu1 %v5250_v35  ;;  %3194 = vmatprep.subr.bf16.mxu0 %v5252_v46 }
 0x160   :  { %3112 = vmatpush1.bf16.msra.mxu1 %v5256_v11  ;;  %3196 = vmatpush1.bf16.msra.mxu0 %v5258_v36 }
 0x161   :  { %3198 = vmatprep.subr.bf16.mxu0 %v5262_v24  ;;  %3242 = vmatprep.subr.bf16.mxu1 %v4988_v25  ;;  %v845_v25 = vld [vmem:[#allocation6 + $0x358] sm:$0xff]  ;;  %v5282_v24 = vpack.c.bf16 %v840_v44, %v838_v62  ;;  %v5294_v62 = vpack.c.bf16 %v849_v53, %v847_v10  ;;  %v846_v44 = vld [vmem:[#allocation6 + $0x380] sm:$0xff]  ;;  %v855_v10 = vld [vmem:[#allocation6 + $0x448] sm:$0xff] }
 0x162   :  { %v5286_v52 = vpack.c.bf16 %v845_v25, %v843_v40  ;;  %v851_v25 = vld [vmem:[#allocation6 + $0x3e8] sm:$0xff]  ;;  %v853_v40 = vld [vmem:[#allocation6 + $0x418] sm:$0xff] }
 0x163   :  { %949 = vmatmul.mubr.f32.vlgmr.msra.gmra.mrb[28].mxu1 %v6569_v13  ;;  %v857_v53 = vld [vmem:[#allocation6 + $0x478] sm:$0xff] }
 0x164   :  { %3200 = vmatpush1.bf16.msra.mxu0 %v5266_v42  ;;  %3244 = vmatpush1.bf16.msra.mxu1 %v5041_v58  ;;  %v844_v58 = vld [vmem:[#allocation6 + $0x350] sm:$0xff] }
 0x165   :  { %3202 = vmatprep.subr.bf16.mxu0 %v5269_v7  ;;  %3246 = vmatprep.subr.bf16.mxu1 %v5046_v61  ;;  %v5290_v61 = vpack.c.bf16 %v844_v58, %v842_v37  ;;  %v5302_v58 = vpack.c.bf16 %v853_v40, %v851_v25  ;;  %v850_v37 = vld [vmem:[#allocation6 + $0x3e0] sm:$0xff]  ;;  %v859_v25 = vld [vmem:[#allocation6 + $0x4a8] sm:$0xff]  ;;  %v861_v40 = vld [vmem:[#allocation6 + $0x4d8] sm:$0xff] }
 0x168   :  { %3204 = vmatpush1.bf16.msra.mxu0 %v5274_v8  ;;  %3248 = vmatpush1.bf16.msra.mxu1 %v5057_v9  ;;  %v848_v9 = vld [vmem:[#allocation6 + $0x3b0] sm:$0xff] }
 0x169   :  { %3206 = vmatprep.subr.bf16.mxu0 %v5278_v16  ;;  %3250 = vmatprep.subr.bf16.mxu1 %v5063_v12  ;;  %v5298_v12 = vpack.c.bf16 %v848_v9, %v846_v44  ;;  %v5310_v9 = vpack.c.bf16 %v857_v53, %v855_v10  ;;  %v854_v44 = vld [vmem:[#allocation6 + $0x440] sm:$0xff]  ;;  %v863_v10 = vld [vmem:[#allocation6 + $0x508] sm:$0xff]  ;;  %v865_v53 = vld [vmem:[#allocation6 + $0x538] sm:$0xff] }
 0x16b   :  { %6593 = vst [vmem:[#allocation83_spill] sm:$0xff] %v5310_v9 }
 0x16c   :  { %3208 = vmatpush1.bf16.msra.mxu0 %v5282_v24  ;;  %3252 = vmatpush1.bf16.msra.mxu1 %v5075_v23  ;;  %v852_v23 = vld [vmem:[#allocation6 + $0x410] sm:$0xff] }
 0x16d   :  { %3210 = vmatprep.subr.bf16.mxu0 %v5286_v52  ;;  %3254 = vmatprep.subr.bf16.mxu1 %v5081_v32  ;;  %v5306_v32 = vpack.c.bf16 %v852_v23, %v850_v37  ;;  %v5318_v23 = vpack.c.bf16 %v861_v40, %v859_v25  ;;  %v858_v37 = vld [vmem:[#allocation6 + $0x4a0] sm:$0xff]  ;;  %v867_v25 = vld [vmem:[#allocation6 + $0x568] sm:$0xff]  ;;  %v869_v40 = vld [vmem:[#allocation6 + $0x598] sm:$0xff] }
 0x16f   :  { %6592 = vst [vmem:[#allocation82_spill] sm:$0xff] %v5306_v32  ;;  %6595 = vst [vmem:[#allocation85_spill] sm:$0xff] %v5318_v23 }
 0x170   :  { %3212 = vmatpush1.bf16.msra.mxu0 %v5290_v61  ;;  %3256 = vmatpush1.bf16.msra.mxu1 %v5093_v43  ;;  %v856_v43 = vld [vmem:[#allocation6 + $0x470] sm:$0xff] }
 0x171   :  { %3214 = vmatprep.subr.bf16.mxu0 %v5294_v62  ;;  %3258 = vmatprep.subr.bf16.mxu1 %v5099_v49  ;;  %v5314_v49 = vpack.c.bf16 %v856_v43, %v854_v44  ;;  %v5326_v43 = vpack.c.bf16 %v865_v53, %v863_v10  ;;  %v862_v44 = vld [vmem:[#allocation6 + $0x500] sm:$0xff]  ;;  %v871_v10 = vld [vmem:[#allocation6 + $0x5c8] sm:$0xff]  ;;  %v873_v53 = vld [vmem:[#allocation6 + $0x5f8] sm:$0xff] }
 0x173   :  { %6594 = vst [vmem:[#allocation84_spill] sm:$0xff] %v5314_v49  ;;  %6597 = vst [vmem:[#allocation87_spill] sm:$0xff] %v5326_v43 }
 0x174   :  { %3216 = vmatpush1.bf16.msra.mxu0 %v5298_v12  ;;  %3260 = vmatpush1.bf16.msra.mxu1 %v5109_v0  ;;  %v860_v0 = vld [vmem:[#allocation6 + $0x4d0] sm:$0xff] }
 0x175   :  { %3218 = vmatprep.subr.bf16.mxu0 %v5302_v58  ;;  %3262 = vmatprep.subr.bf16.mxu1 %v5115_v6  ;;  %v5322_v6 = vpack.c.bf16 %v860_v0, %v858_v37  ;;  %v5334_v0 = vpack.c.bf16 %v869_v40, %v867_v25  ;;  %v866_v37 = vld [vmem:[#allocation6 + $0x560] sm:$0xff]  ;;  %v6606_v40 = vld [vmem:[#allocation35_spill] sm:$0xff] }
 0x177   :  { %6596 = vst [vmem:[#allocation86_spill] sm:$0xff] %v5322_v6  ;;  %6599 = vst [vmem:[#allocation89_spill] sm:$0xff] %v5334_v0 }
 0x178   :  { %3220 = vmatpush1.bf16.msra.mxu0 %v5306_v32  ;;  %3264 = vmatpush1.bf16.msra.mxu1 %v5124_v20  ;;  %v864_v20 = vld [vmem:[#allocation6 + $0x530] sm:$0xff] }
 0x179   :  { %3222 = vmatprep.subr.bf16.mxu0 %v5310_v9  ;;  %3266 = vmatprep.subr.bf16.mxu1 %v5130_v28  ;;  %v5330_v28 = vpack.c.bf16 %v864_v20, %v862_v44  ;;  %v5342_v20 = vpack.c.bf16 %v873_v53, %v871_v10  ;;  %v870_v44 = vld [vmem:[#allocation6 + $0x5c0] sm:$0xff]  ;;  %v6608_v10 = vld [vmem:[#allocation39_spill] sm:$0xff]  ;;  %v6609_v53 = vld [vmem:[#allocation41_spill] sm:$0xff] }
 0x17b   :  { %6598 = vst [vmem:[#allocation88_spill] sm:$0xff] %v5330_v28  ;;  %6601 = vst [vmem:[#allocation91_spill] sm:$0xff] %v5342_v20 }
 0x17c   :  { %3224 = vmatpush1.bf16.msra.mxu0 %v5314_v49  ;;  %3268 = vmatpush1.bf16.msra.mxu1 %v5139_v48  ;;  %v868_v48 = vld [vmem:[#allocation6 + $0x590] sm:$0xff] }
 0x17d   :  { %3226 = vmatprep.subr.bf16.mxu0 %v5318_v23  ;;  %3270 = vmatprep.subr.bf16.mxu1 %v5145_v55  ;;  %v5338_v55 = vpack.c.bf16 %v868_v48, %v866_v37  ;;  %v6603_v48 = vld [vmem:[#allocation29_spill] sm:$0xff] }
 0x17e   :  { %v6607_v37 = vld [vmem:[#allocation37_spill] sm:$0xff] }
 0x17f   :  { %6600 = vst [vmem:[#allocation90_spill] sm:$0xff] %v5338_v55 }
 0x180   :  { %3228 = vmatpush1.bf16.msra.mxu0 %v5322_v6  ;;  %3272 = vmatpush1.bf16.msra.mxu1 %v5154_v63  ;;  %v872_v63 = vld [vmem:[#allocation6 + $0x5f0] sm:$0xff] }
 0x181   :  { %3230 = vmatprep.subr.bf16.mxu0 %v5326_v43  ;;  %3274 = vmatprep.subr.bf16.mxu1 %v5160_v17  ;;  %v5346_v25 = vpack.c.bf16 %v872_v63, %v870_v44  ;;  %v6604_v63 = vld [vmem:[#allocation31_spill] sm:$0xff]  ;;  %v240_v17 = vlaneseq }
 0x182   :  { %v6610_v44 = vld [vmem:[#allocation43_spill] sm:$0xff] }
 0x183   :  { %6602 = vst [vmem:[#allocation92_spill] sm:$0xff] %v5346_v25 }
 0x184   :  { %3232 = vmatpush1.bf16.msra.mxu0 %v5330_v28  ;;  %3276 = vmatpush1.bf16.msra.mxu1 %v5169_v30 }
 0x185   :  { %3234 = vmatprep.subr.bf16.mxu0 %v5334_v0  ;;  %3278 = vmatprep.subr.bf16.mxu1 %v5175_v57 }
 0x188   :  { %3236 = vmatpush1.bf16.msra.mxu0 %v5338_v55  ;;  %3280 = vmatpush1.bf16.msra.mxu1 %v5182_v14 }
 0x189   :  { %3238 = vmatprep.subr.bf16.mxu0 %v5342_v20  ;;  %3282 = vmatprep.subr.bf16.mxu1 %v5188_v15 }
 0x18c   :  { %3240 = vmatpush1.bf16.msra.mxu0 %v5346_v25  ;;  %3284 = vmatpush1.bf16.msra.mxu1 %v5194_v50  ;;  %v6621_v50 = vld [vmem:[#allocation65_spill] sm:$0xff] }
 0x18d   :  { %3306 = vmatprep.subr.bf16.mxu0 %v4957_v56  ;;  %3286 = vmatprep.subr.bf16.mxu1 %v5200_v26  ;;  %v6620_v26 = vld [vmem:[#allocation63_spill] sm:$0xff] }
 0x18f   :  { %1102 = vmatmul.mubr.f32.vlgmr.msra.gmra.mrb[28].mxu0 %v6569_v13  ;;  %v6605_v13 = vld [vmem:[#allocation33_spill] sm:$0xff] }
 0x190   :  { %3308 = vmatpush1.bf16.msra.mxu0 %v4967_v3  ;;  %3288 = vmatpush1.bf16.msra.mxu1 %v5206_v22  ;;  %v6619_v22 = vld [vmem:[#allocation61_spill] sm:$0xff] }
 0x191   :  { %3310 = vmatprep.subr.bf16.mxu0 %v4971_v4  ;;  %3290 = vmatprep.subr.bf16.mxu1 %v5212_v54  ;;  %v6618_v54 = vld [vmem:[#allocation59_spill] sm:$0xff] }
 0x194   :  { %3312 = vmatpush1.bf16.msra.mxu0 %v4982_v18  ;;  %3292 = vmatpush1.bf16.msra.mxu1 %v5219_v60  ;;  %v6617_v60 = vld [vmem:[#allocation57_spill] sm:$0xff] }
 0x195   :  { %3314 = vmatprep.subr.bf16.mxu0 %v4986_v19  ;;  %3294 = vmatprep.subr.bf16.mxu1 %v5225_v21  ;;  %v6616_v21 = vld [vmem:[#allocation55_spill] sm:$0xff] }
 0x198   :  { %3316 = vmatpush1.bf16.msra.mxu0 %v4999_v29  ;;  %3296 = vmatpush1.bf16.msra.mxu1 %v5232_v33  ;;  %v6615_v33 = vld [vmem:[#allocation53_spill] sm:$0xff] }
 0x199   :  { %3318 = vmatprep.subr.bf16.mxu0 %v5002_v31  ;;  %3298 = vmatprep.subr.bf16.mxu1 %v5238_v1  ;;  %v6614_v1 = vld [vmem:[#allocation51_spill] sm:$0xff] }
 0x19c   :  { %3320 = vmatpush1.bf16.msra.mxu0 %v5015_v38  ;;  %3300 = vmatpush1.bf16.msra.mxu1 %v5244_v34  ;;  %v6613_v34 = vld [vmem:[#allocation49_spill] sm:$0xff] }
 0x19d   :  { %3322 = vmatprep.subr.bf16.mxu0 %v5018_v39  ;;  %3302 = vmatprep.subr.bf16.mxu1 %v5250_v35  ;;  %v6612_v35 = vld [vmem:[#allocation47_spill] sm:$0xff] }
 0x1a0   :  { %3324 = vmatpush1.bf16.msra.mxu0 %v5029_v45  ;;  %3304 = vmatpush1.bf16.msra.mxu1 %v5256_v11  ;;  %v6611_v11 = vld [vmem:[#allocation45_spill] sm:$0xff] }
 0x1a1   :  { %3326 = vmatprep.subr.bf16.mxu0 %v5032_v47  ;;  %3370 = vmatprep.subr.bf16.mxu1 %v5202_v5  ;;  %v5402_v5 = vshrl.u32 %v240_v17, 7 }
 0x1a3   :  { %v258_v25 = vsub.s32 4, %v5402_v5 }
 0x1a4   :  { %3328 = vmatpush1.bf16.msra.mxu0 %v5043_v59 }
 0x1a5   :  { %3330 = vmatprep.subr.bf16.mxu0 %v5049_v2 }
 0x1a8   :  { %3332 = vmatpush1.bf16.msra.mxu0 %v6603_v48 }
 0x1a9   :  { %3334 = vmatprep.subr.bf16.mxu0 %v6604_v63 }
 0x1ac   :  { %3336 = vmatpush1.bf16.msra.mxu0 %v6605_v13 }
 0x1ad   :  { %3338 = vmatprep.subr.bf16.mxu0 %v6606_v40 }
 0x1b0   :  { %3340 = vmatpush1.bf16.msra.mxu0 %v6607_v37 }
 0x1b1   :  { %3342 = vmatprep.subr.bf16.mxu0 %v6608_v10 }
 0x1b4   :  { %3344 = vmatpush1.bf16.msra.mxu0 %v6609_v53 }
 0x1b5   :  { %3346 = vmatprep.subr.bf16.mxu0 %v6610_v44 }
 0x1b8   :  { %3348 = vmatpush1.bf16.msra.mxu0 %v6611_v11 }
 0x1b9   :  { %3350 = vmatprep.subr.bf16.mxu0 %v6612_v35 }
 0x1bc   :  { %3352 = vmatpush1.bf16.msra.mxu0 %v6613_v34 }
 0x1bd   :  { %3354 = vmatprep.subr.bf16.mxu0 %v6614_v1 }
 0x1c0   :  { %3356 = vmatpush1.bf16.msra.mxu0 %v6615_v33 }
 0x1c1   :  { %3358 = vmatprep.subr.bf16.mxu0 %v6616_v21 }
 0x1c4   :  { %3360 = vmatpush1.bf16.msra.mxu0 %v6617_v60 }
 0x1c5   :  { %3362 = vmatprep.subr.bf16.mxu0 %v6618_v54 }
 0x1c8   :  { %3364 = vmatpush1.bf16.msra.mxu0 %v6619_v22  ;;  %v262_v22 = vsub.s32 5, %v5402_v5 }
 0x1c9   :  { %3366 = vmatprep.subr.bf16.mxu0 %v6620_v26 }
 0x1cc   :  { %3368 = vmatpush1.bf16.msra.mxu0 %v6621_v50 }
 0x1cd   :  { %3498 = vmatprep.subr.bf16.mxu0 %v4957_v56  ;;  %v238_v56 = vld [vmem:[%s6253_s5] sm:$0x3f] }
 0x1ce   :  { %v5413_v50 = vrot.slane %v238_v56, %v258_v25 }
 0x1da   :  { %v361_v15 = vpop.f32.mrb[8].mxu0 }
 0x1db   :  { %v363_v14 = vpop.f32.mrb[9].mxu0 }
 0x1de   :  { %v5398_v57 = vpop.f32.mrb[10].mxu0 }
 0x1df   :  { %6622 = vst [vmem:[#allocation93_spill] sm:$0xff] %v5398_v57  ;;  %v5400_v30 = vpop.f32.mrb[11].mxu0  ;;  %v5415_v57 = vrot.slane %v238_v56, %v262_v22 }
 0x1e0   :  { %6623 = vst [vmem:[#allocation94_spill] sm:$0xff] %v5400_v30 }
 0x1f6   :  { %v5405_v20 = vpop.f32.mrb[12].mxu1 }
 0x1f7   :  { %v5408_v26 = vpop.f32.mrb[13].mxu1 }
 0x1fa   :  { %v593_v30 = vpop.f32.mrb[14].mxu1 }
 0x1fb   :  { %v5418_v17 = vadd.f32 %v593_v30, %v5413_v50  ;;  %v595_v55 = vpop.f32.mrb[15].mxu1 }
 0x1fc   :  { %v5421_v54 = vadd.f32 %v595_v55, %v5415_v57 }
 0x1fd   :  { %6624 = vst [vmem:[#allocation95_spill] sm:$0xff] %v5418_v17 }
 0x1fe   :  { %6625 = vst [vmem:[#allocation96_spill] sm:$0xff] %v5421_v54  ;;  %v599_v60 = vpop.f32.mrb[16].mxu1 }
 0x1ff   :  { %v5424_v0 = vadd.f32 %v599_v60, %v5413_v50  ;;  %v601_v28 = vpop.f32.mrb[17].mxu1 }
 0x200   :  { %v5427_v21 = vadd.f32 %v601_v28, %v5415_v57 }
 0x201   :  { %6626 = vst [vmem:[#allocation97_spill] sm:$0xff] %v5424_v0 }
 0x202   :  { %6627 = vst [vmem:[#allocation98_spill] sm:$0xff] %v5427_v21  ;;  %v605_v25 = vpop.f32.mrb[18].mxu1 }
 0x203   :  { %v5430_v22 = vadd.f32 %v605_v25, %v5413_v50  ;;  %v607_v33 = vpop.f32.mrb[19].mxu1 }
 0x204   :  { %v5433_v30 = vadd.f32 %v607_v33, %v5415_v57 }
 0x205   :  { %6628 = vst [vmem:[#allocation99_spill] sm:$0xff] %v5430_v22 }
 0x206   :  { %6629 = vst [vmem:[#allocation100_spill] sm:$0xff] %v5433_v30  ;;  %v611_v17 = vpop.f32.mrb[20].mxu1 }
 0x207   :  { %v5436_v55 = vadd.f32 %v611_v17, %v5413_v50  ;;  %v613_v54 = vpop.f32.mrb[21].mxu1 }
 0x208   :  { %v5439_v60 = vadd.f32 %v613_v54, %v5415_v57 }
 0x209   :  { %6630 = vst [vmem:[#allocation101_spill] sm:$0xff] %v5436_v55 }
 0x20a   :  { %6631 = vst [vmem:[#allocation102_spill] sm:$0xff] %v5439_v60  ;;  %v617_v0 = vpop.f32.mrb[22].mxu1 }
 0x20b   :  { %v5442_v28 = vadd.f32 %v617_v0, %v5413_v50  ;;  %v619_v21 = vpop.f32.mrb[23].mxu1 }
 0x20c   :  { %v5445_v25 = vadd.f32 %v619_v21, %v5415_v57  ;;  %v242_v21 = vsub.s32 0, %v5402_v5 }
 0x20d   :  { %6632 = vst [vmem:[#allocation103_spill] sm:$0xff] %v5442_v28 }
 0x20e   :  { %6633 = vst [vmem:[#allocation104_spill] sm:$0xff] %v5445_v25  ;;  %v623_v22 = vpop.f32.mrb[24].mxu1  ;;  %v246_v25 = vsub.s32 1, %v5402_v5 }
 0x20f   :  { %v5448_v33 = vadd.f32 %v623_v22, %v5413_v50  ;;  %v625_v30 = vpop.f32.mrb[25].mxu1  ;;  %v5461_v22 = vrot.slane %v238_v56, %v242_v21 }
 0x210   :  { %v5451_v17 = vadd.f32 %v625_v30, %v5415_v57 }
 0x211   :  { %6634 = vst [vmem:[#allocation105_spill] sm:$0xff] %v5448_v33  ;;  %6638 = vst [vmem:[#allocation109_spill] sm:$0xff] %v5461_v22  ;;  %v5463_v33 = vrot.slane %v238_v56, %v246_v25  ;;  %v362_v30 = vadd.f32 %v361_v15, %v5461_v22 }
 0x212   :  { %6635 = vst [vmem:[#allocation106_spill] sm:$0xff] %v5451_v17  ;;  %v629_v55 = vpop.f32.mrb[26].mxu1 }
 0x213   :  { %v5454_v54 = vadd.f32 %v629_v55, %v5413_v50  ;;  %v631_v60 = vpop.f32.mrb[27].mxu1  ;;  %6639 = vst [vmem:[#allocation110_spill] sm:$0xff] %v5463_v33  ;;  %v364_v17 = vadd.f32 %v363_v14, %v5463_v33 }
 0x214   :  { %v5457_v0 = vadd.f32 %v631_v60, %v5415_v57  ;;  %v250_v60 = vsub.s32 2, %v5402_v5 }
 0x215   :  { %6636 = vst [vmem:[#allocation107_spill] sm:$0xff] %v5454_v54 }
 0x216   :  { %6637 = vst [vmem:[#allocation108_spill] sm:$0xff] %v5457_v0  ;;  %v254_v0 = vsub.s32 3, %v5402_v5  ;;  %v5469_v49 = vrot.slane %v238_v56, %v250_v60 }
 0x218   :  { %6640 = vst [vmem:[#allocation111_spill] sm:$0xff] %v5469_v49  ;;  %v5471_v35 = vrot.slane %v238_v56, %v254_v0 }
 0x21a   :  { %6641 = vst [vmem:[#allocation112_spill] sm:$0xff] %v5471_v35 }
 0x222   :  { %v1021_v28 = vpop.f32.mrb[12].mxu0 }
 0x223   :  { %v1023_v43 = vpop.f32.mrb[13].mxu0  ;;  %v4609_v15 = vadd.f32 %v1021_v28, %v5469_v49 }
 0x224   :  { %v4610_v14 = vadd.f32 %v1023_v43, %v5471_v35 }
 0x225   :  { %v1120_v33 = vmul.f32 0.5, %v4609_v15  ;;  %v588_v15 = vadd.f32 %v5405_v20, %v5413_v50 }
 0x236   :  { %v950_v55 = vpop.f32.mrb[28].mxu1 }
 0x237   :  { %v1108_v54 = vadd.f32 %v950_v55, %v362_v30  ;;  %v952_v6 = vpop.f32.mrb[29].mxu1  ;;  %v1121_v30 = vmul.f32 0.5, %v4610_v14 }
 0x238   :  { %v1109_v1 = vadd.f32 %v952_v6, %v364_v17  ;;  %v874_v6 = vld [vmem:[%s6254_s6] sm:$0x3]  ;;  %s4834_s6 = smov [#allocation8]  }
 0x239   :  { %v1110_v34 = vmul.f32 0.5, %v1108_v54  ;;  %v5478_v17 = vrot.slane %v874_v6, %v242_v21  ;;  %s2942_s24 = sshll.u32 %s4834_s6, 4  ;;  %s2943_s24 = int_to_ptr.vmem [resolvable:$true] %s2942_s24 }
 0x23a   :  { %v1111_v23 = vmul.f32 0.5, %v1109_v1  ;;  %s4800_s3 = scalar_lea.vmem %s2943_s24, 256  ;;  %p4805_p3 = scmp.lt.s32.totalorder %s2943_s24, %s2943_s24 }
 0x23b   :  { %4660 = vtanh.f32 %v1110_v34  ;;  %6642 = vst [vmem:[#allocation113_spill] sm:$0xff] %v5478_v17  ;;  %v5480_v34 = vrot.slane %v874_v6, %v246_v25  ;;  %p4801_p2 = scmp.ne.s32.totalorder %s2943_s24, %s4800_s3  ;;  %p4806_p4 = scmp.lt.s32.totalorder %s4800_s3, %s4800_s3 }
 0x23c   :  { %4662 = vtanh.f32 %v1111_v23 }
 0x23d   :  { %4664 = vtanh.f32 %v1120_v33  ;;  %6643 = vst [vmem:[#allocation114_spill] sm:$0xff] %v5480_v34  ;;  %v590_v33 = vadd.f32 %v5408_v26, %v5415_v57  ;;  %p4807_p5 = por %p4806_p4, %p4805_p3 }
 0x23e   :  { %4666 = vtanh.f32 %v1121_v30 }
 0x23f   :  { %p4808_p6 = pnand %p4807_p5, %p4801_p2 }
 0x245   :  { %v4661_v55 = vpop.eup %4660 }
 0x246   :  { %v4663_v5 = vpop.eup %4662  ;;  %v1114_v1 = vmul.f32 0.5, %v4661_v55 }
 0x247   :  { %v1115_v56 = vmul.f32 0.5, %v4663_v5  ;;  %v4665_v30 = vpop.eup %4664 }
 0x248   :  { %v1116_v43 = vadd.f32 0.5, %v1114_v1  ;;  %v4667_v25 = vpop.eup %4666  ;;  %v1124_v5 = vmul.f32 0.5, %v4665_v30  ;;  %v6653_v30 = vld [vmem:[#allocation51_spill] sm:$0xff] }
 0x249   :  { %v1117_v60 = vadd.f32 0.5, %v1115_v56  ;;  %v1125_v1 = vmul.f32 0.5, %v4667_v25  ;;  %v6655_v25 = vld [vmem:[#allocation87_spill] sm:$0xff] }
 0x262   :  { %v1103_v23 = vpop.f32.mrb[28].mxu0 }
 0x263   :  { %v1104_v28 = vadd.f32 %v1103_v23, %v5478_v17  ;;  %v1105_v54 = vpop.f32.mrb[29].mxu0  ;;  %v1126_v23 = vadd.f32 0.5, %v1124_v5  ;;  %v1127_v17 = vadd.f32 0.5, %v1125_v1  ;;  %v6657_v5 = vld [vmem:[#allocation55_spill] sm:$0xff]  ;;  %v6658_v1 = vld [vmem:[#allocation88_spill] sm:$0xff] }
 0x264   :  { %v1106_v0 = vadd.f32 %v1105_v54, %v5480_v34 }
 0x265   :  { %v1128_v14 = vmul.f32 %v1116_v43, %v1104_v28  ;;  %v1134_v54 = vsub.f32 1.0, %v1126_v23  ;;  %v1135_v34 = vsub.f32 1.0, %v1127_v17  ;;  %v1138_v50 = vmul.f32 0.0, %v1126_v23  ;;  %v6659_v23 = vld [vmem:[#allocation89_spill] sm:$0xff] }
 0x266   :  { %v1129_v21 = vmul.f32 %v1117_v60, %v1106_v0  ;;  %v1139_v28 = vmul.f32 0.0, %v1127_v17  ;;  %v6644_v0 = vld [vmem:[#allocation69_spill] sm:$0xff]  ;;  %v6645_v60 = vld [vmem:[#allocation71_spill] sm:$0xff] }
 0x267   :  { %v1130_v55 = vadd.f32 %v1128_v14, %v588_v15  ;;  %v6647_v17 = vld [vmem:[#allocation75_spill] sm:$0xff]  ;;  %v6650_v14 = vld [vmem:[#allocation84_spill] sm:$0xff] }
 0x268   :  { %v1131_v6 = vadd.f32 %v1129_v21, %v590_v33  ;;  %v6649_v15 = vld [vmem:[#allocation47_spill] sm:$0xff]  ;;  %v6651_v33 = vld [vmem:[#allocation85_spill] sm:$0xff] }
 0x269   :  { %4668 = vtanh.f32 %v1130_v55  ;;  %v6652_v21 = vld [vmem:[#allocation49_spill] sm:$0xff]  ;;  %v6654_v55 = vld [vmem:[#allocation86_spill] sm:$0xff] }
 0x26a   :  { %4670 = vtanh.f32 %v1131_v6  ;;  %v6656_v6 = vld [vmem:[#allocation53_spill] sm:$0xff] }
 0x273   :  { %v4669_v56 = vpop.eup %4668 }
 0x274   :  { %v4671_v35 = vpop.eup %4670  ;;  %v1136_v20 = vmul.f32 %v4669_v56, %v1134_v54  ;;  %v6660_v54 = vld [vmem:[#allocation57_spill] sm:$0xff]  ;;  %v6661_v56 = vld [vmem:[#allocation59_spill] sm:$0xff] }
 0x275   :  { %v1137_v43 = vmul.f32 %v4671_v35, %v1135_v34  ;;  %v6646_v35 = vld [vmem:[#allocation73_spill] sm:$0xff] }
 0x276   :  { %v5488_v57 = vadd.f32 %v1138_v50, %v1136_v20  ;;  %v6648_v34 = vld [vmem:[#allocation81_spill] sm:$0xff]  ;;  %v6662_v50 = vld [vmem:[#allocation90_spill] sm:$0xff]  ;;  %v6663_v20 = vld [vmem:[#allocation91_spill] sm:$0xff] }
 0x277   :  { %v5490_v26 = vadd.f32 %v1139_v28, %v1137_v43  ;;  %v6664_v28 = vld [vmem:[#allocation61_spill] sm:$0xff]  ;;  %v6665_v43 = vld [vmem:[#allocation63_spill] sm:$0xff] }
 0x279   :  { %1215 = vmatprep.mubr.f32.mxu1 %v5490_v26  ;;  %1286 = vmatprep.mubr.f32.mxu0 %v5490_v26 }
 0x27a   :  { %1216 = vmatmul.mubr.f32.vlgmr.msra.gmra.mrb[30].mxu1 %v5488_v57  ;;  %1287 = vmatmul.mubr.f32.vlgmr.msra.gmra.mrb[14].mxu0 %v5488_v57 }
 0x27b   :  { %3372 = vmatpush1.bf16.msra.mxu1 %v6644_v0  ;;  %1357 = vmatprep.mubr.f32.mxu1 %v5490_v26 }
 0x27c   :  { %3374 = vmatprep.subr.bf16.mxu1 %v6645_v60  ;;  %3500 = vmatpush1.bf16.msra.mxu0 %v4967_v3  ;;  %v6696_v3 = vld [vmem:[#allocation76_spill] sm:$0xff] }
 0x27d   :  { %3502 = vmatprep.subr.bf16.mxu0 %v4971_v4  ;;  %v6695_v4 = vld [vmem:[#allocation74_spill] sm:$0xff] }
 0x27f   :  { %3376 = vmatpush1.bf16.msra.mxu1 %v6646_v35 }
 0x280   :  { %3378 = vmatprep.subr.bf16.mxu1 %v6647_v17  ;;  %3504 = vmatpush1.bf16.msra.mxu0 %v4982_v18  ;;  %v6694_v18 = vld [vmem:[#allocation72_spill] sm:$0xff] }
 0x281   :  { %3506 = vmatprep.subr.bf16.mxu0 %v4986_v19  ;;  %v6693_v19 = vld [vmem:[#allocation70_spill] sm:$0xff] }
 0x283   :  { %3380 = vmatpush1.bf16.msra.mxu1 %v5234_v41 }
 0x284   :  { %3382 = vmatprep.subr.bf16.mxu1 %v5240_v51  ;;  %3508 = vmatpush1.bf16.msra.mxu0 %v4999_v29  ;;  %v6692_v29 = vld [vmem:[#allocation68_spill] sm:$0xff] }
 0x285   :  { %3510 = vmatprep.subr.bf16.mxu0 %v5002_v31  ;;  %v6691_v31 = vld [vmem:[#allocation66_spill] sm:$0xff] }
 0x287   :  { %3384 = vmatpush1.bf16.msra.mxu1 %v5246_v27 }
 0x288   :  { %3386 = vmatprep.subr.bf16.mxu1 %v5252_v46  ;;  %3512 = vmatpush1.bf16.msra.mxu0 %v5015_v38  ;;  %v6690_v38 = vld [vmem:[#allocation64_spill] sm:$0xff] }
 0x289   :  { %3514 = vmatprep.subr.bf16.mxu0 %v5018_v39  ;;  %v6689_v39 = vld [vmem:[#allocation62_spill] sm:$0xff] }
 0x28b   :  { %3388 = vmatpush1.bf16.msra.mxu1 %v5258_v36 }
 0x28c   :  { %3390 = vmatprep.subr.bf16.mxu1 %v6648_v34  ;;  %3516 = vmatpush1.bf16.msra.mxu0 %v5029_v45  ;;  %v6688_v45 = vld [vmem:[#allocation60_spill] sm:$0xff] }
 0x28d   :  { %3518 = vmatprep.subr.bf16.mxu0 %v5032_v47  ;;  %v6687_v47 = vld [vmem:[#allocation58_spill] sm:$0xff] }
 0x28f   :  { %3392 = vmatpush1.bf16.msra.mxu1 %v5266_v42 }
 0x290   :  { %3394 = vmatprep.subr.bf16.mxu1 %v5269_v7  ;;  %3520 = vmatpush1.bf16.msra.mxu0 %v5043_v59  ;;  %v6686_v59 = vld [vmem:[#allocation56_spill] sm:$0xff] }
 0x291   :  { %3522 = vmatprep.subr.bf16.mxu0 %v5049_v2  ;;  %v6685_v2 = vld [vmem:[#allocation54_spill] sm:$0xff] }
 0x293   :  { %3396 = vmatpush1.bf16.msra.mxu1 %v5274_v8 }
 0x294   :  { %3398 = vmatprep.subr.bf16.mxu1 %v5278_v16  ;;  %3524 = vmatpush1.bf16.msra.mxu0 %v6603_v48  ;;  %v6684_v48 = vld [vmem:[#allocation52_spill] sm:$0xff] }
 0x295   :  { %3526 = vmatprep.subr.bf16.mxu0 %v6604_v63  ;;  %v6683_v63 = vld [vmem:[#allocation50_spill] sm:$0xff] }
 0x297   :  { %3400 = vmatpush1.bf16.msra.mxu1 %v5282_v24 }
 0x298   :  { %3402 = vmatprep.subr.bf16.mxu1 %v5286_v52  ;;  %3528 = vmatpush1.bf16.msra.mxu0 %v6605_v13  ;;  %v6682_v13 = vld [vmem:[#allocation48_spill] sm:$0xff] }
 0x299   :  { %3530 = vmatprep.subr.bf16.mxu0 %v6606_v40  ;;  %v6681_v40 = vld [vmem:[#allocation46_spill] sm:$0xff] }
 0x29b   :  { %3404 = vmatpush1.bf16.msra.mxu1 %v5290_v61 }
 0x29c   :  { %3406 = vmatprep.subr.bf16.mxu1 %v5294_v62  ;;  %3532 = vmatpush1.bf16.msra.mxu0 %v6607_v37  ;;  %v6680_v37 = vld [vmem:[#allocation44_spill] sm:$0xff] }
 0x29d   :  { %3534 = vmatprep.subr.bf16.mxu0 %v6608_v10  ;;  %v6679_v10 = vld [vmem:[#allocation42_spill] sm:$0xff] }
 0x29f   :  { %3408 = vmatpush1.bf16.msra.mxu1 %v5298_v12 }
 0x2a0   :  { %3410 = vmatprep.subr.bf16.mxu1 %v5302_v58  ;;  %3536 = vmatpush1.bf16.msra.mxu0 %v6609_v53  ;;  %v6677_v53 = vld [vmem:[#allocation38_spill] sm:$0xff] }
 0x2a1   :  { %3538 = vmatprep.subr.bf16.mxu0 %v6610_v44  ;;  %v6676_v44 = vld [vmem:[#allocation36_spill] sm:$0xff] }
 0x2a3   :  { %3412 = vmatpush1.bf16.msra.mxu1 %v5306_v32 }
 0x2a4   :  { %3414 = vmatprep.subr.bf16.mxu1 %v5310_v9  ;;  %3540 = vmatpush1.bf16.msra.mxu0 %v6611_v11  ;;  %v6673_v11 = vld [vmem:[#allocation30_spill] sm:$0xff] }
 0x2a5   :  { %3542 = vmatprep.subr.bf16.mxu0 %v6649_v15  ;;  %v6672_v15 = vld [vmem:[#allocation28_spill] sm:$0xff] }
 0x2a7   :  { %3416 = vmatpush1.bf16.msra.mxu1 %v6650_v14 }
 0x2a8   :  { %3418 = vmatprep.subr.bf16.mxu1 %v6651_v33  ;;  %3544 = vmatpush1.bf16.msra.mxu0 %v6652_v21  ;;  %v6669_v21 = vld [vmem:[#allocation67_spill] sm:$0xff] }
 0x2a9   :  { %3546 = vmatprep.subr.bf16.mxu0 %v6653_v30  ;;  %v6666_v30 = vld [vmem:[#allocation92_spill] sm:$0xff] }
 0x2ab   :  { %3420 = vmatpush1.bf16.msra.mxu1 %v6654_v55  ;;  %v6703_v55 = vld [vmem:[#allocation94_spill] sm:$0xff] }
 0x2ac   :  { %3422 = vmatprep.subr.bf16.mxu1 %v6655_v25  ;;  %3548 = vmatpush1.bf16.msra.mxu0 %v6656_v6  ;;  %v6667_v6 = vld [vmem:[#allocation17_spill] sm:$0xff]  ;;  %v6702_v25 = vld [vmem:[#allocation110_spill] sm:$0xff] }
 0x2ad   :  { %3550 = vmatprep.subr.bf16.mxu0 %v6657_v5  ;;  %v6668_v5 = vld [vmem:[#allocation65_spill] sm:$0xff] }
 0x2af   :  { %3424 = vmatpush1.bf16.msra.mxu1 %v6658_v1 }
 0x2b0   :  { %3426 = vmatprep.subr.bf16.mxu1 %v6659_v23  ;;  %3552 = vmatpush1.bf16.msra.mxu0 %v6660_v54  ;;  %v6670_v54 = vld [vmem:[#allocation24_spill] sm:$0xff]  ;;  %v6701_v23 = vld [vmem:[#allocation93_spill] sm:$0xff] }
 0x2b1   :  { %3554 = vmatprep.subr.bf16.mxu0 %v6661_v56  ;;  %v6671_v56 = vld [vmem:[#allocation26_spill] sm:$0xff]  ;;  %v368_v1 = vadd.f32 %v6701_v23, %v5461_v22 }
 0x2b3   :  { %3428 = vmatpush1.bf16.msra.mxu1 %v6662_v50  ;;  %v6700_v50 = vld [vmem:[#allocation80_spill] sm:$0xff] }
 0x2b4   :  { %3430 = vmatprep.subr.bf16.mxu1 %v6663_v20  ;;  %3556 = vmatpush1.bf16.msra.mxu0 %v6664_v28  ;;  %v6674_v28 = vld [vmem:[#allocation32_spill] sm:$0xff]  ;;  %v6699_v20 = vld [vmem:[#allocation79_spill] sm:$0xff] }
 0x2b5   :  { %3558 = vmatprep.subr.bf16.mxu0 %v6665_v43  ;;  %v6675_v43 = vld [vmem:[#allocation34_spill] sm:$0xff] }
 0x2b7   :  { %3432 = vmatpush1.bf16.msra.mxu1 %v6666_v30  ;;  %v6698_v30 = vld [vmem:[#allocation78_spill] sm:$0xff] }
 0x2b8   :  { %3434 = vmatprep.subr.bf16.mxu1 %v6667_v6  ;;  %3560 = vmatpush1.bf16.msra.mxu0 %v6668_v5  ;;  %v6678_v5 = vld [vmem:[#allocation40_spill] sm:$0xff] }
 0x2b9   :  { %3562 = vmatprep.subr.bf16.mxu0 %v6669_v21  ;;  %v6697_v21 = vld [vmem:[#allocation77_spill] sm:$0xff] }
 0x2ba   :  { %1358 = vmatmul.mubr.f32.vlgmr.msra.gmra.mrb[32].mxu1 %v5488_v57 }
 0x2bb   :  { %3436 = vmatpush1.bf16.msra.mxu1 %v6670_v54 }
 0x2bc   :  { %3438 = vmatprep.subr.bf16.mxu1 %v6671_v56 }
 0x2bf   :  { %3440 = vmatpush1.bf16.msra.mxu1 %v6672_v15 }
 0x2c0   :  { %3442 = vmatprep.subr.bf16.mxu1 %v6673_v11 }
 0x2c3   :  { %3444 = vmatpush1.bf16.msra.mxu1 %v6674_v28 }
 0x2c4   :  { %3446 = vmatprep.subr.bf16.mxu1 %v6675_v43 }
 0x2c7   :  { %3448 = vmatpush1.bf16.msra.mxu1 %v6676_v44 }
 0x2c8   :  { %3450 = vmatprep.subr.bf16.mxu1 %v6677_v53 }
 0x2cb   :  { %3452 = vmatpush1.bf16.msra.mxu1 %v6678_v5 }
 0x2cc   :  { %3454 = vmatprep.subr.bf16.mxu1 %v6679_v10 }
 0x2cf   :  { %3456 = vmatpush1.bf16.msra.mxu1 %v6680_v37 }
 0x2d0   :  { %3458 = vmatprep.subr.bf16.mxu1 %v6681_v40 }
 0x2d3   :  { %3460 = vmatpush1.bf16.msra.mxu1 %v6682_v13 }
 0x2d4   :  { %3462 = vmatprep.subr.bf16.mxu1 %v6683_v63 }
 0x2d7   :  { %3464 = vmatpush1.bf16.msra.mxu1 %v6684_v48 }
 0x2d8   :  { %3466 = vmatprep.subr.bf16.mxu1 %v6685_v2 }
 0x2db   :  { %3468 = vmatpush1.bf16.msra.mxu1 %v6686_v59 }
 0x2dc   :  { %3470 = vmatprep.subr.bf16.mxu1 %v6687_v47 }
 0x2df   :  { %3472 = vmatpush1.bf16.msra.mxu1 %v6688_v45 }
 0x2e0   :  { %3474 = vmatprep.subr.bf16.mxu1 %v6689_v39 }
 0x2e3   :  { %3476 = vmatpush1.bf16.msra.mxu1 %v6690_v38 }
 0x2e4   :  { %3478 = vmatprep.subr.bf16.mxu1 %v6691_v31 }
 0x2e7   :  { %3480 = vmatpush1.bf16.msra.mxu1 %v6692_v29 }
 0x2e8   :  { %3482 = vmatprep.subr.bf16.mxu1 %v6693_v19 }
 0x2eb   :  { %3484 = vmatpush1.bf16.msra.mxu1 %v6694_v18  ;;  %v370_v18 = vadd.f32 %v6703_v55, %v6702_v25 }
 0x2ec   :  { %3486 = vmatprep.subr.bf16.mxu1 %v6695_v4 }
 0x2ef   :  { %3488 = vmatpush1.bf16.msra.mxu1 %v6696_v3 }
 0x2f0   :  { %3490 = vmatprep.subr.bf16.mxu1 %v6697_v21 }
 0x2f3   :  { %3492 = vmatpush1.bf16.msra.mxu1 %v6698_v30 }
 0x2f4   :  { %3494 = vmatprep.subr.bf16.mxu1 %v6699_v20  ;;  %v6704_v20 = vld [vmem:[#allocation112_spill] sm:$0xff] }
 0x2f7   :  { %3496 = vmatpush1.bf16.msra.mxu1 %v6700_v50 }
 0x2f8   :  { %3626 = vmatprep.subr.bf16.mxu1 %v6667_v6 }
 0x34d   :  { %v1217_v19 = vpop.f32.mrb[30].mxu1  ;;  %v1288_v4 = vpop.f32.mrb[14].mxu0 }
 0x34e   :  { %v1364_v29 = vadd.f32 %v1217_v19, %v368_v1  ;;  %v1219_v3 = vpop.f32.mrb[31].mxu1  ;;  %v1290_v33 = vpop.f32.mrb[15].mxu0  ;;  %v4611_v50 = vadd.f32 %v1288_v4, %v5469_v49  ;;  %v6705_v1 = vld [vmem:[#allocation113_spill] sm:$0xff] }
 0x34f   :  { %v1365_v21 = vadd.f32 %v1219_v3, %v370_v18  ;;  %v4612_v6 = vadd.f32 %v1290_v33, %v6704_v20  ;;  %v6707_v33 = vld [vmem:[#allocation95_spill] sm:$0xff]  ;;  %v6708_v20 = vld [vmem:[#allocation96_spill] sm:$0xff] }
 0x350   :  { %v1366_v14 = vmul.f32 0.5, %v1364_v29  ;;  %v1376_v31 = vmul.f32 0.5, %v4611_v50  ;;  %v6706_v29 = vld [vmem:[#allocation114_spill] sm:$0xff] }
 0x351   :  { %v1367_v30 = vmul.f32 0.5, %v1365_v21  ;;  %v1377_v38 = vmul.f32 0.5, %v4612_v6 }
 0x352   :  { %4672 = vtanh.f32 %v1366_v14 }
 0x353   :  { %4674 = vtanh.f32 %v1367_v30 }
 0x354   :  { %4676 = vtanh.f32 %v1376_v31 }
 0x355   :  { %4678 = vtanh.f32 %v1377_v38 }
 0x35c   :  { %v4673_v23 = vpop.eup %4672 }
 0x35d   :  { %v4675_v22 = vpop.eup %4674  ;;  %v1370_v55 = vmul.f32 0.5, %v4673_v23 }
 0x35e   :  { %v1371_v25 = vmul.f32 0.5, %v4675_v22  ;;  %v4677_v49 = vpop.eup %4676 }
 0x35f   :  { %v1372_v3 = vadd.f32 0.5, %v1370_v55  ;;  %v4679_v6 = vpop.eup %4678  ;;  %v1380_v31 = vmul.f32 0.5, %v4677_v49  ;;  %v6711_v49 = vld [vmem:[#allocation83_spill] sm:$0xff] }
 0x360   :  { %v1373_v21 = vadd.f32 0.5, %v1371_v25  ;;  %v1381_v38 = vmul.f32 0.5, %v4679_v6  ;;  %v6720_v6 = vld [vmem:[#allocation72_spill] sm:$0xff] }
 0x361   :  { %v1382_v22 = vadd.f32 0.5, %v1380_v31  ;;  %v6721_v31 = vld [vmem:[#allocation74_spill] sm:$0xff] }
 0x362   :  { %v1383_v23 = vadd.f32 0.5, %v1381_v38  ;;  %v6722_v38 = vld [vmem:[#allocation88_spill] sm:$0xff] }
 0x363   :  { %v1394_v25 = vmul.f32 %v1382_v22, %v5488_v57  ;;  %v6712_v57 = vld [vmem:[#allocation64_spill] sm:$0xff] }
 0x38d   :  { %v1359_v19 = vpop.f32.mrb[32].mxu1 }
 0x38e   :  { %v1360_v9 = vadd.f32 %v1359_v19, %v6705_v1  ;;  %v1361_v18 = vpop.f32.mrb[33].mxu1  ;;  %v1390_v19 = vsub.f32 1.0, %v1382_v22  ;;  %v1391_v1 = vsub.f32 1.0, %v1383_v23  ;;  %v6723_v22 = vld [vmem:[#allocation89_spill] sm:$0xff] }
 0x38f   :  { %v1362_v14 = vadd.f32 %v1361_v18, %v6706_v29 }
 0x390   :  { %v1384_v30 = vmul.f32 %v1372_v3, %v1360_v9  ;;  %v1395_v3 = vmul.f32 %v1383_v23, %v5490_v26  ;;  %v6713_v26 = vld [vmem:[#allocation66_spill] sm:$0xff]  ;;  %v6724_v23 = vld [vmem:[#allocation76_spill] sm:$0xff] }
 0x391   :  { %v1385_v4 = vmul.f32 %v1373_v21, %v1362_v14 }
 0x392   :  { %v1386_v50 = vadd.f32 %v1384_v30, %v6707_v33  ;;  %v6716_v30 = vld [vmem:[#allocation68_spill] sm:$0xff]  ;;  %v6718_v33 = vld [vmem:[#allocation86_spill] sm:$0xff] }
 0x393   :  { %v1387_v32 = vadd.f32 %v1385_v4, %v6708_v20  ;;  %v6714_v20 = vld [vmem:[#allocation84_spill] sm:$0xff]  ;;  %v6717_v4 = vld [vmem:[#allocation70_spill] sm:$0xff] }
 0x394   :  { %4680 = vtanh.f32 %v1386_v50  ;;  %v6719_v50 = vld [vmem:[#allocation87_spill] sm:$0xff] }
 0x395   :  { %4682 = vtanh.f32 %v1387_v32  ;;  %v6710_v32 = vld [vmem:[#allocation82_spill] sm:$0xff] }
 0x39e   :  { %v4681_v55 = vpop.eup %4680 }
 0x39f   :  { %v4683_v39 = vpop.eup %4682  ;;  %v1392_v9 = vmul.f32 %v4681_v55, %v1390_v19  ;;  %v6725_v19 = vld [vmem:[#allocation77_spill] sm:$0xff]  ;;  %v6726_v55 = vld [vmem:[#allocation90_spill] sm:$0xff] }
 0x3a0   :  { %v1393_v18 = vmul.f32 %v4683_v39, %v1391_v1  ;;  %v6709_v39 = vld [vmem:[#allocation62_spill] sm:$0xff]  ;;  %v6715_v1 = vld [vmem:[#allocation85_spill] sm:$0xff] }
 0x3a1   :  { %v5606_v14 = vadd.f32 %v1394_v25, %v1392_v9  ;;  %v6727_v25 = vld [vmem:[#allocation91_spill] sm:$0xff]  ;;  %v6728_v9 = vld [vmem:[#allocation78_spill] sm:$0xff] }
 0x3a2   :  { %v5608_v21 = vadd.f32 %v1395_v3, %v1393_v18  ;;  %v6729_v3 = vld [vmem:[#allocation79_spill] sm:$0xff]  ;;  %v6730_v18 = vld [vmem:[#allocation92_spill] sm:$0xff] }
 0x3a4   :  { %1471 = vmatprep.mubr.f32.mxu1 %v5608_v21  ;;  %1542 = vmatprep.mubr.f32.mxu0 %v5608_v21 }
 0x3a5   :  { %1472 = vmatmul.mubr.f32.vlgmr.msra.gmra.mrb[0].mxu1 %v5606_v14  ;;  %1543 = vmatmul.mubr.f32.vlgmr.msra.gmra.mrb[16].mxu0 %v5606_v14 }
 0x3a6   :  { %3564 = vmatpush1.bf16.msra.mxu0 %v6644_v0  ;;  %1613 = vmatprep.mubr.f32.mxu0 %v5608_v21 }
 0x3a7   :  { %3566 = vmatprep.subr.bf16.mxu0 %v6645_v60  ;;  %3628 = vmatpush1.bf16.msra.mxu1 %v6670_v54  ;;  %v6761_v54 = vld [vmem:[#allocation59_spill] sm:$0xff] }
 0x3a8   :  { %3630 = vmatprep.subr.bf16.mxu1 %v6671_v56  ;;  %v6760_v56 = vld [vmem:[#allocation57_spill] sm:$0xff] }
 0x3aa   :  { %3568 = vmatpush1.bf16.msra.mxu0 %v6646_v35 }
 0x3ab   :  { %3570 = vmatprep.subr.bf16.mxu0 %v6647_v17  ;;  %3632 = vmatpush1.bf16.msra.mxu1 %v6672_v15  ;;  %v6759_v15 = vld [vmem:[#allocation55_spill] sm:$0xff] }
 0x3ac   :  { %3634 = vmatprep.subr.bf16.mxu1 %v6673_v11  ;;  %v6758_v11 = vld [vmem:[#allocation53_spill] sm:$0xff] }
 0x3ae   :  { %3572 = vmatpush1.bf16.msra.mxu0 %v5234_v41 }
 0x3af   :  { %3574 = vmatprep.subr.bf16.mxu0 %v5240_v51  ;;  %3636 = vmatpush1.bf16.msra.mxu1 %v6674_v28  ;;  %v6757_v28 = vld [vmem:[#allocation51_spill] sm:$0xff] }
 0x3b0   :  { %3638 = vmatprep.subr.bf16.mxu1 %v6675_v43  ;;  %v6756_v43 = vld [vmem:[#allocation49_spill] sm:$0xff] }
 0x3b2   :  { %3576 = vmatpush1.bf16.msra.mxu0 %v5246_v27 }
 0x3b3   :  { %3578 = vmatprep.subr.bf16.mxu0 %v5252_v46  ;;  %3640 = vmatpush1.bf16.msra.mxu1 %v6676_v44  ;;  %v6755_v44 = vld [vmem:[#allocation47_spill] sm:$0xff] }
 0x3b4   :  { %3642 = vmatprep.subr.bf16.mxu1 %v6677_v53  ;;  %v6754_v53 = vld [vmem:[#allocation45_spill] sm:$0xff] }
 0x3b6   :  { %3580 = vmatpush1.bf16.msra.mxu0 %v5258_v36 }
 0x3b7   :  { %3582 = vmatprep.subr.bf16.mxu0 %v6648_v34  ;;  %3644 = vmatpush1.bf16.msra.mxu1 %v6678_v5  ;;  %v6753_v5 = vld [vmem:[#allocation43_spill] sm:$0xff] }
 0x3b8   :  { %3646 = vmatprep.subr.bf16.mxu1 %v6679_v10  ;;  %v6752_v10 = vld [vmem:[#allocation41_spill] sm:$0xff] }
 0x3ba   :  { %3584 = vmatpush1.bf16.msra.mxu0 %v5266_v42 }
 0x3bb   :  { %3586 = vmatprep.subr.bf16.mxu0 %v5269_v7  ;;  %3648 = vmatpush1.bf16.msra.mxu1 %v6680_v37  ;;  %v6751_v37 = vld [vmem:[#allocation39_spill] sm:$0xff] }
 0x3bc   :  { %3650 = vmatprep.subr.bf16.mxu1 %v6681_v40  ;;  %v6750_v40 = vld [vmem:[#allocation37_spill] sm:$0xff] }
 0x3be   :  { %3588 = vmatpush1.bf16.msra.mxu0 %v5274_v8 }
 0x3bf   :  { %3590 = vmatprep.subr.bf16.mxu0 %v5278_v16  ;;  %3652 = vmatpush1.bf16.msra.mxu1 %v6682_v13  ;;  %v6749_v13 = vld [vmem:[#allocation35_spill] sm:$0xff] }
 0x3c0   :  { %3654 = vmatprep.subr.bf16.mxu1 %v6683_v63  ;;  %v6748_v63 = vld [vmem:[#allocation33_spill] sm:$0xff] }
 0x3c2   :  { %3592 = vmatpush1.bf16.msra.mxu0 %v5282_v24 }
 0x3c3   :  { %3594 = vmatprep.subr.bf16.mxu0 %v5286_v52  ;;  %3656 = vmatpush1.bf16.msra.mxu1 %v6684_v48  ;;  %v6747_v48 = vld [vmem:[#allocation31_spill] sm:$0xff] }
 0x3c4   :  { %3658 = vmatprep.subr.bf16.mxu1 %v6685_v2  ;;  %v6746_v2 = vld [vmem:[#allocation29_spill] sm:$0xff] }
 0x3c6   :  { %3596 = vmatpush1.bf16.msra.mxu0 %v5290_v61 }
 0x3c7   :  { %3598 = vmatprep.subr.bf16.mxu0 %v5294_v62  ;;  %3660 = vmatpush1.bf16.msra.mxu1 %v6686_v59  ;;  %v6745_v59 = vld [vmem:[#allocation27_spill] sm:$0xff] }
 0x3c8   :  { %3662 = vmatprep.subr.bf16.mxu1 %v6687_v47  ;;  %v6744_v47 = vld [vmem:[#allocation25_spill] sm:$0xff] }
 0x3ca   :  { %3600 = vmatpush1.bf16.msra.mxu0 %v5298_v12 }
 0x3cb   :  { %3602 = vmatprep.subr.bf16.mxu0 %v5302_v58  ;;  %3664 = vmatpush1.bf16.msra.mxu1 %v6688_v45  ;;  %v6743_v45 = vld [vmem:[#allocation23_spill] sm:$0xff] }
 0x3cc   :  { %3666 = vmatprep.subr.bf16.mxu1 %v6709_v39  ;;  %v6741_v39 = vld [vmem:[#allocation21_spill] sm:$0xff] }
 0x3ce   :  { %3604 = vmatpush1.bf16.msra.mxu0 %v6710_v32 }
 0x3cf   :  { %3606 = vmatprep.subr.bf16.mxu0 %v6711_v49  ;;  %3668 = vmatpush1.bf16.msra.mxu1 %v6712_v57  ;;  %v6740_v57 = vld [vmem:[#allocation20_spill] sm:$0xff] }
 0x3d0   :  { %3670 = vmatprep.subr.bf16.mxu1 %v6713_v26  ;;  %v6737_v26 = vld [vmem:[#allocation16_spill] sm:$0xff] }
 0x3d2   :  { %3608 = vmatpush1.bf16.msra.mxu0 %v6714_v20 }
 0x3d3   :  { %3610 = vmatprep.subr.bf16.mxu0 %v6715_v1  ;;  %3672 = vmatpush1.bf16.msra.mxu1 %v6716_v30  ;;  %v6736_v30 = vld [vmem:[#allocation15_spill] sm:$0xff]  ;;  %v6768_v1 = vld [vmem:[#allocation112_spill] sm:$0xff] }
 0x3d4   :  { %3674 = vmatprep.subr.bf16.mxu1 %v6717_v4  ;;  %v6733_v4 = vld [vmem:[#allocation67_spill] sm:$0xff] }
 0x3d6   :  { %3612 = vmatpush1.bf16.msra.mxu0 %v6718_v33  ;;  %v6765_v33 = vld [vmem:[#allocation109_spill] sm:$0xff] }
 0x3d7   :  { %3614 = vmatprep.subr.bf16.mxu0 %v6719_v50  ;;  %3676 = vmatpush1.bf16.msra.mxu1 %v6720_v6  ;;  %v6731_v6 = vld [vmem:[#allocation12_spill] sm:$0xff] }
 0x3d8   :  { %3678 = vmatprep.subr.bf16.mxu1 %v6721_v31  ;;  %v6732_v31 = vld [vmem:[#allocation80_spill] sm:$0xff] }
 0x3da   :  { %3616 = vmatpush1.bf16.msra.mxu0 %v6722_v38 }
 0x3db   :  { %3618 = vmatprep.subr.bf16.mxu0 %v6723_v22  ;;  %3680 = vmatpush1.bf16.msra.mxu1 %v6724_v23  ;;  %v6734_v23 = vld [vmem:[#allocation13_spill] sm:$0xff] }
 0x3dc   :  { %3682 = vmatprep.subr.bf16.mxu1 %v6725_v19  ;;  %v6735_v19 = vld [vmem:[#allocation14_spill] sm:$0xff] }
 0x3de   :  { %3620 = vmatpush1.bf16.msra.mxu0 %v6726_v55 }
 0x3df   :  { %3622 = vmatprep.subr.bf16.mxu0 %v6727_v25  ;;  %3684 = vmatpush1.bf16.msra.mxu1 %v6728_v9  ;;  %v6738_v9 = vld [vmem:[#allocation18_spill] sm:$0xff]  ;;  %v6764_v25 = vld [vmem:[#allocation65_spill] sm:$0xff] }
 0x3e0   :  { %3686 = vmatprep.subr.bf16.mxu1 %v6729_v3  ;;  %v6739_v3 = vld [vmem:[#allocation19_spill] sm:$0xff] }
 0x3e2   :  { %3624 = vmatpush1.bf16.msra.mxu0 %v6730_v18  ;;  %v6763_v18 = vld [vmem:[#allocation63_spill] sm:$0xff] }
 0x3e3   :  { %3690 = vmatprep.subr.bf16.mxu0 %v6731_v6  ;;  %3688 = vmatpush1.bf16.msra.mxu1 %v6732_v31  ;;  %v6742_v31 = vld [vmem:[#allocation22_spill] sm:$0xff] }
 0x3e4   :  { %3754 = vmatprep.subr.bf16.mxu1 %v6733_v4  ;;  %v6762_v4 = vld [vmem:[#allocation61_spill] sm:$0xff] }
 0x3e5   :  { %1614 = vmatmul.mubr.f32.vlgmr.msra.gmra.mrb[30].mxu0 %v5606_v14 }
 0x3e6   :  { %3692 = vmatpush1.bf16.msra.mxu0 %v6734_v23 }
 0x3e7   :  { %3694 = vmatprep.subr.bf16.mxu0 %v6735_v19 }
 0x3ea   :  { %3696 = vmatpush1.bf16.msra.mxu0 %v6736_v30 }
 0x3eb   :  { %3698 = vmatprep.subr.bf16.mxu0 %v6737_v26 }
 0x3ee   :  { %3700 = vmatpush1.bf16.msra.mxu0 %v6738_v9 }
 0x3ef   :  { %3702 = vmatprep.subr.bf16.mxu0 %v6739_v3 }
 0x3f2   :  { %3704 = vmatpush1.bf16.msra.mxu0 %v6740_v57 }
 0x3f3   :  { %3706 = vmatprep.subr.bf16.mxu0 %v6741_v39 }
 0x3f6   :  { %3708 = vmatpush1.bf16.msra.mxu0 %v6742_v31 }
 0x3f7   :  { %3710 = vmatprep.subr.bf16.mxu0 %v6743_v45 }
 0x3fa   :  { %3712 = vmatpush1.bf16.msra.mxu0 %v6744_v47 }
 0x3fb   :  { %3714 = vmatprep.subr.bf16.mxu0 %v6745_v59 }
 0x3fe   :  { %3716 = vmatpush1.bf16.msra.mxu0 %v6746_v2 }
 0x3ff   :  { %3718 = vmatprep.subr.bf16.mxu0 %v6747_v48 }
 0x402   :  { %3720 = vmatpush1.bf16.msra.mxu0 %v6748_v63 }
 0x403   :  { %3722 = vmatprep.subr.bf16.mxu0 %v6749_v13 }
 0x406   :  { %3724 = vmatpush1.bf16.msra.mxu0 %v6750_v40 }
 0x407   :  { %3726 = vmatprep.subr.bf16.mxu0 %v6751_v37 }
 0x40a   :  { %3728 = vmatpush1.bf16.msra.mxu0 %v6752_v10 }
 0x40b   :  { %3730 = vmatprep.subr.bf16.mxu0 %v6753_v5 }
 0x40e   :  { %3732 = vmatpush1.bf16.msra.mxu0 %v6754_v53 }
 0x40f   :  { %3734 = vmatprep.subr.bf16.mxu0 %v6755_v44 }
 0x412   :  { %3736 = vmatpush1.bf16.msra.mxu0 %v6756_v43 }
 0x413   :  { %3738 = vmatprep.subr.bf16.mxu0 %v6757_v28  ;;  %v6766_v28 = vld [vmem:[#allocation110_spill] sm:$0xff] }
 0x416   :  { %3740 = vmatpush1.bf16.msra.mxu0 %v6758_v11 }
 0x417   :  { %3742 = vmatprep.subr.bf16.mxu0 %v6759_v15 }
 0x41a   :  { %3744 = vmatpush1.bf16.msra.mxu0 %v6760_v56 }
 0x41b   :  { %3746 = vmatprep.subr.bf16.mxu0 %v6761_v54  ;;  %v6767_v54 = vld [vmem:[#allocation111_spill] sm:$0xff] }
 0x41e   :  { %3748 = vmatpush1.bf16.msra.mxu0 %v6762_v4 }
 0x41f   :  { %3750 = vmatprep.subr.bf16.mxu0 %v6763_v18 }
 0x422   :  { %3752 = vmatpush1.bf16.msra.mxu0 %v6764_v25 }
 0x423   :  { %3882 = vmatprep.subr.bf16.mxu0 %v6731_v6 }
 0x478   :  { %v1473_v55 = vpop.f32.mrb[0].mxu1  ;;  %v1544_v22 = vpop.f32.mrb[16].mxu0 }
 0x479   :  { %v1475_v38 = vpop.f32.mrb[1].mxu1  ;;  %v1546_v50 = vpop.f32.mrb[17].mxu0  ;;  %v4597_v11 = vadd.f32 %v1473_v55, %v6765_v33  ;;  %v4613_v4 = vadd.f32 %v1544_v22, %v6767_v54  ;;  %v6769_v55 = vld [vmem:[#allocation113_spill] sm:$0xff] }
 0x47a   :  { %v4598_v15 = vadd.f32 %v1475_v38, %v6766_v28  ;;  %v4614_v18 = vadd.f32 %v1546_v50, %v6768_v1  ;;  %v6770_v50 = vld [vmem:[#allocation97_spill] sm:$0xff]  ;;  %v6771_v1 = vld [vmem:[#allocation98_spill] sm:$0xff] }
 0x47b   :  { %v1622_v43 = vmul.f32 0.5, %v4597_v11  ;;  %v1632_v20 = vmul.f32 0.5, %v4613_v4 }
 0x47c   :  { %v1623_v56 = vmul.f32 0.5, %v4598_v15  ;;  %v1633_v25 = vmul.f32 0.5, %v4614_v18 }
 0x47d   :  { %4684 = vtanh.f32 %v1622_v43 }
 0x47e   :  { %4686 = vtanh.f32 %v1623_v56 }
 0x47f   :  { %4688 = vtanh.f32 %v1632_v20 }
 0x480   :  { %4690 = vtanh.f32 %v1633_v25 }
 0x487   :  { %v4685_v44 = vpop.eup %4684 }
 0x488   :  { %v4687_v6 = vpop.eup %4686  ;;  %v1626_v53 = vmul.f32 0.5, %v4685_v44 }
 0x489   :  { %v1627_v49 = vmul.f32 0.5, %v4687_v6  ;;  %v4689_v54 = vpop.eup %4688 }
 0x48a   :  { %v1628_v38 = vadd.f32 0.5, %v1626_v53  ;;  %v4691_v18 = vpop.eup %4690  ;;  %v1636_v20 = vmul.f32 0.5, %v4689_v54  ;;  %v6773_v54 = vld [vmem:[#allocation82_spill] sm:$0xff] }
 0x48b   :  { %v1629_v56 = vadd.f32 0.5, %v1627_v49  ;;  %v1637_v44 = vmul.f32 0.5, %v4691_v18  ;;  %v6783_v18 = vld [vmem:[#allocation53_spill] sm:$0xff] }
 0x48c   :  { %v1638_v6 = vadd.f32 0.5, %v1636_v20  ;;  %v6784_v20 = vld [vmem:[#allocation55_spill] sm:$0xff] }
 0x48d   :  { %v1639_v25 = vadd.f32 0.5, %v1637_v44  ;;  %v6785_v44 = vld [vmem:[#allocation88_spill] sm:$0xff] }
 0x48e   :  { %v1650_v49 = vmul.f32 %v1638_v6, %v5606_v14  ;;  %v6775_v14 = vld [vmem:[#allocation45_spill] sm:$0xff] }
 0x4b8   :  { %v1615_v32 = vpop.f32.mrb[30].mxu0 }
 0x4b9   :  { %v1616_v33 = vadd.f32 %v1615_v32, %v6769_v55  ;;  %v1617_v11 = vpop.f32.mrb[31].mxu0  ;;  %v1646_v32 = vsub.f32 1.0, %v1638_v6  ;;  %v1647_v55 = vsub.f32 1.0, %v1639_v25  ;;  %v6786_v6 = vld [vmem:[#allocation89_spill] sm:$0xff] }
 0x4ba   :  { %v1618_v15 = vadd.f32 %v1617_v11, %v6706_v29 }
 0x4bb   :  { %v1640_v43 = vmul.f32 %v1628_v38, %v1616_v33  ;;  %v1651_v38 = vmul.f32 %v1639_v25, %v5608_v21  ;;  %v6776_v21 = vld [vmem:[#allocation47_spill] sm:$0xff]  ;;  %v6787_v25 = vld [vmem:[#allocation57_spill] sm:$0xff] }
 0x4bc   :  { %v1641_v22 = vmul.f32 %v1629_v56, %v1618_v15 }
 0x4bd   :  { %v1642_v4 = vadd.f32 %v1640_v43, %v6770_v50  ;;  %v6779_v43 = vld [vmem:[#allocation49_spill] sm:$0xff]  ;;  %v6781_v50 = vld [vmem:[#allocation86_spill] sm:$0xff] }
 0x4be   :  { %v1643_v28 = vadd.f32 %v1641_v22, %v6771_v1  ;;  %v6777_v1 = vld [vmem:[#allocation84_spill] sm:$0xff]  ;;  %v6780_v22 = vld [vmem:[#allocation51_spill] sm:$0xff] }
 0x4bf   :  { %4692 = vtanh.f32 %v1642_v4  ;;  %v6782_v4 = vld [vmem:[#allocation87_spill] sm:$0xff] }
 0x4c0   :  { %4694 = vtanh.f32 %v1643_v28  ;;  %v6774_v28 = vld [vmem:[#allocation83_spill] sm:$0xff] }
 0x4c9   :  { %v4693_v53 = vpop.eup %4692 }
 0x4ca   :  { %v4695_v5 = vpop.eup %4694  ;;  %v1648_v33 = vmul.f32 %v4693_v53, %v1646_v32  ;;  %v6788_v32 = vld [vmem:[#allocation59_spill] sm:$0xff]  ;;  %v6789_v53 = vld [vmem:[#allocation90_spill] sm:$0xff] }
 0x4cb   :  { %v1649_v11 = vmul.f32 %v4695_v5, %v1647_v55  ;;  %v6772_v5 = vld [vmem:[#allocation43_spill] sm:$0xff]  ;;  %v6778_v55 = vld [vmem:[#allocation85_spill] sm:$0xff] }
 0x4cc   :  { %v5722_v15 = vadd.f32 %v1650_v49, %v1648_v33  ;;  %v6790_v49 = vld [vmem:[#allocation91_spill] sm:$0xff]  ;;  %v6791_v33 = vld [vmem:[#allocation61_spill] sm:$0xff] }
 0x4cd   :  { %v5724_v56 = vadd.f32 %v1651_v38, %v1649_v11  ;;  %v6792_v38 = vld [vmem:[#allocation63_spill] sm:$0xff]  ;;  %v6793_v11 = vld [vmem:[#allocation92_spill] sm:$0xff] }
 0x4cf   :  { %1727 = vmatprep.mubr.f32.mxu1 %v5724_v56  ;;  %1798 = vmatprep.mubr.f32.mxu0 %v5724_v56 }
 0x4d0   :  { %1728 = vmatmul.mubr.f32.vlgmr.msra.gmra.mrb[2].mxu1 %v5722_v15  ;;  %1799 = vmatmul.mubr.f32.vlgmr.msra.gmra.mrb[18].mxu0 %v5722_v15 }
 0x4d1   :  { %3756 = vmatpush1.bf16.msra.mxu1 %v6644_v0  ;;  %1869 = vmatprep.mubr.f32.mxu1 %v5724_v56 }
 0x4d2   :  { %3758 = vmatprep.subr.bf16.mxu1 %v6645_v60  ;;  %3884 = vmatpush1.bf16.msra.mxu0 %v6734_v23  ;;  %v6824_v23 = vld [vmem:[#allocation77_spill] sm:$0xff] }
 0x4d3   :  { %3886 = vmatprep.subr.bf16.mxu0 %v6735_v19  ;;  %v6823_v19 = vld [vmem:[#allocation76_spill] sm:$0xff] }
 0x4d5   :  { %3760 = vmatpush1.bf16.msra.mxu1 %v6646_v35 }
 0x4d6   :  { %3762 = vmatprep.subr.bf16.mxu1 %v6647_v17  ;;  %3888 = vmatpush1.bf16.msra.mxu0 %v6736_v30  ;;  %v6822_v30 = vld [vmem:[#allocation74_spill] sm:$0xff] }
 0x4d7   :  { %3890 = vmatprep.subr.bf16.mxu0 %v6737_v26  ;;  %v6821_v26 = vld [vmem:[#allocation72_spill] sm:$0xff] }
 0x4d9   :  { %3764 = vmatpush1.bf16.msra.mxu1 %v5234_v41 }
 0x4da   :  { %3766 = vmatprep.subr.bf16.mxu1 %v5240_v51  ;;  %3892 = vmatpush1.bf16.msra.mxu0 %v6738_v9  ;;  %v6820_v9 = vld [vmem:[#allocation70_spill] sm:$0xff] }
 0x4db   :  { %3894 = vmatprep.subr.bf16.mxu0 %v6739_v3  ;;  %v6819_v3 = vld [vmem:[#allocation68_spill] sm:$0xff] }
 0x4dd   :  { %3768 = vmatpush1.bf16.msra.mxu1 %v5246_v27 }
 0x4de   :  { %3770 = vmatprep.subr.bf16.mxu1 %v5252_v46  ;;  %3896 = vmatpush1.bf16.msra.mxu0 %v6740_v57  ;;  %v6818_v57 = vld [vmem:[#allocation66_spill] sm:$0xff] }
 0x4df   :  { %3898 = vmatprep.subr.bf16.mxu0 %v6741_v39  ;;  %v6817_v39 = vld [vmem:[#allocation64_spill] sm:$0xff] }
 0x4e1   :  { %3772 = vmatpush1.bf16.msra.mxu1 %v5258_v36 }
 0x4e2   :  { %3774 = vmatprep.subr.bf16.mxu1 %v6648_v34  ;;  %3900 = vmatpush1.bf16.msra.mxu0 %v6742_v31  ;;  %v6816_v31 = vld [vmem:[#allocation62_spill] sm:$0xff] }
 0x4e3   :  { %3902 = vmatprep.subr.bf16.mxu0 %v6743_v45  ;;  %v6815_v45 = vld [vmem:[#allocation60_spill] sm:$0xff] }
 0x4e5   :  { %3776 = vmatpush1.bf16.msra.mxu1 %v5266_v42 }
 0x4e6   :  { %3778 = vmatprep.subr.bf16.mxu1 %v5269_v7  ;;  %3904 = vmatpush1.bf16.msra.mxu0 %v6744_v47  ;;  %v6814_v47 = vld [vmem:[#allocation58_spill] sm:$0xff] }
 0x4e7   :  { %3906 = vmatprep.subr.bf16.mxu0 %v6745_v59  ;;  %v6813_v59 = vld [vmem:[#allocation56_spill] sm:$0xff] }
 0x4e9   :  { %3780 = vmatpush1.bf16.msra.mxu1 %v5274_v8 }
 0x4ea   :  { %3782 = vmatprep.subr.bf16.mxu1 %v5278_v16  ;;  %3908 = vmatpush1.bf16.msra.mxu0 %v6746_v2  ;;  %v6812_v2 = vld [vmem:[#allocation54_spill] sm:$0xff] }
 0x4eb   :  { %3910 = vmatprep.subr.bf16.mxu0 %v6747_v48  ;;  %v6811_v48 = vld [vmem:[#allocation52_spill] sm:$0xff] }
 0x4ed   :  { %3784 = vmatpush1.bf16.msra.mxu1 %v5282_v24 }
 0x4ee   :  { %3786 = vmatprep.subr.bf16.mxu1 %v5286_v52  ;;  %3912 = vmatpush1.bf16.msra.mxu0 %v6748_v63  ;;  %v6810_v63 = vld [vmem:[#allocation50_spill] sm:$0xff] }
 0x4ef   :  { %3914 = vmatprep.subr.bf16.mxu0 %v6749_v13  ;;  %v6809_v13 = vld [vmem:[#allocation48_spill] sm:$0xff] }
 0x4f1   :  { %3788 = vmatpush1.bf16.msra.mxu1 %v5290_v61 }
 0x4f2   :  { %3790 = vmatprep.subr.bf16.mxu1 %v5294_v62  ;;  %3916 = vmatpush1.bf16.msra.mxu0 %v6750_v40  ;;  %v6808_v40 = vld [vmem:[#allocation46_spill] sm:$0xff] }
 0x4f3   :  { %3918 = vmatprep.subr.bf16.mxu0 %v6751_v37  ;;  %v6807_v37 = vld [vmem:[#allocation44_spill] sm:$0xff] }
 0x4f5   :  { %3792 = vmatpush1.bf16.msra.mxu1 %v5298_v12 }
 0x4f6   :  { %3794 = vmatprep.subr.bf16.mxu1 %v5302_v58  ;;  %3920 = vmatpush1.bf16.msra.mxu0 %v6752_v10  ;;  %v6806_v10 = vld [vmem:[#allocation42_spill] sm:$0xff] }
 0x4f7   :  { %3922 = vmatprep.subr.bf16.mxu0 %v6772_v5  ;;  %v6804_v5 = vld [vmem:[#allocation38_spill] sm:$0xff] }
 0x4f9   :  { %3796 = vmatpush1.bf16.msra.mxu1 %v6773_v54 }
 0x4fa   :  { %3798 = vmatprep.subr.bf16.mxu1 %v6774_v28  ;;  %3924 = vmatpush1.bf16.msra.mxu0 %v6775_v14  ;;  %v6803_v14 = vld [vmem:[#allocation36_spill] sm:$0xff] }
 0x4fb   :  { %3926 = vmatprep.subr.bf16.mxu0 %v6776_v21  ;;  %v6800_v21 = vld [vmem:[#allocation30_spill] sm:$0xff] }
 0x4fd   :  { %3800 = vmatpush1.bf16.msra.mxu1 %v6777_v1 }
 0x4fe   :  { %3802 = vmatprep.subr.bf16.mxu1 %v6778_v55  ;;  %3928 = vmatpush1.bf16.msra.mxu0 %v6779_v43  ;;  %v6799_v43 = vld [vmem:[#allocation28_spill] sm:$0xff] }
 0x4ff   :  { %3930 = vmatprep.subr.bf16.mxu0 %v6780_v22  ;;  %v6796_v22 = vld [vmem:[#allocation67_spill] sm:$0xff]  ;;  %v6831_v55 = vld [vmem:[#allocation112_spill] sm:$0xff] }
 0x501   :  { %3804 = vmatpush1.bf16.msra.mxu1 %v6781_v50  ;;  %v6828_v50 = vld [vmem:[#allocation109_spill] sm:$0xff] }
 0x502   :  { %3806 = vmatprep.subr.bf16.mxu1 %v6782_v4  ;;  %3932 = vmatpush1.bf16.msra.mxu0 %v6783_v18  ;;  %v6794_v18 = vld [vmem:[#allocation17_spill] sm:$0xff] }
 0x503   :  { %3934 = vmatprep.subr.bf16.mxu0 %v6784_v20  ;;  %v6795_v20 = vld [vmem:[#allocation65_spill] sm:$0xff] }
 0x505   :  { %3808 = vmatpush1.bf16.msra.mxu1 %v6785_v44 }
 0x506   :  { %3810 = vmatprep.subr.bf16.mxu1 %v6786_v6  ;;  %3936 = vmatpush1.bf16.msra.mxu0 %v6787_v25  ;;  %v6797_v25 = vld [vmem:[#allocation24_spill] sm:$0xff] }
 0x507   :  { %3938 = vmatprep.subr.bf16.mxu0 %v6788_v32  ;;  %v6798_v32 = vld [vmem:[#allocation26_spill] sm:$0xff] }
 0x509   :  { %3812 = vmatpush1.bf16.msra.mxu1 %v6789_v53 }
 0x50a   :  { %3814 = vmatprep.subr.bf16.mxu1 %v6790_v49  ;;  %3940 = vmatpush1.bf16.msra.mxu0 %v6791_v33  ;;  %v6801_v33 = vld [vmem:[#allocation32_spill] sm:$0xff] }
 0x50b   :  { %3942 = vmatprep.subr.bf16.mxu0 %v6792_v38  ;;  %v6802_v38 = vld [vmem:[#allocation34_spill] sm:$0xff]  ;;  %v6827_v49 = vld [vmem:[#allocation80_spill] sm:$0xff] }
 0x50d   :  { %3816 = vmatpush1.bf16.msra.mxu1 %v6793_v11  ;;  %v6826_v11 = vld [vmem:[#allocation79_spill] sm:$0xff] }
 0x50e   :  { %3818 = vmatprep.subr.bf16.mxu1 %v6794_v18  ;;  %3944 = vmatpush1.bf16.msra.mxu0 %v6795_v20  ;;  %v6805_v20 = vld [vmem:[#allocation40_spill] sm:$0xff] }
 0x50f   :  { %3946 = vmatprep.subr.bf16.mxu0 %v6796_v22  ;;  %v6825_v22 = vld [vmem:[#allocation78_spill] sm:$0xff] }
 0x510   :  { %1870 = vmatmul.mubr.f32.vlgmr.msra.gmra.mrb[34].mxu1 %v5722_v15 }
 0x511   :  { %3820 = vmatpush1.bf16.msra.mxu1 %v6797_v25 }
 0x512   :  { %3822 = vmatprep.subr.bf16.mxu1 %v6798_v32 }
 0x515   :  { %3824 = vmatpush1.bf16.msra.mxu1 %v6799_v43 }
 0x516   :  { %3826 = vmatprep.subr.bf16.mxu1 %v6800_v21 }
 0x519   :  { %3828 = vmatpush1.bf16.msra.mxu1 %v6801_v33 }
 0x51a   :  { %3830 = vmatprep.subr.bf16.mxu1 %v6802_v38 }
 0x51d   :  { %3832 = vmatpush1.bf16.msra.mxu1 %v6803_v14 }
 0x51e   :  { %3834 = vmatprep.subr.bf16.mxu1 %v6804_v5 }
 0x521   :  { %3836 = vmatpush1.bf16.msra.mxu1 %v6805_v20 }
 0x522   :  { %3838 = vmatprep.subr.bf16.mxu1 %v6806_v10 }
 0x525   :  { %3840 = vmatpush1.bf16.msra.mxu1 %v6807_v37 }
 0x526   :  { %3842 = vmatprep.subr.bf16.mxu1 %v6808_v40 }
 0x529   :  { %3844 = vmatpush1.bf16.msra.mxu1 %v6809_v13 }
 0x52a   :  { %3846 = vmatprep.subr.bf16.mxu1 %v6810_v63 }
 0x52d   :  { %3848 = vmatpush1.bf16.msra.mxu1 %v6811_v48 }
 0x52e   :  { %3850 = vmatprep.subr.bf16.mxu1 %v6812_v2 }
 0x531   :  { %3852 = vmatpush1.bf16.msra.mxu1 %v6813_v59 }
 0x532   :  { %3854 = vmatprep.subr.bf16.mxu1 %v6814_v47 }
 0x535   :  { %3856 = vmatpush1.bf16.msra.mxu1 %v6815_v45 }
 0x536   :  { %3858 = vmatprep.subr.bf16.mxu1 %v6816_v31 }
 0x539   :  { %3860 = vmatpush1.bf16.msra.mxu1 %v6817_v39 }
 0x53a   :  { %3862 = vmatprep.subr.bf16.mxu1 %v6818_v57 }
 0x53d   :  { %3864 = vmatpush1.bf16.msra.mxu1 %v6819_v3 }
 0x53e   :  { %3866 = vmatprep.subr.bf16.mxu1 %v6820_v9  ;;  %v6829_v9 = vld [vmem:[#allocation110_spill] sm:$0xff] }
 0x541   :  { %3868 = vmatpush1.bf16.msra.mxu1 %v6821_v26 }
 0x542   :  { %3870 = vmatprep.subr.bf16.mxu1 %v6822_v30 }
 0x545   :  { %3872 = vmatpush1.bf16.msra.mxu1 %v6823_v19 }
 0x546   :  { %3874 = vmatprep.subr.bf16.mxu1 %v6824_v23  ;;  %v6830_v23 = vld [vmem:[#allocation111_spill] sm:$0xff] }
 0x549   :  { %3876 = vmatpush1.bf16.msra.mxu1 %v6825_v22 }
 0x54a   :  { %3878 = vmatprep.subr.bf16.mxu1 %v6826_v11 }
 0x54d   :  { %3880 = vmatpush1.bf16.msra.mxu1 %v6827_v49 }
 0x54e   :  { %4010 = vmatprep.subr.bf16.mxu1 %v6794_v18 }
 0x5a3   :  { %v1729_v53 = vpop.f32.mrb[2].mxu1  ;;  %v1800_v6 = vpop.f32.mrb[18].mxu0 }
 0x5a4   :  { %v1731_v44 = vpop.f32.mrb[3].mxu1  ;;  %v1802_v4 = vpop.f32.mrb[19].mxu0  ;;  %v4599_v26 = vadd.f32 %v1729_v53, %v6828_v50  ;;  %v4615_v22 = vadd.f32 %v1800_v6, %v6830_v23  ;;  %v6832_v53 = vld [vmem:[#allocation113_spill] sm:$0xff] }
 0x5a5   :  { %v4600_v30 = vadd.f32 %v1731_v44, %v6829_v9  ;;  %v4616_v11 = vadd.f32 %v1802_v4, %v6831_v55  ;;  %v6833_v4 = vld [vmem:[#allocation99_spill] sm:$0xff]  ;;  %v6834_v55 = vld [vmem:[#allocation100_spill] sm:$0xff] }
 0x5a6   :  { %v1878_v3 = vmul.f32 0.5, %v4599_v26  ;;  %v1888_v1 = vmul.f32 0.5, %v4615_v22 }
 0x5a7   :  { %v1879_v19 = vmul.f32 0.5, %v4600_v30  ;;  %v1889_v49 = vmul.f32 0.5, %v4616_v11 }
 0x5a8   :  { %4696 = vtanh.f32 %v1878_v3 }
 0x5a9   :  { %4698 = vtanh.f32 %v1879_v19 }
 0x5aa   :  { %4700 = vtanh.f32 %v1888_v1 }
 0x5ab   :  { %4702 = vtanh.f32 %v1889_v49 }
 0x5b2   :  { %v4697_v57 = vpop.eup %4696 }
 0x5b3   :  { %v4699_v18 = vpop.eup %4698  ;;  %v1882_v39 = vmul.f32 0.5, %v4697_v57 }
 0x5b4   :  { %v1883_v28 = vmul.f32 0.5, %v4699_v18  ;;  %v4701_v23 = vpop.eup %4700 }
 0x5b5   :  { %v1884_v44 = vadd.f32 0.5, %v1882_v39  ;;  %v4703_v11 = vpop.eup %4702  ;;  %v1892_v1 = vmul.f32 0.5, %v4701_v23  ;;  %v6836_v23 = vld [vmem:[#allocation82_spill] sm:$0xff] }
 0x5b6   :  { %v1885_v19 = vadd.f32 0.5, %v1883_v28  ;;  %v1893_v57 = vmul.f32 0.5, %v4703_v11  ;;  %v6846_v11 = vld [vmem:[#allocation72_spill] sm:$0xff] }
 0x5b7   :  { %v1894_v18 = vadd.f32 0.5, %v1892_v1  ;;  %v6847_v1 = vld [vmem:[#allocation74_spill] sm:$0xff] }
 0x5b8   :  { %v1895_v49 = vadd.f32 0.5, %v1893_v57  ;;  %v6848_v57 = vld [vmem:[#allocation88_spill] sm:$0xff] }
 0x5b9   :  { %v1906_v28 = vmul.f32 %v1894_v18, %v5722_v15  ;;  %v6838_v15 = vld [vmem:[#allocation64_spill] sm:$0xff] }
 0x5e3   :  { %v1871_v54 = vpop.f32.mrb[34].mxu1 }
 0x5e4   :  { %v1872_v50 = vadd.f32 %v1871_v54, %v6832_v53  ;;  %v1873_v26 = vpop.f32.mrb[35].mxu1  ;;  %v1902_v54 = vsub.f32 1.0, %v1894_v18  ;;  %v1903_v53 = vsub.f32 1.0, %v1895_v49  ;;  %v6849_v18 = vld [vmem:[#allocation89_spill] sm:$0xff] }
 0x5e5   :  { %v1874_v30 = vadd.f32 %v1873_v26, %v6706_v29 }
 0x5e6   :  { %v1896_v3 = vmul.f32 %v1884_v44, %v1872_v50  ;;  %v1907_v44 = vmul.f32 %v1895_v49, %v5724_v56  ;;  %v6839_v56 = vld [vmem:[#allocation66_spill] sm:$0xff]  ;;  %v6850_v49 = vld [vmem:[#allocation76_spill] sm:$0xff] }
 0x5e7   :  { %v1897_v6 = vmul.f32 %v1885_v19, %v1874_v30 }
 0x5e8   :  { %v1898_v22 = vadd.f32 %v1896_v3, %v6833_v4  ;;  %v6842_v3 = vld [vmem:[#allocation68_spill] sm:$0xff]  ;;  %v6844_v4 = vld [vmem:[#allocation86_spill] sm:$0xff] }
 0x5e9   :  { %v1899_v9 = vadd.f32 %v1897_v6, %v6834_v55  ;;  %v6840_v55 = vld [vmem:[#allocation84_spill] sm:$0xff]  ;;  %v6843_v6 = vld [vmem:[#allocation70_spill] sm:$0xff] }
 0x5ea   :  { %4704 = vtanh.f32 %v1898_v22  ;;  %v6845_v22 = vld [vmem:[#allocation87_spill] sm:$0xff] }
 0x5eb   :  { %4706 = vtanh.f32 %v1899_v9  ;;  %v6837_v9 = vld [vmem:[#allocation83_spill] sm:$0xff] }
 0x5f4   :  { %v4705_v39 = vpop.eup %4704 }
 0x5f5   :  { %v4707_v31 = vpop.eup %4706  ;;  %v1904_v50 = vmul.f32 %v4705_v39, %v1902_v54  ;;  %v6851_v54 = vld [vmem:[#allocation77_spill] sm:$0xff]  ;;  %v6852_v39 = vld [vmem:[#allocation90_spill] sm:$0xff] }
 0x5f6   :  { %v1905_v26 = vmul.f32 %v4707_v31, %v1903_v53  ;;  %v6835_v31 = vld [vmem:[#allocation62_spill] sm:$0xff]  ;;  %v6841_v53 = vld [vmem:[#allocation85_spill] sm:$0xff] }
 0x5f7   :  { %v5838_v30 = vadd.f32 %v1906_v28, %v1904_v50  ;;  %v6853_v28 = vld [vmem:[#allocation91_spill] sm:$0xff]  ;;  %v6854_v50 = vld [vmem:[#allocation78_spill] sm:$0xff] }
 0x5f8   :  { %v5840_v19 = vadd.f32 %v1907_v44, %v1905_v26  ;;  %v6855_v44 = vld [vmem:[#allocation79_spill] sm:$0xff]  ;;  %v6856_v26 = vld [vmem:[#allocation92_spill] sm:$0xff] }
 0x5fa   :  { %1983 = vmatprep.mubr.f32.mxu1 %v5840_v19  ;;  %2054 = vmatprep.mubr.f32.mxu0 %v5840_v19 }
 0x5fb   :  { %1984 = vmatmul.mubr.f32.vlgmr.msra.gmra.mrb[4].mxu1 %v5838_v30  ;;  %2055 = vmatmul.mubr.f32.vlgmr.msra.gmra.mrb[20].mxu0 %v5838_v30 }
 0x5fc   :  { %3948 = vmatpush1.bf16.msra.mxu0 %v6644_v0  ;;  %2125 = vmatprep.mubr.f32.mxu0 %v5840_v19 }
 0x5fd   :  { %3950 = vmatprep.subr.bf16.mxu0 %v6645_v60  ;;  %4012 = vmatpush1.bf16.msra.mxu1 %v6797_v25  ;;  %v6887_v25 = vld [vmem:[#allocation59_spill] sm:$0xff] }
 0x5fe   :  { %4014 = vmatprep.subr.bf16.mxu1 %v6798_v32  ;;  %v6886_v32 = vld [vmem:[#allocation57_spill] sm:$0xff] }
 0x600   :  { %3952 = vmatpush1.bf16.msra.mxu0 %v6646_v35 }
 0x601   :  { %3954 = vmatprep.subr.bf16.mxu0 %v6647_v17  ;;  %4016 = vmatpush1.bf16.msra.mxu1 %v6799_v43  ;;  %v6885_v43 = vld [vmem:[#allocation55_spill] sm:$0xff] }
 0x602   :  { %4018 = vmatprep.subr.bf16.mxu1 %v6800_v21  ;;  %v6884_v21 = vld [vmem:[#allocation53_spill] sm:$0xff] }
 0x604   :  { %3956 = vmatpush1.bf16.msra.mxu0 %v5234_v41 }
 0x605   :  { %3958 = vmatprep.subr.bf16.mxu0 %v5240_v51  ;;  %4020 = vmatpush1.bf16.msra.mxu1 %v6801_v33  ;;  %v6883_v33 = vld [vmem:[#allocation51_spill] sm:$0xff] }
 0x606   :  { %4022 = vmatprep.subr.bf16.mxu1 %v6802_v38  ;;  %v6882_v38 = vld [vmem:[#allocation49_spill] sm:$0xff] }
 0x608   :  { %3960 = vmatpush1.bf16.msra.mxu0 %v5246_v27 }
 0x609   :  { %3962 = vmatprep.subr.bf16.mxu0 %v5252_v46  ;;  %4024 = vmatpush1.bf16.msra.mxu1 %v6803_v14  ;;  %v6881_v14 = vld [vmem:[#allocation47_spill] sm:$0xff] }
 0x60a   :  { %4026 = vmatprep.subr.bf16.mxu1 %v6804_v5  ;;  %v6880_v5 = vld [vmem:[#allocation45_spill] sm:$0xff] }
 0x60c   :  { %3964 = vmatpush1.bf16.msra.mxu0 %v5258_v36 }
 0x60d   :  { %3966 = vmatprep.subr.bf16.mxu0 %v6648_v34  ;;  %4028 = vmatpush1.bf16.msra.mxu1 %v6805_v20  ;;  %v6879_v20 = vld [vmem:[#allocation43_spill] sm:$0xff] }
 0x60e   :  { %4030 = vmatprep.subr.bf16.mxu1 %v6806_v10  ;;  %v6878_v10 = vld [vmem:[#allocation41_spill] sm:$0xff] }
 0x610   :  { %3968 = vmatpush1.bf16.msra.mxu0 %v5266_v42 }
 0x611   :  { %3970 = vmatprep.subr.bf16.mxu0 %v5269_v7  ;;  %4032 = vmatpush1.bf16.msra.mxu1 %v6807_v37  ;;  %v6877_v37 = vld [vmem:[#allocation39_spill] sm:$0xff] }
 0x612   :  { %4034 = vmatprep.subr.bf16.mxu1 %v6808_v40  ;;  %v6876_v40 = vld [vmem:[#allocation37_spill] sm:$0xff] }
 0x614   :  { %3972 = vmatpush1.bf16.msra.mxu0 %v5274_v8 }
 0x615   :  { %3974 = vmatprep.subr.bf16.mxu0 %v5278_v16  ;;  %4036 = vmatpush1.bf16.msra.mxu1 %v6809_v13  ;;  %v6875_v13 = vld [vmem:[#allocation35_spill] sm:$0xff] }
 0x616   :  { %4038 = vmatprep.subr.bf16.mxu1 %v6810_v63  ;;  %v6874_v63 = vld [vmem:[#allocation33_spill] sm:$0xff] }
 0x618   :  { %3976 = vmatpush1.bf16.msra.mxu0 %v5282_v24 }
 0x619   :  { %3978 = vmatprep.subr.bf16.mxu0 %v5286_v52  ;;  %4040 = vmatpush1.bf16.msra.mxu1 %v6811_v48  ;;  %v6873_v48 = vld [vmem:[#allocation31_spill] sm:$0xff] }
 0x61a   :  { %4042 = vmatprep.subr.bf16.mxu1 %v6812_v2  ;;  %v6872_v2 = vld [vmem:[#allocation29_spill] sm:$0xff] }
 0x61c   :  { %3980 = vmatpush1.bf16.msra.mxu0 %v5290_v61 }
 0x61d   :  { %3982 = vmatprep.subr.bf16.mxu0 %v5294_v62  ;;  %4044 = vmatpush1.bf16.msra.mxu1 %v6813_v59  ;;  %v6871_v59 = vld [vmem:[#allocation27_spill] sm:$0xff] }
 0x61e   :  { %4046 = vmatprep.subr.bf16.mxu1 %v6814_v47  ;;  %v6870_v47 = vld [vmem:[#allocation25_spill] sm:$0xff] }
 0x620   :  { %3984 = vmatpush1.bf16.msra.mxu0 %v5298_v12 }
 0x621   :  { %3986 = vmatprep.subr.bf16.mxu0 %v5302_v58  ;;  %4048 = vmatpush1.bf16.msra.mxu1 %v6815_v45  ;;  %v6869_v45 = vld [vmem:[#allocation23_spill] sm:$0xff] }
 0x622   :  { %4050 = vmatprep.subr.bf16.mxu1 %v6835_v31  ;;  %v6867_v31 = vld [vmem:[#allocation21_spill] sm:$0xff] }
 0x624   :  { %3988 = vmatpush1.bf16.msra.mxu0 %v6836_v23 }
 0x625   :  { %3990 = vmatprep.subr.bf16.mxu0 %v6837_v9  ;;  %4052 = vmatpush1.bf16.msra.mxu1 %v6838_v15  ;;  %v6866_v15 = vld [vmem:[#allocation20_spill] sm:$0xff] }
 0x626   :  { %4054 = vmatprep.subr.bf16.mxu1 %v6839_v56  ;;  %v6863_v56 = vld [vmem:[#allocation16_spill] sm:$0xff] }
 0x628   :  { %3992 = vmatpush1.bf16.msra.mxu0 %v6840_v55 }
 0x629   :  { %3994 = vmatprep.subr.bf16.mxu0 %v6841_v53  ;;  %4056 = vmatpush1.bf16.msra.mxu1 %v6842_v3  ;;  %v6862_v3 = vld [vmem:[#allocation15_spill] sm:$0xff]  ;;  %v6894_v53 = vld [vmem:[#allocation112_spill] sm:$0xff] }
 0x62a   :  { %4058 = vmatprep.subr.bf16.mxu1 %v6843_v6  ;;  %v6859_v6 = vld [vmem:[#allocation67_spill] sm:$0xff] }
 0x62c   :  { %3996 = vmatpush1.bf16.msra.mxu0 %v6844_v4  ;;  %v6891_v4 = vld [vmem:[#allocation109_spill] sm:$0xff] }
 0x62d   :  { %3998 = vmatprep.subr.bf16.mxu0 %v6845_v22  ;;  %4060 = vmatpush1.bf16.msra.mxu1 %v6846_v11  ;;  %v6857_v11 = vld [vmem:[#allocation12_spill] sm:$0xff] }
 0x62e   :  { %4062 = vmatprep.subr.bf16.mxu1 %v6847_v1  ;;  %v6858_v1 = vld [vmem:[#allocation80_spill] sm:$0xff] }
 0x630   :  { %4000 = vmatpush1.bf16.msra.mxu0 %v6848_v57 }
 0x631   :  { %4002 = vmatprep.subr.bf16.mxu0 %v6849_v18  ;;  %4064 = vmatpush1.bf16.msra.mxu1 %v6850_v49  ;;  %v6860_v49 = vld [vmem:[#allocation13_spill] sm:$0xff] }
 0x632   :  { %4066 = vmatprep.subr.bf16.mxu1 %v6851_v54  ;;  %v6861_v54 = vld [vmem:[#allocation14_spill] sm:$0xff] }
 0x634   :  { %4004 = vmatpush1.bf16.msra.mxu0 %v6852_v39 }
 0x635   :  { %4006 = vmatprep.subr.bf16.mxu0 %v6853_v28  ;;  %4068 = vmatpush1.bf16.msra.mxu1 %v6854_v50  ;;  %v6864_v50 = vld [vmem:[#allocation18_spill] sm:$0xff]  ;;  %v6890_v28 = vld [vmem:[#allocation65_spill] sm:$0xff] }
 0x636   :  { %4070 = vmatprep.subr.bf16.mxu1 %v6855_v44  ;;  %v6865_v44 = vld [vmem:[#allocation19_spill] sm:$0xff] }
 0x638   :  { %4008 = vmatpush1.bf16.msra.mxu0 %v6856_v26  ;;  %v6889_v26 = vld [vmem:[#allocation63_spill] sm:$0xff] }
 0x639   :  { %4074 = vmatprep.subr.bf16.mxu0 %v6857_v11  ;;  %4072 = vmatpush1.bf16.msra.mxu1 %v6858_v1  ;;  %v6868_v1 = vld [vmem:[#allocation22_spill] sm:$0xff] }
 0x63a   :  { %4138 = vmatprep.subr.bf16.mxu1 %v6859_v6  ;;  %v6888_v6 = vld [vmem:[#allocation61_spill] sm:$0xff] }
 0x63b   :  { %2126 = vmatmul.mubr.f32.vlgmr.msra.gmra.mrb[32].mxu0 %v5838_v30 }
 0x63c   :  { %4076 = vmatpush1.bf16.msra.mxu0 %v6860_v49 }
 0x63d   :  { %4078 = vmatprep.subr.bf16.mxu0 %v6861_v54 }
 0x640   :  { %4080 = vmatpush1.bf16.msra.mxu0 %v6862_v3 }
 0x641   :  { %4082 = vmatprep.subr.bf16.mxu0 %v6863_v56 }
 0x644   :  { %4084 = vmatpush1.bf16.msra.mxu0 %v6864_v50 }
 0x645   :  { %4086 = vmatprep.subr.bf16.mxu0 %v6865_v44 }
 0x648   :  { %4088 = vmatpush1.bf16.msra.mxu0 %v6866_v15 }
 0x649   :  { %4090 = vmatprep.subr.bf16.mxu0 %v6867_v31 }
 0x64c   :  { %4092 = vmatpush1.bf16.msra.mxu0 %v6868_v1 }
 0x64d   :  { %4094 = vmatprep.subr.bf16.mxu0 %v6869_v45 }
 0x650   :  { %4096 = vmatpush1.bf16.msra.mxu0 %v6870_v47 }
 0x651   :  { %4098 = vmatprep.subr.bf16.mxu0 %v6871_v59 }
 0x654   :  { %4100 = vmatpush1.bf16.msra.mxu0 %v6872_v2 }
 0x655   :  { %4102 = vmatprep.subr.bf16.mxu0 %v6873_v48 }
 0x658   :  { %4104 = vmatpush1.bf16.msra.mxu0 %v6874_v63 }
 0x659   :  { %4106 = vmatprep.subr.bf16.mxu0 %v6875_v13 }
 0x65c   :  { %4108 = vmatpush1.bf16.msra.mxu0 %v6876_v40 }
 0x65d   :  { %4110 = vmatprep.subr.bf16.mxu0 %v6877_v37 }
 0x660   :  { %4112 = vmatpush1.bf16.msra.mxu0 %v6878_v10 }
 0x661   :  { %4114 = vmatprep.subr.bf16.mxu0 %v6879_v20 }
 0x664   :  { %4116 = vmatpush1.bf16.msra.mxu0 %v6880_v5 }
 0x665   :  { %4118 = vmatprep.subr.bf16.mxu0 %v6881_v14 }
 0x668   :  { %4120 = vmatpush1.bf16.msra.mxu0 %v6882_v38 }
 0x669   :  { %4122 = vmatprep.subr.bf16.mxu0 %v6883_v33  ;;  %v6892_v33 = vld [vmem:[#allocation110_spill] sm:$0xff] }
 0x66c   :  { %4124 = vmatpush1.bf16.msra.mxu0 %v6884_v21 }
 0x66d   :  { %4126 = vmatprep.subr.bf16.mxu0 %v6885_v43 }
 0x670   :  { %4128 = vmatpush1.bf16.msra.mxu0 %v6886_v32 }
 0x671   :  { %4130 = vmatprep.subr.bf16.mxu0 %v6887_v25  ;;  %v6893_v25 = vld [vmem:[#allocation111_spill] sm:$0xff] }
 0x674   :  { %4132 = vmatpush1.bf16.msra.mxu0 %v6888_v6 }
 0x675   :  { %4134 = vmatprep.subr.bf16.mxu0 %v6889_v26 }
 0x678   :  { %4136 = vmatpush1.bf16.msra.mxu0 %v6890_v28 }
 0x679   :  { %4266 = vmatprep.subr.bf16.mxu0 %v6857_v11 }
 0x6ce   :  { %v1985_v39 = vpop.f32.mrb[4].mxu1  ;;  %v2056_v18 = vpop.f32.mrb[20].mxu0 }
 0x6cf   :  { %v1987_v57 = vpop.f32.mrb[5].mxu1  ;;  %v2058_v22 = vpop.f32.mrb[21].mxu0  ;;  %v4601_v21 = vadd.f32 %v1985_v39, %v6891_v4  ;;  %v4617_v6 = vadd.f32 %v2056_v18, %v6893_v25  ;;  %v6895_v39 = vld [vmem:[#allocation113_spill] sm:$0xff] }
 0x6d0   :  { %v4602_v43 = vadd.f32 %v1987_v57, %v6892_v33  ;;  %v4618_v26 = vadd.f32 %v2058_v22, %v6894_v53  ;;  %v6896_v22 = vld [vmem:[#allocation101_spill] sm:$0xff]  ;;  %v6897_v53 = vld [vmem:[#allocation102_spill] sm:$0xff] }
 0x6d1   :  { %v2134_v38 = vmul.f32 0.5, %v4601_v21  ;;  %v2144_v55 = vmul.f32 0.5, %v4617_v6 }
 0x6d2   :  { %v2135_v32 = vmul.f32 0.5, %v4602_v43  ;;  %v2145_v28 = vmul.f32 0.5, %v4618_v26 }
 0x6d3   :  { %4708 = vtanh.f32 %v2134_v38 }
 0x6d4   :  { %4710 = vtanh.f32 %v2135_v32 }
 0x6d5   :  { %4712 = vtanh.f32 %v2144_v55 }
 0x6d6   :  { %4714 = vtanh.f32 %v2145_v28 }
 0x6dd   :  { %v4709_v14 = vpop.eup %4708 }
 0x6de   :  { %v4711_v11 = vpop.eup %4710  ;;  %v2138_v5 = vmul.f32 0.5, %v4709_v14 }
 0x6df   :  { %v2139_v9 = vmul.f32 0.5, %v4711_v11  ;;  %v4713_v25 = vpop.eup %4712 }
 0x6e0   :  { %v2140_v57 = vadd.f32 0.5, %v2138_v5  ;;  %v4715_v26 = vpop.eup %4714  ;;  %v2148_v55 = vmul.f32 0.5, %v4713_v25  ;;  %v6899_v25 = vld [vmem:[#allocation82_spill] sm:$0xff] }
 0x6e1   :  { %v2141_v32 = vadd.f32 0.5, %v2139_v9  ;;  %v2149_v14 = vmul.f32 0.5, %v4715_v26  ;;  %v6909_v26 = vld [vmem:[#allocation53_spill] sm:$0xff] }
 0x6e2   :  { %v2150_v11 = vadd.f32 0.5, %v2148_v55  ;;  %v6910_v55 = vld [vmem:[#allocation55_spill] sm:$0xff] }
 0x6e3   :  { %v2151_v28 = vadd.f32 0.5, %v2149_v14  ;;  %v6911_v14 = vld [vmem:[#allocation88_spill] sm:$0xff] }
 0x6e4   :  { %v2162_v9 = vmul.f32 %v2150_v11, %v5838_v30  ;;  %v6901_v30 = vld [vmem:[#allocation45_spill] sm:$0xff] }
 0x70e   :  { %v2127_v23 = vpop.f32.mrb[32].mxu0 }
 0x70f   :  { %v2128_v4 = vadd.f32 %v2127_v23, %v6895_v39  ;;  %v2129_v21 = vpop.f32.mrb[33].mxu0  ;;  %v2158_v23 = vsub.f32 1.0, %v2150_v11  ;;  %v2159_v39 = vsub.f32 1.0, %v2151_v28  ;;  %v6912_v11 = vld [vmem:[#allocation89_spill] sm:$0xff] }
 0x710   :  { %v2130_v43 = vadd.f32 %v2129_v21, %v6706_v29 }
 0x711   :  { %v2152_v38 = vmul.f32 %v2140_v57, %v2128_v4  ;;  %v2163_v57 = vmul.f32 %v2151_v28, %v5840_v19  ;;  %v6902_v19 = vld [vmem:[#allocation47_spill] sm:$0xff]  ;;  %v6913_v28 = vld [vmem:[#allocation57_spill] sm:$0xff] }
 0x712   :  { %v2153_v18 = vmul.f32 %v2141_v32, %v2130_v43 }
 0x713   :  { %v2154_v6 = vadd.f32 %v2152_v38, %v6896_v22  ;;  %v6905_v38 = vld [vmem:[#allocation49_spill] sm:$0xff]  ;;  %v6907_v22 = vld [vmem:[#allocation86_spill] sm:$0xff] }
 0x714   :  { %v2155_v33 = vadd.f32 %v2153_v18, %v6897_v53  ;;  %v6903_v53 = vld [vmem:[#allocation84_spill] sm:$0xff]  ;;  %v6906_v18 = vld [vmem:[#allocation51_spill] sm:$0xff] }
 0x715   :  { %4716 = vtanh.f32 %v2154_v6  ;;  %v6908_v6 = vld [vmem:[#allocation87_spill] sm:$0xff] }
 0x716   :  { %4718 = vtanh.f32 %v2155_v33  ;;  %v6900_v33 = vld [vmem:[#allocation83_spill] sm:$0xff] }
 0x71f   :  { %v4717_v5 = vpop.eup %4716 }
 0x720   :  { %v4719_v20 = vpop.eup %4718  ;;  %v2160_v4 = vmul.f32 %v4717_v5, %v2158_v23  ;;  %v6914_v23 = vld [vmem:[#allocation59_spill] sm:$0xff]  ;;  %v6915_v5 = vld [vmem:[#allocation90_spill] sm:$0xff] }
 0x721   :  { %v2161_v21 = vmul.f32 %v4719_v20, %v2159_v39  ;;  %v6898_v20 = vld [vmem:[#allocation43_spill] sm:$0xff]  ;;  %v6904_v39 = vld [vmem:[#allocation85_spill] sm:$0xff] }
 0x722   :  { %v5954_v43 = vadd.f32 %v2162_v9, %v2160_v4  ;;  %v6916_v9 = vld [vmem:[#allocation91_spill] sm:$0xff]  ;;  %v6917_v4 = vld [vmem:[#allocation61_spill] sm:$0xff] }
 0x723   :  { %v5956_v32 = vadd.f32 %v2163_v57, %v2161_v21  ;;  %v6918_v57 = vld [vmem:[#allocation63_spill] sm:$0xff]  ;;  %v6919_v21 = vld [vmem:[#allocation92_spill] sm:$0xff] }
 0x725   :  { %2239 = vmatprep.mubr.f32.mxu1 %v5956_v32  ;;  %2310 = vmatprep.mubr.f32.mxu0 %v5956_v32 }
 0x726   :  { %2240 = vmatmul.mubr.f32.vlgmr.msra.gmra.mrb[6].mxu1 %v5954_v43  ;;  %2311 = vmatmul.mubr.f32.vlgmr.msra.gmra.mrb[22].mxu0 %v5954_v43 }
 0x727   :  { %4140 = vmatpush1.bf16.msra.mxu1 %v6644_v0  ;;  %2381 = vmatprep.mubr.f32.mxu1 %v5956_v32 }
 0x728   :  { %4142 = vmatprep.subr.bf16.mxu1 %v6645_v60  ;;  %4268 = vmatpush1.bf16.msra.mxu0 %v6860_v49  ;;  %v6950_v49 = vld [vmem:[#allocation77_spill] sm:$0xff] }
 0x729   :  { %4270 = vmatprep.subr.bf16.mxu0 %v6861_v54  ;;  %v6949_v54 = vld [vmem:[#allocation76_spill] sm:$0xff] }
 0x72b   :  { %4144 = vmatpush1.bf16.msra.mxu1 %v6646_v35 }
 0x72c   :  { %4146 = vmatprep.subr.bf16.mxu1 %v6647_v17  ;;  %4272 = vmatpush1.bf16.msra.mxu0 %v6862_v3  ;;  %v6948_v3 = vld [vmem:[#allocation74_spill] sm:$0xff] }
 0x72d   :  { %4274 = vmatprep.subr.bf16.mxu0 %v6863_v56  ;;  %v6947_v56 = vld [vmem:[#allocation72_spill] sm:$0xff] }
 0x72f   :  { %4148 = vmatpush1.bf16.msra.mxu1 %v5234_v41 }
 0x730   :  { %4150 = vmatprep.subr.bf16.mxu1 %v5240_v51  ;;  %4276 = vmatpush1.bf16.msra.mxu0 %v6864_v50  ;;  %v6946_v50 = vld [vmem:[#allocation70_spill] sm:$0xff] }
 0x731   :  { %4278 = vmatprep.subr.bf16.mxu0 %v6865_v44  ;;  %v6945_v44 = vld [vmem:[#allocation68_spill] sm:$0xff] }
 0x733   :  { %4152 = vmatpush1.bf16.msra.mxu1 %v5246_v27 }
 0x734   :  { %4154 = vmatprep.subr.bf16.mxu1 %v5252_v46  ;;  %4280 = vmatpush1.bf16.msra.mxu0 %v6866_v15  ;;  %v6944_v15 = vld [vmem:[#allocation66_spill] sm:$0xff] }
 0x735   :  { %4282 = vmatprep.subr.bf16.mxu0 %v6867_v31  ;;  %v6943_v31 = vld [vmem:[#allocation64_spill] sm:$0xff] }
 0x737   :  { %4156 = vmatpush1.bf16.msra.mxu1 %v5258_v36 }
 0x738   :  { %4158 = vmatprep.subr.bf16.mxu1 %v6648_v34  ;;  %4284 = vmatpush1.bf16.msra.mxu0 %v6868_v1  ;;  %v6942_v1 = vld [vmem:[#allocation62_spill] sm:$0xff] }
 0x739   :  { %4286 = vmatprep.subr.bf16.mxu0 %v6869_v45  ;;  %v6941_v45 = vld [vmem:[#allocation60_spill] sm:$0xff] }
 0x73b   :  { %4160 = vmatpush1.bf16.msra.mxu1 %v5266_v42 }
 0x73c   :  { %4162 = vmatprep.subr.bf16.mxu1 %v5269_v7  ;;  %4288 = vmatpush1.bf16.msra.mxu0 %v6870_v47  ;;  %v6940_v47 = vld [vmem:[#allocation58_spill] sm:$0xff] }
 0x73d   :  { %4290 = vmatprep.subr.bf16.mxu0 %v6871_v59  ;;  %v6939_v59 = vld [vmem:[#allocation56_spill] sm:$0xff] }
 0x73f   :  { %4164 = vmatpush1.bf16.msra.mxu1 %v5274_v8 }
 0x740   :  { %4166 = vmatprep.subr.bf16.mxu1 %v5278_v16  ;;  %4292 = vmatpush1.bf16.msra.mxu0 %v6872_v2  ;;  %v6938_v2 = vld [vmem:[#allocation54_spill] sm:$0xff] }
 0x741   :  { %4294 = vmatprep.subr.bf16.mxu0 %v6873_v48  ;;  %v6937_v48 = vld [vmem:[#allocation52_spill] sm:$0xff] }
 0x743   :  { %4168 = vmatpush1.bf16.msra.mxu1 %v5282_v24 }
 0x744   :  { %4170 = vmatprep.subr.bf16.mxu1 %v5286_v52  ;;  %4296 = vmatpush1.bf16.msra.mxu0 %v6874_v63  ;;  %v6936_v63 = vld [vmem:[#allocation50_spill] sm:$0xff] }
 0x745   :  { %4298 = vmatprep.subr.bf16.mxu0 %v6875_v13  ;;  %v6935_v13 = vld [vmem:[#allocation48_spill] sm:$0xff] }
 0x747   :  { %4172 = vmatpush1.bf16.msra.mxu1 %v5290_v61 }
 0x748   :  { %4174 = vmatprep.subr.bf16.mxu1 %v5294_v62  ;;  %4300 = vmatpush1.bf16.msra.mxu0 %v6876_v40  ;;  %v6934_v40 = vld [vmem:[#allocation46_spill] sm:$0xff] }
 0x749   :  { %4302 = vmatprep.subr.bf16.mxu0 %v6877_v37  ;;  %v6933_v37 = vld [vmem:[#allocation44_spill] sm:$0xff] }
 0x74b   :  { %4176 = vmatpush1.bf16.msra.mxu1 %v5298_v12 }
 0x74c   :  { %4178 = vmatprep.subr.bf16.mxu1 %v5302_v58  ;;  %4304 = vmatpush1.bf16.msra.mxu0 %v6878_v10  ;;  %v6932_v10 = vld [vmem:[#allocation42_spill] sm:$0xff] }
 0x74d   :  { %4306 = vmatprep.subr.bf16.mxu0 %v6898_v20  ;;  %v6930_v20 = vld [vmem:[#allocation38_spill] sm:$0xff] }
 0x74f   :  { %4180 = vmatpush1.bf16.msra.mxu1 %v6899_v25 }
 0x750   :  { %4182 = vmatprep.subr.bf16.mxu1 %v6900_v33  ;;  %4308 = vmatpush1.bf16.msra.mxu0 %v6901_v30  ;;  %v6929_v30 = vld [vmem:[#allocation36_spill] sm:$0xff] }
 0x751   :  { %4310 = vmatprep.subr.bf16.mxu0 %v6902_v19  ;;  %v6926_v19 = vld [vmem:[#allocation30_spill] sm:$0xff] }
 0x753   :  { %4184 = vmatpush1.bf16.msra.mxu1 %v6903_v53 }
 0x754   :  { %4186 = vmatprep.subr.bf16.mxu1 %v6904_v39  ;;  %4312 = vmatpush1.bf16.msra.mxu0 %v6905_v38  ;;  %v6925_v38 = vld [vmem:[#allocation28_spill] sm:$0xff] }
 0x755   :  { %4314 = vmatprep.subr.bf16.mxu0 %v6906_v18  ;;  %v6922_v18 = vld [vmem:[#allocation67_spill] sm:$0xff]  ;;  %v6957_v39 = vld [vmem:[#allocation112_spill] sm:$0xff] }
 0x757   :  { %4188 = vmatpush1.bf16.msra.mxu1 %v6907_v22  ;;  %v6954_v22 = vld [vmem:[#allocation109_spill] sm:$0xff] }
 0x758   :  { %4190 = vmatprep.subr.bf16.mxu1 %v6908_v6  ;;  %4316 = vmatpush1.bf16.msra.mxu0 %v6909_v26  ;;  %v6920_v26 = vld [vmem:[#allocation17_spill] sm:$0xff] }
 0x759   :  { %4318 = vmatprep.subr.bf16.mxu0 %v6910_v55  ;;  %v6921_v55 = vld [vmem:[#allocation65_spill] sm:$0xff] }
 0x75b   :  { %4192 = vmatpush1.bf16.msra.mxu1 %v6911_v14 }
 0x75c   :  { %4194 = vmatprep.subr.bf16.mxu1 %v6912_v11  ;;  %4320 = vmatpush1.bf16.msra.mxu0 %v6913_v28  ;;  %v6923_v28 = vld [vmem:[#allocation24_spill] sm:$0xff] }
 0x75d   :  { %4322 = vmatprep.subr.bf16.mxu0 %v6914_v23  ;;  %v6924_v23 = vld [vmem:[#allocation26_spill] sm:$0xff] }
 0x75f   :  { %4196 = vmatpush1.bf16.msra.mxu1 %v6915_v5 }
 0x760   :  { %4198 = vmatprep.subr.bf16.mxu1 %v6916_v9  ;;  %4324 = vmatpush1.bf16.msra.mxu0 %v6917_v4  ;;  %v6927_v4 = vld [vmem:[#allocation32_spill] sm:$0xff] }
 0x761   :  { %4326 = vmatprep.subr.bf16.mxu0 %v6918_v57  ;;  %v6928_v57 = vld [vmem:[#allocation34_spill] sm:$0xff]  ;;  %v6953_v9 = vld [vmem:[#allocation80_spill] sm:$0xff] }
 0x763   :  { %4200 = vmatpush1.bf16.msra.mxu1 %v6919_v21  ;;  %v6952_v21 = vld [vmem:[#allocation79_spill] sm:$0xff] }
 0x764   :  { %4202 = vmatprep.subr.bf16.mxu1 %v6920_v26  ;;  %4328 = vmatpush1.bf16.msra.mxu0 %v6921_v55  ;;  %v6931_v55 = vld [vmem:[#allocation40_spill] sm:$0xff] }
 0x765   :  { %4330 = vmatprep.subr.bf16.mxu0 %v6922_v18  ;;  %v6951_v18 = vld [vmem:[#allocation78_spill] sm:$0xff] }
 0x766   :  { %2382 = vmatmul.mubr.f32.vlgmr.msra.gmra.mrb[36].mxu1 %v5954_v43 }
 0x767   :  { %4204 = vmatpush1.bf16.msra.mxu1 %v6923_v28 }
 0x768   :  { %4206 = vmatprep.subr.bf16.mxu1 %v6924_v23 }
 0x76b   :  { %4208 = vmatpush1.bf16.msra.mxu1 %v6925_v38 }
 0x76c   :  { %4210 = vmatprep.subr.bf16.mxu1 %v6926_v19 }
 0x76f   :  { %4212 = vmatpush1.bf16.msra.mxu1 %v6927_v4 }
 0x770   :  { %4214 = vmatprep.subr.bf16.mxu1 %v6928_v57 }
 0x773   :  { %4216 = vmatpush1.bf16.msra.mxu1 %v6929_v30 }
 0x774   :  { %4218 = vmatprep.subr.bf16.mxu1 %v6930_v20 }
 0x777   :  { %4220 = vmatpush1.bf16.msra.mxu1 %v6931_v55 }
 0x778   :  { %4222 = vmatprep.subr.bf16.mxu1 %v6932_v10 }
 0x77b   :  { %4224 = vmatpush1.bf16.msra.mxu1 %v6933_v37 }
 0x77c   :  { %4226 = vmatprep.subr.bf16.mxu1 %v6934_v40 }
 0x77f   :  { %4228 = vmatpush1.bf16.msra.mxu1 %v6935_v13 }
 0x780   :  { %4230 = vmatprep.subr.bf16.mxu1 %v6936_v63 }
 0x783   :  { %4232 = vmatpush1.bf16.msra.mxu1 %v6937_v48 }
 0x784   :  { %4234 = vmatprep.subr.bf16.mxu1 %v6938_v2 }
 0x787   :  { %4236 = vmatpush1.bf16.msra.mxu1 %v6939_v59 }
 0x788   :  { %4238 = vmatprep.subr.bf16.mxu1 %v6940_v47 }
 0x78b   :  { %4240 = vmatpush1.bf16.msra.mxu1 %v6941_v45 }
 0x78c   :  { %4242 = vmatprep.subr.bf16.mxu1 %v6942_v1 }
 0x78f   :  { %4244 = vmatpush1.bf16.msra.mxu1 %v6943_v31 }
 0x790   :  { %4246 = vmatprep.subr.bf16.mxu1 %v6944_v15 }
 0x793   :  { %4248 = vmatpush1.bf16.msra.mxu1 %v6945_v44 }
 0x794   :  { %4250 = vmatprep.subr.bf16.mxu1 %v6946_v50  ;;  %v6955_v50 = vld [vmem:[#allocation110_spill] sm:$0xff] }
 0x797   :  { %4252 = vmatpush1.bf16.msra.mxu1 %v6947_v56 }
 0x798   :  { %4254 = vmatprep.subr.bf16.mxu1 %v6948_v3 }
 0x79b   :  { %4256 = vmatpush1.bf16.msra.mxu1 %v6949_v54 }
 0x79c   :  { %4258 = vmatprep.subr.bf16.mxu1 %v6950_v49  ;;  %v6956_v49 = vld [vmem:[#allocation111_spill] sm:$0xff] }
 0x79f   :  { %4260 = vmatpush1.bf16.msra.mxu1 %v6951_v18 }
 0x7a0   :  { %4262 = vmatprep.subr.bf16.mxu1 %v6952_v21 }
 0x7a3   :  { %4264 = vmatpush1.bf16.msra.mxu1 %v6953_v9 }
 0x7a4   :  { %4394 = vmatprep.subr.bf16.mxu1 %v6920_v26 }
 0x7f9   :  { %v2241_v5 = vpop.f32.mrb[6].mxu1  ;;  %v2312_v11 = vpop.f32.mrb[22].mxu0 }
 0x7fa   :  { %v2243_v14 = vpop.f32.mrb[7].mxu1  ;;  %v2314_v6 = vpop.f32.mrb[23].mxu0  ;;  %v4603_v56 = vadd.f32 %v2241_v5, %v6954_v22  ;;  %v4619_v18 = vadd.f32 %v2312_v11, %v6956_v49  ;;  %v6958_v5 = vld [vmem:[#allocation113_spill] sm:$0xff] }
 0x7fb   :  { %v4604_v3 = vadd.f32 %v2243_v14, %v6955_v50  ;;  %v4620_v21 = vadd.f32 %v2314_v6, %v6957_v39  ;;  %v6959_v6 = vld [vmem:[#allocation103_spill] sm:$0xff]  ;;  %v6960_v39 = vld [vmem:[#allocation104_spill] sm:$0xff] }
 0x7fc   :  { %v2390_v44 = vmul.f32 0.5, %v4603_v56  ;;  %v2400_v53 = vmul.f32 0.5, %v4619_v18 }
 0x7fd   :  { %v2391_v54 = vmul.f32 0.5, %v4604_v3  ;;  %v2401_v9 = vmul.f32 0.5, %v4620_v21 }
 0x7fe   :  { %4720 = vtanh.f32 %v2390_v44 }
 0x7ff   :  { %4722 = vtanh.f32 %v2391_v54 }
 0x800   :  { %4724 = vtanh.f32 %v2400_v53 }
 0x801   :  { %4726 = vtanh.f32 %v2401_v9 }
 0x808   :  { %v4721_v15 = vpop.eup %4720 }
 0x809   :  { %v4723_v26 = vpop.eup %4722  ;;  %v2394_v31 = vmul.f32 0.5, %v4721_v15 }
 0x80a   :  { %v2395_v33 = vmul.f32 0.5, %v4723_v26  ;;  %v4725_v49 = vpop.eup %4724 }
 0x80b   :  { %v2396_v14 = vadd.f32 0.5, %v2394_v31  ;;  %v4727_v21 = vpop.eup %4726  ;;  %v2404_v53 = vmul.f32 0.5, %v4725_v49  ;;  %v6972_v49 = vld [vmem:[#allocation72_spill] sm:$0xff] }
 0x80c   :  { %v2397_v54 = vadd.f32 0.5, %v2395_v33  ;;  %v2405_v15 = vmul.f32 0.5, %v4727_v21  ;;  %v6991_v21 = vld [vmem:[#allocation19_spill] sm:$0xff] }
 0x80d   :  { %v2406_v9 = vadd.f32 0.5, %v2404_v53  ;;  %v6992_v53 = vld [vmem:[#allocation20_spill] sm:$0xff] }
 0x80e   :  { %v2407_v26 = vadd.f32 0.5, %v2405_v15  ;;  %v6993_v15 = vld [vmem:[#allocation21_spill] sm:$0xff] }
 0x80f   :  { %v2418_v33 = vmul.f32 %v2406_v9, %v5954_v43  ;;  %v6974_v43 = vld [vmem:[#allocation88_spill] sm:$0xff] }
 0x839   :  { %v2383_v25 = vpop.f32.mrb[36].mxu1 }
 0x83a   :  { %v2384_v22 = vadd.f32 %v2383_v25, %v6958_v5  ;;  %v2385_v56 = vpop.f32.mrb[37].mxu1  ;;  %v2414_v25 = vsub.f32 1.0, %v2406_v9  ;;  %v2415_v5 = vsub.f32 1.0, %v2407_v26  ;;  %v6994_v9 = vld [vmem:[#allocation22_spill] sm:$0xff] }
 0x83b   :  { %v2386_v3 = vadd.f32 %v2385_v56, %v6706_v29 }
 0x83c   :  { %v2408_v44 = vmul.f32 %v2396_v14, %v2384_v22  ;;  %v2419_v14 = vmul.f32 %v2407_v26, %v5956_v32  ;;  %v6975_v32 = vld [vmem:[#allocation89_spill] sm:$0xff]  ;;  %v6995_v26 = vld [vmem:[#allocation23_spill] sm:$0xff] }
 0x83d   :  { %v2409_v11 = vmul.f32 %v2397_v54, %v2386_v3 }
 0x83e   :  { %v2410_v18 = vadd.f32 %v2408_v44, %v6959_v6  ;;  %v6987_v44 = vld [vmem:[#allocation14_spill] sm:$0xff]  ;;  %v6989_v6 = vld [vmem:[#allocation16_spill] sm:$0xff] }
 0x83f   :  { %v2411_v50 = vadd.f32 %v2409_v11, %v6960_v39  ;;  %v6979_v39 = vld [vmem:[#allocation91_spill] sm:$0xff] }
 0x840   :  { %4728 = vtanh.f32 %v2410_v18  ;;  %v6988_v11 = vld [vmem:[#allocation15_spill] sm:$0xff]  ;;  %v6990_v18 = vld [vmem:[#allocation18_spill] sm:$0xff] }
 0x841   :  { %4730 = vtanh.f32 %v2411_v50  ;;  %v6973_v50 = vld [vmem:[#allocation74_spill] sm:$0xff] }
 0x84a   :  { %v4729_v31 = vpop.eup %4728 }
 0x84b   :  { %v4731_v1 = vpop.eup %4730  ;;  %v2416_v22 = vmul.f32 %v4729_v31, %v2414_v25  ;;  %v6996_v25 = vld [vmem:[#allocation25_spill] sm:$0xff]  ;;  %v6997_v31 = vld [vmem:[#allocation27_spill] sm:$0xff] }
 0x84c   :  { %v2417_v56 = vmul.f32 %v4731_v1, %v2415_v5  ;;  %v6970_v1 = vld [vmem:[#allocation86_spill] sm:$0xff]  ;;  %v6986_v5 = vld [vmem:[#allocation13_spill] sm:$0xff] }
 0x84d   :  { %v6070_v3 = vadd.f32 %v2418_v33, %v2416_v22  ;;  %v6998_v33 = vld [vmem:[#allocation29_spill] sm:$0xff]  ;;  %v6999_v22 = vld [vmem:[#allocation31_spill] sm:$0xff] }
 0x84e   :  { %v6072_v54 = vadd.f32 %v2419_v14, %v2417_v56  ;;  %v7000_v14 = vld [vmem:[#allocation33_spill] sm:$0xff]  ;;  %v7001_v56 = vld [vmem:[#allocation35_spill] sm:$0xff] }
 0x850   :  { %2495 = vmatprep.mubr.f32.mxu1 %v6072_v54  ;;  %2566 = vmatprep.mubr.f32.mxu0 %v6072_v54 }
 0x851   :  { %2496 = vmatmul.mubr.f32.vlgmr.msra.gmra.mrb[8].mxu1 %v6070_v3  ;;  %2567 = vmatmul.mubr.f32.vlgmr.msra.gmra.mrb[24].mxu0 %v6070_v3 }
 0x852   :  { %4332 = vmatpush1.bf16.msra.mxu0 %v6644_v0  ;;  %2637 = vmatprep.mubr.f32.mxu0 %v6072_v54 }
 0x853   :  { %4334 = vmatprep.subr.bf16.mxu0 %v6645_v60  ;;  %4396 = vmatpush1.bf16.msra.mxu1 %v6923_v28  ;;  %v6982_v28 = vld [vmem:[#allocation92_spill] sm:$0xff] }
 0x854   :  { %4398 = vmatprep.subr.bf16.mxu1 %v6924_v23  ;;  %v6983_v23 = vld [vmem:[#allocation12_spill] sm:$0xff] }
 0x856   :  { %4336 = vmatpush1.bf16.msra.mxu0 %v6646_v35 }
 0x857   :  { %4338 = vmatprep.subr.bf16.mxu0 %v6647_v17  ;;  %4400 = vmatpush1.bf16.msra.mxu1 %v6925_v38  ;;  %v6980_v38 = vld [vmem:[#allocation78_spill] sm:$0xff] }
 0x858   :  { %4402 = vmatprep.subr.bf16.mxu1 %v6926_v19  ;;  %v6978_v19 = vld [vmem:[#allocation90_spill] sm:$0xff] }
 0x85a   :  { %4340 = vmatpush1.bf16.msra.mxu0 %v5234_v41 }
 0x85b   :  { %4342 = vmatprep.subr.bf16.mxu0 %v5240_v51  ;;  %4404 = vmatpush1.bf16.msra.mxu1 %v6927_v4  ;;  %v6984_v4 = vld [vmem:[#allocation80_spill] sm:$0xff] }
 0x85c   :  { %4406 = vmatprep.subr.bf16.mxu1 %v6928_v57  ;;  %v6985_v57 = vld [vmem:[#allocation67_spill] sm:$0xff] }
 0x85e   :  { %4344 = vmatpush1.bf16.msra.mxu0 %v5246_v27 }
 0x85f   :  { %4346 = vmatprep.subr.bf16.mxu0 %v5252_v46  ;;  %4408 = vmatpush1.bf16.msra.mxu1 %v6929_v30  ;;  %v6977_v30 = vld [vmem:[#allocation77_spill] sm:$0xff] }
 0x860   :  { %4410 = vmatprep.subr.bf16.mxu1 %v6930_v20  ;;  %v6976_v20 = vld [vmem:[#allocation76_spill] sm:$0xff] }
 0x862   :  { %4348 = vmatpush1.bf16.msra.mxu0 %v5258_v36 }
 0x863   :  { %4350 = vmatprep.subr.bf16.mxu0 %v6648_v34  ;;  %4412 = vmatpush1.bf16.msra.mxu1 %v6931_v55  ;;  %v6981_v55 = vld [vmem:[#allocation79_spill] sm:$0xff] }
 0x864   :  { %4414 = vmatprep.subr.bf16.mxu1 %v6932_v10  ;;  %v6969_v10 = vld [vmem:[#allocation70_spill] sm:$0xff] }
 0x866   :  { %4352 = vmatpush1.bf16.msra.mxu0 %v5266_v42 }
 0x867   :  { %4354 = vmatprep.subr.bf16.mxu0 %v5269_v7  ;;  %4416 = vmatpush1.bf16.msra.mxu1 %v6933_v37  ;;  %v6966_v37 = vld [vmem:[#allocation84_spill] sm:$0xff] }
 0x868   :  { %4418 = vmatprep.subr.bf16.mxu1 %v6934_v40  ;;  %v6965_v40 = vld [vmem:[#allocation66_spill] sm:$0xff] }
 0x86a   :  { %4356 = vmatpush1.bf16.msra.mxu0 %v5274_v8 }
 0x86b   :  { %4358 = vmatprep.subr.bf16.mxu0 %v5278_v16  ;;  %4420 = vmatpush1.bf16.msra.mxu1 %v6935_v13  ;;  %v6962_v13 = vld [vmem:[#allocation82_spill] sm:$0xff] }
 0x86c   :  { %4422 = vmatprep.subr.bf16.mxu1 %v6936_v63  ;;  %v6961_v63 = vld [vmem:[#allocation62_spill] sm:$0xff] }
 0x86e   :  { %4360 = vmatpush1.bf16.msra.mxu0 %v5282_v24 }
 0x86f   :  { %4362 = vmatprep.subr.bf16.mxu0 %v5286_v52  ;;  %4424 = vmatpush1.bf16.msra.mxu1 %v6937_v48  ;;  %v6963_v48 = vld [vmem:[#allocation83_spill] sm:$0xff] }
 0x870   :  { %4426 = vmatprep.subr.bf16.mxu1 %v6938_v2  ;;  %v6964_v2 = vld [vmem:[#allocation64_spill] sm:$0xff] }
 0x872   :  { %4364 = vmatpush1.bf16.msra.mxu0 %v5290_v61 }
 0x873   :  { %4366 = vmatprep.subr.bf16.mxu0 %v5294_v62  ;;  %4428 = vmatpush1.bf16.msra.mxu1 %v6939_v59  ;;  %v6967_v59 = vld [vmem:[#allocation85_spill] sm:$0xff] }
 0x874   :  { %4430 = vmatprep.subr.bf16.mxu1 %v6940_v47  ;;  %v6968_v47 = vld [vmem:[#allocation68_spill] sm:$0xff] }
 0x876   :  { %4368 = vmatpush1.bf16.msra.mxu0 %v5298_v12 }
 0x877   :  { %4370 = vmatprep.subr.bf16.mxu0 %v5302_v58  ;;  %4432 = vmatpush1.bf16.msra.mxu1 %v6941_v45  ;;  %v6971_v45 = vld [vmem:[#allocation87_spill] sm:$0xff] }
 0x878   :  { %4434 = vmatprep.subr.bf16.mxu1 %v6961_v63  ;;  %v7002_v63 = vld [vmem:[#allocation37_spill] sm:$0xff] }
 0x87a   :  { %4372 = vmatpush1.bf16.msra.mxu0 %v6962_v13 }
 0x87b   :  { %4374 = vmatprep.subr.bf16.mxu0 %v6963_v48  ;;  %4436 = vmatpush1.bf16.msra.mxu1 %v6964_v2  ;;  %v7003_v2 = vld [vmem:[#allocation39_spill] sm:$0xff] }
 0x87c   :  { %4438 = vmatprep.subr.bf16.mxu1 %v6965_v40  ;;  %v7004_v40 = vld [vmem:[#allocation41_spill] sm:$0xff] }
 0x87e   :  { %4376 = vmatpush1.bf16.msra.mxu0 %v6966_v37 }
 0x87f   :  { %4378 = vmatprep.subr.bf16.mxu0 %v6967_v59  ;;  %4440 = vmatpush1.bf16.msra.mxu1 %v6968_v47  ;;  %v7005_v47 = vld [vmem:[#allocation43_spill] sm:$0xff] }
 0x880   :  { %4442 = vmatprep.subr.bf16.mxu1 %v6969_v10  ;;  %v7006_v10 = vld [vmem:[#allocation45_spill] sm:$0xff] }
 0x882   :  { %4380 = vmatpush1.bf16.msra.mxu0 %v6970_v1 }
 0x883   :  { %4382 = vmatprep.subr.bf16.mxu0 %v6971_v45  ;;  %4444 = vmatpush1.bf16.msra.mxu1 %v6972_v49  ;;  %v7007_v49 = vld [vmem:[#allocation47_spill] sm:$0xff] }
 0x884   :  { %4446 = vmatprep.subr.bf16.mxu1 %v6973_v50  ;;  %v7008_v50 = vld [vmem:[#allocation49_spill] sm:$0xff] }
 0x886   :  { %4384 = vmatpush1.bf16.msra.mxu0 %v6974_v43 }
 0x887   :  { %4386 = vmatprep.subr.bf16.mxu0 %v6975_v32  ;;  %4448 = vmatpush1.bf16.msra.mxu1 %v6976_v20  ;;  %v7009_v20 = vld [vmem:[#allocation51_spill] sm:$0xff] }
 0x888   :  { %4450 = vmatprep.subr.bf16.mxu1 %v6977_v30  ;;  %v7010_v30 = vld [vmem:[#allocation53_spill] sm:$0xff] }
 0x88a   :  { %4388 = vmatpush1.bf16.msra.mxu0 %v6978_v19 }
 0x88b   :  { %4390 = vmatprep.subr.bf16.mxu0 %v6979_v39  ;;  %4452 = vmatpush1.bf16.msra.mxu1 %v6980_v38  ;;  %v7011_v38 = vld [vmem:[#allocation55_spill] sm:$0xff] }
 0x88c   :  { %4454 = vmatprep.subr.bf16.mxu1 %v6981_v55  ;;  %v7012_v55 = vld [vmem:[#allocation57_spill] sm:$0xff] }
 0x88e   :  { %4392 = vmatpush1.bf16.msra.mxu0 %v6982_v28 }
 0x88f   :  { %4458 = vmatprep.subr.bf16.mxu0 %v6983_v23  ;;  %4456 = vmatpush1.bf16.msra.mxu1 %v6984_v4  ;;  %v7013_v23 = vld [vmem:[#allocation59_spill] sm:$0xff]  ;;  %v7014_v4 = vld [vmem:[#allocation61_spill] sm:$0xff] }
 0x890   :  { %4522 = vmatprep.subr.bf16.mxu1 %v6985_v57  ;;  %v7015_v57 = vld [vmem:[#allocation63_spill] sm:$0xff] }
 0x891   :  { %2638 = vmatmul.mubr.f32.vlgmr.msra.gmra.mrb[34].mxu0 %v6070_v3 }
 0x892   :  { %4460 = vmatpush1.bf16.msra.mxu0 %v6986_v5  ;;  %v7016_v5 = vld [vmem:[#allocation65_spill] sm:$0xff] }
 0x893   :  { %4462 = vmatprep.subr.bf16.mxu0 %v6987_v44 }
 0x896   :  { %4464 = vmatpush1.bf16.msra.mxu0 %v6988_v11 }
 0x897   :  { %4466 = vmatprep.subr.bf16.mxu0 %v6989_v6 }
 0x89a   :  { %4468 = vmatpush1.bf16.msra.mxu0 %v6990_v18 }
 0x89b   :  { %4470 = vmatprep.subr.bf16.mxu0 %v6991_v21  ;;  %v7017_v21 = vld [vmem:[#allocation109_spill] sm:$0xff] }
 0x89e   :  { %4472 = vmatpush1.bf16.msra.mxu0 %v6992_v53 }
 0x89f   :  { %4474 = vmatprep.subr.bf16.mxu0 %v6993_v15  ;;  %v7018_v15 = vld [vmem:[#allocation110_spill] sm:$0xff] }
 0x8a2   :  { %4476 = vmatpush1.bf16.msra.mxu0 %v6994_v9 }
 0x8a3   :  { %4478 = vmatprep.subr.bf16.mxu0 %v6995_v26 }
 0x8a6   :  { %4480 = vmatpush1.bf16.msra.mxu0 %v6996_v25 }
 0x8a7   :  { %4482 = vmatprep.subr.bf16.mxu0 %v6997_v31  ;;  %v7019_v31 = vld [vmem:[#allocation111_spill] sm:$0xff] }
 0x8aa   :  { %4484 = vmatpush1.bf16.msra.mxu0 %v6998_v33 }
 0x8ab   :  { %4486 = vmatprep.subr.bf16.mxu0 %v6999_v22  ;;  %v7020_v22 = vld [vmem:[#allocation112_spill] sm:$0xff] }
 0x8ae   :  { %4488 = vmatpush1.bf16.msra.mxu0 %v7000_v14 }
 0x8af   :  { %4490 = vmatprep.subr.bf16.mxu0 %v7001_v56 }
 0x8b2   :  { %4492 = vmatpush1.bf16.msra.mxu0 %v7002_v63 }
 0x8b3   :  { %4494 = vmatprep.subr.bf16.mxu0 %v7003_v2 }
 0x8b6   :  { %4496 = vmatpush1.bf16.msra.mxu0 %v7004_v40 }
 0x8b7   :  { %4498 = vmatprep.subr.bf16.mxu0 %v7005_v47 }
 0x8ba   :  { %4500 = vmatpush1.bf16.msra.mxu0 %v7006_v10 }
 0x8bb   :  { %4502 = vmatprep.subr.bf16.mxu0 %v7007_v49 }
 0x8be   :  { %4504 = vmatpush1.bf16.msra.mxu0 %v7008_v50  ;;  %v7021_v50 = vld [vmem:[#allocation113_spill] sm:$0xff] }
 0x8bf   :  { %4506 = vmatprep.subr.bf16.mxu0 %v7009_v20 }
 0x8c2   :  { %4508 = vmatpush1.bf16.msra.mxu0 %v7010_v30 }
 0x8c3   :  { %4510 = vmatprep.subr.bf16.mxu0 %v7011_v38 }
 0x8c6   :  { %4512 = vmatpush1.bf16.msra.mxu0 %v7012_v55 }
 0x8c7   :  { %4514 = vmatprep.subr.bf16.mxu0 %v7013_v23 }
 0x8ca   :  { %4516 = vmatpush1.bf16.msra.mxu0 %v7014_v4 }
 0x8cb   :  { %4518 = vmatprep.subr.bf16.mxu0 %v7015_v57 }
 0x8ce   :  { %4520 = vmatpush1.bf16.msra.mxu0 %v7016_v5 }
 0x924   :  { %v2497_v44 = vpop.f32.mrb[8].mxu1  ;;  %v2568_v11 = vpop.f32.mrb[24].mxu0 }
 0x925   :  { %v2499_v6 = vpop.f32.mrb[9].mxu1  ;;  %v2570_v18 = vpop.f32.mrb[25].mxu0  ;;  %v4605_v53 = vadd.f32 %v2497_v44, %v7017_v21  ;;  %v4621_v33 = vadd.f32 %v2568_v11, %v7019_v31  ;;  %v7022_v44 = vld [vmem:[#allocation105_spill] sm:$0xff] }
 0x926   :  { %v4606_v9 = vadd.f32 %v2499_v6, %v7018_v15  ;;  %v4622_v14 = vadd.f32 %v2570_v18, %v7020_v22  ;;  %v7023_v18 = vld [vmem:[#allocation106_spill] sm:$0xff] }
 0x927   :  { %v2646_v26 = vmul.f32 0.5, %v4605_v53  ;;  %v2656_v56 = vmul.f32 0.5, %v4621_v33 }
 0x928   :  { %v2647_v25 = vmul.f32 0.5, %v4606_v9  ;;  %v2657_v63 = vmul.f32 0.5, %v4622_v14 }
 0x929   :  { %4732 = vtanh.f32 %v2646_v26 }
 0x92a   :  { %4734 = vtanh.f32 %v2647_v25 }
 0x92b   :  { %4736 = vtanh.f32 %v2656_v56 }
 0x92c   :  { %4738 = vtanh.f32 %v2657_v63 }
 0x933   :  { %v4733_v2 = vpop.eup %4732 }
 0x934   :  { %v4735_v40 = vpop.eup %4734  ;;  %v2650_v47 = vmul.f32 0.5, %v4733_v2 }
 0x935   :  { %v2651_v10 = vmul.f32 0.5, %v4735_v40  ;;  %v4737_v5 = vpop.eup %4736 }
 0x936   :  { %v2652_v30 = vadd.f32 0.5, %v2650_v47  ;;  %v4739_v6 = vpop.eup %4738  ;;  %v2660_v9 = vmul.f32 0.5, %v4737_v5 }
 0x937   :  { %v2653_v23 = vadd.f32 0.5, %v2651_v10  ;;  %v2661_v26 = vmul.f32 0.5, %v4739_v6 }
 0x938   :  { %v2662_v25 = vadd.f32 0.5, %v2660_v9 }
 0x939   :  { %v2663_v33 = vadd.f32 0.5, %v2661_v26 }
 0x93a   :  { %v2670_v14 = vsub.f32 1.0, %v2662_v25  ;;  %v2674_v40 = vmul.f32 %v2662_v25, %v6070_v3 }
 0x93b   :  { %v2671_v63 = vsub.f32 1.0, %v2663_v33  ;;  %v2675_v10 = vmul.f32 %v2663_v33, %v6072_v54 }
 0x964   :  { %v2639_v49 = vpop.f32.mrb[34].mxu0 }
 0x965   :  { %v2640_v20 = vadd.f32 %v2639_v49, %v7021_v50  ;;  %v2641_v38 = vpop.f32.mrb[35].mxu0 }
 0x966   :  { %v2642_v55 = vadd.f32 %v2641_v38, %v6706_v29 }
 0x967   :  { %v2664_v4 = vmul.f32 %v2652_v30, %v2640_v20 }
 0x968   :  { %v2665_v57 = vmul.f32 %v2653_v23, %v2642_v55 }
 0x969   :  { %v2666_v11 = vadd.f32 %v2664_v4, %v7022_v44 }
 0x96a   :  { %v2667_v53 = vadd.f32 %v2665_v57, %v7023_v18 }
 0x96b   :  { %4740 = vtanh.f32 %v2666_v11 }
 0x96c   :  { %4742 = vtanh.f32 %v2667_v53 }
 0x975   :  { %v4741_v56 = vpop.eup %4740 }
 0x976   :  { %v4743_v2 = vpop.eup %4742  ;;  %v2672_v47 = vmul.f32 %v4741_v56, %v2670_v14 }
 0x977   :  { %v2673_v49 = vmul.f32 %v4743_v2, %v2671_v63 }
 0x978   :  { %v6185_v20 = vadd.f32 %v2674_v40, %v2672_v47 }
 0x979   :  { %v6187_v30 = vadd.f32 %v2675_v10, %v2673_v49 }
 0x97b   :  { %2751 = vmatprep.mubr.f32.mxu1 %v6187_v30  ;;  %2822 = vmatprep.mubr.f32.mxu0 %v6187_v30 }
 0x97c   :  { %2752 = vmatmul.mubr.f32.vlgmr.msra.gmra.mrb[10].mxu1 %v6185_v20  ;;  %2823 = vmatmul.mubr.f32.vlgmr.msra.gmra.mrb[26].mxu0 %v6185_v20 }
 0x97d   :  { %4524 = vmatpush1.bf16.msra.mxu1 %v6644_v0  ;;  %2893 = vmatprep.mubr.f32.mxu1 %v6187_v30 }
 0x97e   :  { %4526 = vmatprep.subr.bf16.mxu1 %v6645_v60 }
 0x981   :  { %4528 = vmatpush1.bf16.msra.mxu1 %v6646_v35 }
 0x982   :  { %4530 = vmatprep.subr.bf16.mxu1 %v6647_v17 }
 0x985   :  { %4532 = vmatpush1.bf16.msra.mxu1 %v5234_v41 }
 0x986   :  { %4534 = vmatprep.subr.bf16.mxu1 %v5240_v51 }
 0x989   :  { %4536 = vmatpush1.bf16.msra.mxu1 %v5246_v27 }
 0x98a   :  { %4538 = vmatprep.subr.bf16.mxu1 %v5252_v46 }
 0x98d   :  { %4540 = vmatpush1.bf16.msra.mxu1 %v5258_v36 }
 0x98e   :  { %4542 = vmatprep.subr.bf16.mxu1 %v6648_v34 }
 0x991   :  { %4544 = vmatpush1.bf16.msra.mxu1 %v5266_v42 }
 0x992   :  { %4546 = vmatprep.subr.bf16.mxu1 %v5269_v7 }
 0x995   :  { %4548 = vmatpush1.bf16.msra.mxu1 %v5274_v8 }
 0x996   :  { %4550 = vmatprep.subr.bf16.mxu1 %v5278_v16 }
 0x999   :  { %4552 = vmatpush1.bf16.msra.mxu1 %v5282_v24 }
 0x99a   :  { %4554 = vmatprep.subr.bf16.mxu1 %v5286_v52 }
 0x99d   :  { %4556 = vmatpush1.bf16.msra.mxu1 %v5290_v61 }
 0x99e   :  { %4558 = vmatprep.subr.bf16.mxu1 %v5294_v62 }
 0x9a1   :  { %4560 = vmatpush1.bf16.msra.mxu1 %v5298_v12 }
 0x9a2   :  { %4562 = vmatprep.subr.bf16.mxu1 %v5302_v58 }
 0x9a5   :  { %4564 = vmatpush1.bf16.msra.mxu1 %v6962_v13 }
 0x9a6   :  { %4566 = vmatprep.subr.bf16.mxu1 %v6963_v48 }
 0x9a9   :  { %4568 = vmatpush1.bf16.msra.mxu1 %v6966_v37 }
 0x9aa   :  { %4570 = vmatprep.subr.bf16.mxu1 %v6967_v59  ;;  %v7024_v59 = vld [vmem:[#allocation107_spill] sm:$0xff] }
 0x9ad   :  { %4572 = vmatpush1.bf16.msra.mxu1 %v6970_v1 }
 0x9ae   :  { %4574 = vmatprep.subr.bf16.mxu1 %v6971_v45 }
 0x9b1   :  { %4576 = vmatpush1.bf16.msra.mxu1 %v6974_v43  ;;  %v7025_v43 = vld [vmem:[#allocation108_spill] sm:$0xff] }
 0x9b2   :  { %4578 = vmatprep.subr.bf16.mxu1 %v6975_v32 }
 0x9b5   :  { %4580 = vmatpush1.bf16.msra.mxu1 %v6978_v19 }
 0x9b6   :  { %4582 = vmatprep.subr.bf16.mxu1 %v6979_v39 }
 0x9b9   :  { %4584 = vmatpush1.bf16.msra.mxu1 %v6982_v28 }
 0x9bc   :  { %2894 = vmatmul.mubr.f32.vlgmr.msra.gmra.mrb[38].mxu1 %v6185_v20 }
 0xa4f   :  { %v2753_v61 = vpop.f32.mrb[10].mxu1  ;;  %v2824_v12 = vpop.f32.mrb[26].mxu0 }
 0xa50   :  { %v2755_v41 = vpop.f32.mrb[11].mxu1  ;;  %v2826_v51 = vpop.f32.mrb[27].mxu0  ;;  %v4607_v27 = vadd.f32 %v2753_v61, %v7017_v21  ;;  %v4623_v42 = vadd.f32 %v2824_v12, %v7019_v31 }
 0xa51   :  { %v4608_v46 = vadd.f32 %v2755_v41, %v7018_v15  ;;  %v4624_v7 = vadd.f32 %v2826_v51, %v7020_v22 }
 0xa52   :  { %v2902_v36 = vmul.f32 0.5, %v4607_v27  ;;  %v2912_v8 = vmul.f32 0.5, %v4623_v42 }
 0xa53   :  { %v2903_v24 = vmul.f32 0.5, %v4608_v46  ;;  %v2913_v16 = vmul.f32 0.5, %v4624_v7 }
 0xa54   :  { %4744 = vtanh.f32 %v2902_v36 }
 0xa55   :  { %4746 = vtanh.f32 %v2903_v24 }
 0xa56   :  { %4748 = vtanh.f32 %v2912_v8 }
 0xa57   :  { %4750 = vtanh.f32 %v2913_v16 }
 0xa5e   :  { %v4745_v52 = vpop.eup %4744 }
 0xa5f   :  { %v4747_v62 = vpop.eup %4746  ;;  %v2906_v58 = vmul.f32 0.5, %v4745_v52 }
 0xa60   :  { %v2907_v0 = vmul.f32 0.5, %v4747_v62  ;;  %v4749_v37 = vpop.eup %4748 }
 0xa61   :  { %v2908_v17 = vadd.f32 0.5, %v2906_v58  ;;  %v4751_v45 = vpop.eup %4750  ;;  %v2916_v19 = vmul.f32 0.5, %v4749_v37 }
 0xa62   :  { %v2909_v54 = vadd.f32 0.5, %v2907_v0  ;;  %v2917_v39 = vmul.f32 0.5, %v4751_v45 }
 0xa63   :  { %v2918_v28 = vadd.f32 0.5, %v2916_v19 }
 0xa64   :  { %v2919_v21 = vadd.f32 0.5, %v2917_v39 }
 0xa65   :  { %v2926_v15 = vsub.f32 1.0, %v2918_v28 }
 0xa66   :  { %v2927_v22 = vsub.f32 1.0, %v2919_v21  ;;  %v2931_v55 = vmul.f32 %v2919_v21, %v6187_v30 }
 0xa8f   :  { %v2895_v60 = vpop.f32.mrb[38].mxu1 }
 0xa90   :  { %v2896_v35 = vadd.f32 %v2895_v60, %v7021_v50  ;;  %v2897_v34 = vpop.f32.mrb[39].mxu1 }
 0xa91   :  { %v2898_v3 = vadd.f32 %v2897_v34, %v6706_v29  ;;  %v2930_v29 = vmul.f32 %v2918_v28, %v6185_v20 }
 0xa92   :  { %v2920_v13 = vmul.f32 %v2908_v17, %v2896_v35 }
 0xa93   :  { %v2921_v48 = vmul.f32 %v2909_v54, %v2898_v3 }
 0xa94   :  { %v2922_v1 = vadd.f32 %v2920_v13, %v7024_v59 }
 0xa95   :  { %v2923_v32 = vadd.f32 %v2921_v48, %v7025_v43 }
 0xa96   :  { %4752 = vtanh.f32 %v2922_v1 }
 0xa97   :  { %4754 = vtanh.f32 %v2923_v32 }
 0xaa0   :  { %v4753_v31 = vpop.eup %4752 }
 0xaa1   :  { %v4755_v50 = vpop.eup %4754  ;;  %v2928_v38 = vmul.f32 %v4753_v31, %v2926_v15 }
 0xaa2   :  { %v2929_v23 = vmul.f32 %v4755_v50, %v2927_v22 }
 0xaa3   :  { %v2932_v4 = vadd.f32 %v2930_v29, %v2928_v38 }
 0xaa4   :  { %v2933_v57 = vadd.f32 %v2931_v55, %v2929_v23 }
 0xaa5   :  { %2934 = vst [vmem:[#allocation8] sm:$0xff] %v2932_v4 }
 0xaa6   :  { %2935 = vst [vmem:[#allocation8 + $0x8] sm:$0xff] %v2933_v57 }
 0xaa7   :  { %4811 = shalt.err (!%p4808_p6)
}
 0xaa8   :  { %s4812_s27 = scalar_lea.hbm %s6255_s7, 256 }
 0xaa9   :  { %p4813_p7 = scmp.ne.s32.totalorder %s6255_s7, %s4812_s27  ;;  %p4816_p8 = scmp.lt.u32.totalorder %s4812_s27, %s6255_s7 }
 0xaab   :  { %p4818_p9 = pnand %p4816_p8, %p4813_p7 }
 0xaad   :  { %4821 = shalt.err (!%p4818_p9)
}
 0xaae   :  { %2945 = dma.vmem_to_hbm [thread:$0]  %s2943_s24, 256, %s6255_s7, [#allocation5]  }
 0xaaf   :  { %4826 = dma.done.wait [#allocation5], 256  }
 0xab0   :  { %4827 = vsyncadd [#allocation5], 4294967040 }
 0xab1   :  { %2949 = vsyncpa [#allocation4], 1 }
 0xab2   :  { %2950 = vsyncpa [#allocation7], 1 }
 0xab3   :  { %2951 = vsyncpa [#allocation5], 1 }

</bundles_post_ra>
